<compile_context>
chip_gen: v7x
topology: tpu7x:2x2x1
jax: 0.10.0
libtpu: 0.0.40
codegen_flags: <defaults>
</compile_context>

<pallas_src>
import math

import jax
import jax.numpy as jnp
from jax.experimental import pallas as pl
from jax.experimental.pallas import tpu as pltpu

_EPS = 1e-5
_LANE = 128    # TPU vreg lane width: channels are padded to a multiple of this
_LPAD = 8      # left halo width -> interior stores stay sublane-aligned (offset 8)


def _round_up(x, m):
    return (x + m - 1) // m * m


# ---------------------------------------------------------------------------
# Fused kernel.  grid = (3 phases, batch tiles); phases run sequentially:
#   phase 0: conv1 per tile -> acc scratch (whole batch); accumulate BN1 sum/sq
#   phase 1: finalize BN1 (once); BN1+ReLU+conv2 per tile -> acc; accumulate BN2 sum/sq
#   phase 2: finalize BN2 (once); BN2 + residual + ReLU -> output tile
# Nothing round-trips HBM between the two conv stages.
# ---------------------------------------------------------------------------
def _fused_resblock_kernel(x_ref, w1_ref, g1_ref, b1_ref, w2_ref, g2_ref, b2_ref,
                           o_ref, ws_ref, acc_ref,
                           sum_ref, sq_ref, scale_ref, shift_ref):
    phase = pl.program_id(0)
    bidx = pl.program_id(1)
    bt, H, W, CP = x_ref.shape
    B = acc_ref.shape[0]
    rows = bt * H * W
    inv_n = 1.0 / float(B * H * W)          # full-batch BN row count (static)
    b0 = pl.multiple_of(bidx * bt, bt)

    # ---- helpers -----------------------------------------------------------
    def put_tile(val):
        """Place a (bt,H,W,CP) tile into the zero-bordered workspace interior.
        Interior starts at sublane offset _LPAD (=8) -> aligned store; the zero
        halo (written once at grid start) is never touched again."""
        ws_ref[:, 1:H + 1, _LPAD:_LPAD + W, :] = val.astype(ws_ref.dtype)

    def conv3x3(w_ref):
        """3x3 'same' conv of the workspace tile as 3 accumulating MXU dots
        grouped by ky: patch (rows, 3*CP) in matmul dtype vs weight rows
        [3*ky*CP : 3*(ky+1)*CP].  Accumulation stays f32."""
        acc = None
        for ky in range(3):
            cols = [ws_ref[:, ky:ky + H, _LPAD - 1 + kx:_LPAD - 1 + kx + W, :]
                    .reshape(rows, CP).astype(w_ref.dtype) for kx in range(3)]
            patch = jnp.concatenate(cols, axis=1)              # (rows, 3*CP)
            part = jnp.dot(patch, w_ref[ky * 3 * CP:(ky + 1) * 3 * CP, :],
                           preferred_element_type=jnp.float32)
            acc = part if acc is None else acc + part
        return acc                                             # (rows, CP) f32

    def zero_stats():
        sum_ref[...] = jnp.zeros_like(sum_ref)
        sq_ref[...] = jnp.zeros_like(sq_ref)

    def add_stats(y):
        sum_ref[...] += jnp.sum(y, axis=0, keepdims=True)
        sq_ref[...] += jnp.sum(y * y, axis=0, keepdims=True)

    def finalize_bn(g_ref, beta_ref):
        """Training-mode BatchNorm (batch stats, biased var) folded into a
        per-channel scale/shift FMA from the accumulated sum / sum-of-squares."""
        mean = sum_ref[...] * inv_n
        var = jnp.maximum(sq_ref[...] * inv_n - mean * mean, 0.0)
        scale = g_ref[...] * jax.lax.rsqrt(var + _EPS)
        scale_ref[...] = scale
        shift_ref[...] = beta_ref[...] - mean * scale

    # ---- one-time init: zero halo workspace + BN accumulators ---------------
    @pl.when(jnp.logical_and(phase == 0, bidx == 0))
    def _():
        ws_ref[...] = jnp.zeros_like(ws_ref)
        zero_stats()

    # ---- phase 0: conv1 + BN1 stats -----------------------------------------
    @pl.when(phase == 0)
    def _():
        put_tile(x_ref[...])
        y = conv3x3(w1_ref)
        acc_ref[pl.ds(b0, bt), :, :, :] = y.reshape(bt, H, W, CP)
        add_stats(y)

    # ---- phase 1: finalize BN1 (once), BN1+ReLU+conv2 + BN2 stats ------------
    @pl.when(jnp.logical_and(phase == 1, bidx == 0))
    def _():
        finalize_bn(g1_ref, b1_ref)
        zero_stats()                       # reuse accumulators for stage 2

    @pl.when(phase == 1)
    def _():
        h = acc_ref[pl.ds(b0, bt), :, :, :].reshape(rows, CP)
        h = jnp.maximum(h * scale_ref[...] + shift_ref[...], 0.0)
        put_tile(h.reshape(bt, H, W, CP))
        y = conv3x3(w2_ref)
        acc_ref[pl.ds(b0, bt), :, :, :] = y.reshape(bt, H, W, CP)
        add_stats(y)

    # ---- phase 2: finalize BN2 (once), BN2 + residual + ReLU -----------------
    @pl.when(jnp.logical_and(phase == 2, bidx == 0))
    def _():
        finalize_bn(g2_ref, b2_ref)

    @pl.when(phase == 2)
    def _():
        y = acc_ref[pl.ds(b0, bt), :, :, :].reshape(rows, CP)
        y = y * scale_ref[...] + shift_ref[...] + x_ref[...].reshape(rows, CP)
        o_ref[...] = jnp.maximum(y, 0.0).reshape(bt, H, W, CP).astype(o_ref.dtype)


# ---------------------------------------------------------------------------
# Packing helpers + NHWC fast path (keep this layout across stacked blocks)
# ---------------------------------------------------------------------------
def pack_params(params, matmul_dtype=jnp.bfloat16):
    """(w1,g1,b1,w2,g2,b2) -> lane-padded kernel operands.
    w*: (9, Cin, Cout) with tap index k = ky*3+kx; g*/b*: (1, C)."""
    w1, g1, b1, w2, g2, b2 = params
    C = w1.shape[1]
    CP = max(_round_up(C, _LANE), _LANE)

    def pack_w(w):    # (9, C, C) -> (9*CP, CP) : K-dense matmul operand
        wp = jnp.pad(w, ((0, 0), (0, CP - C), (0, CP - C)))
        return wp.reshape(9 * CP, CP).astype(matmul_dtype)

    def pack_p(v):    # (1, C) -> (1, CP), f32 (BN math stays f32 on all parts)
        return jnp.pad(v, ((0, 0), (0, CP - C))).astype(jnp.float32)

    packed = (pack_w(w1), pack_p(g1), pack_p(b1),
              pack_w(w2), pack_p(g2), pack_p(b2))
    return packed, C, CP


def _pick_batch_tile(B, H, W, CP, requested):
    if requested is not None:
        bt = int(requested)
    else:
        # Target ~2 MiB f32 per streamed x/out block (amortizes per-step overhead;
        # acc scratch, not the block size, is what holds the whole batch).
        bt = max(1, (2 * 1024 * 1024) // (H * W * CP * 4))
    bt = max(1, min(bt, B))
    while B % bt:
        bt -= 1
    return bt


def resnet_block_nhwc(x_nhwc, packed, *, batch_tile=None):
    """Fused ResNetBlock on NHWC, lane-padded activations (B,H,W,CP), CP % 128 == 0."""
    w1p, g1p, b1p, w2p, g2p, b2p = packed
    matmul_dtype = w1p.dtype
    mb = jnp.dtype(matmul_dtype).itemsize
    B, H, W, CP = x_nhwc.shape

    bt = _pick_batch_tile(B, H, W, CP, batch_tile)
    nb = B // bt
    grid = (3, nb)                                        # (phase, batch tile)

    ws_w = _round_up(_LPAD + W + 1, 8)                    # shrunk halo workspace width

    def x_map(p, b):
        # x is read in phases 0 and 2 only; during phase 1 pin the block index to
        # the last fetched one so no x DMA is issued for an unused phase.
        return (jnp.where(p == 1, nb - 1, b), 0, 0, 0)

    def const_map(p, b):                                  # fetched once, resident
        return (0, 0)

    in_specs = [
        pl.BlockSpec((bt, H, W, CP), x_map),                                   # x
        pl.BlockSpec((9 * CP, CP), const_map), pl.BlockSpec((1, CP), const_map),
        pl.BlockSpec((1, CP), const_map),                                      # w1,g1,b1
        pl.BlockSpec((9 * CP, CP), const_map), pl.BlockSpec((1, CP), const_map),
        pl.BlockSpec((1, CP), const_map),                                      # w2,g2,b2
    ]
    # Output tiles are produced only in phase 2; keep the block index pinned at 0
    # during phases 0/1 (index changes only once phase 2, b=0 has written it), so
    # no uninitialized buffer is ever flushed to HBM.
    out_spec = pl.BlockSpec((bt, H, W, CP),
                            lambda p, b: (b * jnp.maximum(p - 1, 0), 0, 0, 0))

    scratch_shapes = [
        pltpu.VMEM((bt, H + 2, ws_w, CP), jnp.float32),   # zero-halo conv workspace
        pltpu.VMEM((B, H, W, CP), jnp.float32),           # full-batch pre-BN conv output
        pltpu.VMEM((1, CP), jnp.float32),                 # BN per-channel sum
        pltpu.VMEM((1, CP), jnp.float32),                 # BN per-channel sum-of-squares
        pltpu.VMEM((1, CP), jnp.float32),                 # folded BN scale
        pltpu.VMEM((1, CP), jnp.float32),                 # folded BN shift
    ]

    # VMEM budget: acc + workspace + double-buffered x/out blocks + double-buffered
    # bf16 weights + per-ky conv temporaries, capped below the physical VMEM of the
    # current part (64 MiB/TC on v7x, 128 MiB on v5e/v6e).
    acc_b = B * H * W * CP * 4
    ws_b = bt * (H + 2) * ws_w * CP * 4
    blk_b = bt * H * W * CP * 4
    wt_b = 9 * CP * CP * mb
    tmp_b = bt * H * W * CP * (3 * mb + 4)                # ky-group patch + f32 result
    est = acc_b + ws_b + 4 * blk_b + 4 * wt_b + 2 * tmp_b + 16 * CP * 4
    try:
        vmem_cap = int(pltpu.get_tpu_info().vmem_capacity_bytes)
    except Exception:
        vmem_cap = 64 * 1024 * 1024                       # conservative (v7x-safe)
    if vmem_cap <= 0:
        vmem_cap = 64 * 1024 * 1024
    vmem_limit = int(min(max(2 * est, 32 * 1024 * 1024), int(0.85 * vmem_cap)))
    # TODO(synk): if acc_b alone approaches vmem_cap, switch to an HBM-streamed
    # two-pass BN variant (acc in pl.ANY, same per-tile sum/sq accumulators).

    cost = pl.CostEstimate(
        flops=2 * 2 * B * H * W * 9 * CP * CP,            # two 3x3 convs
        transcendentals=2 * CP,                            # two rsqrt finalizes
        bytes_accessed=3 * B * H * W * CP * 4 + 2 * 9 * CP * CP * mb,
    )

    compiler_params = pltpu.CompilerParams(
        dimension_semantics=("arbitrary", "arbitrary"),   # sequential: shared VMEM stats
        vmem_limit_bytes=vmem_limit,
    )

    return pl.pallas_call(
        _fused_resblock_kernel,
        out_shape=jax.ShapeDtypeStruct((B, H, W, CP), jnp.float32),
        grid=grid,
        in_specs=in_specs,
        out_specs=out_spec,
        scratch_shapes=scratch_shapes,
        compiler_params=compiler_params,
        cost_estimate=cost,
    )(x_nhwc, w1p, g1p, b1p, w2p, g2p, b2p)


# ---------------------------------------------------------------------------
# NCHW entry point (PyTorch layout).  For stacked ResNet blocks prefer keeping
# activations NHWC / lane-padded and calling resnet_block_nhwc directly.
# ---------------------------------------------------------------------------
def resnet_block_forward(x_nchw, params, *, batch_tile=None, matmul_dtype=jnp.bfloat16):
    packed, C, CP = pack_params(params, matmul_dtype)
    B, _, H, W = x_nchw.shape
    x = jnp.transpose(x_nchw, (0, 2, 3, 1))                          # NCHW -> NHWC
    x = jnp.pad(x, ((0, 0), (0, 0), (0, 0), (0, CP - C)))            # lane padding
    out = resnet_block_nhwc(x, packed, batch_tile=batch_tile)
    return jnp.transpose(out[..., :C], (0, 3, 1, 2))                 # NHWC -> NCHW


# ---------------------------------------------------------------------------
# Deterministic parameter init (shapes from ResNetBlock.__init__)
# ---------------------------------------------------------------------------
def init_params(key, num_planes):
    C = num_planes
    keys = jax.random.split(key, 6)
    scale = 1.0 / math.sqrt(9 * C)

    def conv_w(k):
        # PyTorch weight layout (Cout, Cin, 3, 3) -> packed (9, Cin, Cout), k = ky*3+kx.
        w_t = jax.random.normal(k, (C, C, 3, 3), jnp.float32) * scale
        return jnp.transpose(w_t, (2, 3, 1, 0)).reshape(9, C, C)

    w1 = conv_w(keys[0])
    w2 = conv_w(keys[1])
    g1 = 1.0 + 0.1 * jax.random.normal(keys[2], (1, C), jnp.float32)
    b1 = 0.1 * jax.random.normal(keys[3], (1, C), jnp.float32)
    g2 = 1.0 + 0.1 * jax.random.normal(keys[4], (1, C), jnp.float32)
    b2 = 0.1 * jax.random.normal(keys[5], (1, C), jnp.float32)
    return (w1, g1, b1, w2, g2, b2)


# ---------------------------------------------------------------------------
# Pure-JAX reference (same semantics) for the correctness check
# ---------------------------------------------------------------------------
def ref_block(x_nchw, params):
    w1, g1, b1, w2, g2, b2 = params
    C = x_nchw.shape[1]
    x = jnp.transpose(x_nchw, (0, 2, 3, 1))

    def conv_bn(inp, w, g, b):
        y = jax.lax.conv_general_dilated(
            inp, w.reshape(3, 3, C, C), (1, 1), "SAME",
            dimension_numbers=("NHWC", "HWIO", "NHWC"))
        mean = y.mean(axis=(0, 1, 2), keepdims=True)
        var = ((y - mean) ** 2).mean(axis=(0, 1, 2), keepdims=True)
        return ((y - mean) * jax.lax.rsqrt(var + _EPS)
                * g.reshape(1, 1, 1, C) + b.reshape(1, 1, 1, C))

    o = jax.nn.relu(conv_bn(x, w1, g1, b1))
    o = conv_bn(o, w2, g2, b2) + x
    return jnp.transpose(jax.nn.relu(o), (0, 3, 1, 2))


# ---------------------------------------------------------------------------
if __name__ == "__main__":
    B, C, H, W = 2, 4, 16, 16          # num_planes = 4 (small test shapes)
    key = jax.random.PRNGKey(0)
    k_x, k_p = jax.random.split(key)

    x = jax.random.normal(k_x, (B, C, H, W), jnp.float32)
    params = init_params(k_p, C)

    fwd = jax.jit(resnet_block_forward, static_argnames=("batch_tile", "matmul_dtype"))

    # Production default (bf16 MXU inputs), batch_tile=1 -> 2 tiles exercises the grid.
    out_bf16 = jax.block_until_ready(fwd(x, params, batch_tile=1))
    assert out_bf16.shape == (B, C, H, W), out_bf16.shape

    # f32 MXU path, single batch tile -> tight numerical check of the fused pipeline.
    out_f32 = jax.block_until_ready(fwd(x, params, batch_tile=2, matmul_dtype=jnp.float32))

    ref = jax.block_until_ready(ref_block(x, params))
    err32 = float(jnp.max(jnp.abs(out_f32 - ref)))
    err16 = float(jnp.max(jnp.abs(out_bf16 - ref)))
    if not jnp.allclose(out_f32, ref, atol=2e-3, rtol=2e-3):
        raise AssertionError(f"f32 Pallas output mismatch vs reference, max_err={err32}")
    if not jnp.allclose(out_bf16, ref, atol=7.5e-2, rtol=7.5e-2):
        raise AssertionError(f"bf16 Pallas output mismatch vs reference, max_err={err16}")

    print("KERNEL_OK")
</pallas_src>

<mosaic_0001>
module attributes {stable_mosaic.version = 11 : i64} {
  func.func @_fused_resblock_kernel(%arg0: i32, %arg1: i32, %arg2: memref<1x16x16x128xf32, #tpu.memory_space<vmem>>, %arg3: memref<1152x128xbf16, #tpu.memory_space<vmem>>, %arg4: memref<1x128xf32, #tpu.memory_space<vmem>>, %arg5: memref<1x128xf32, #tpu.memory_space<vmem>>, %arg6: memref<1152x128xbf16, #tpu.memory_space<vmem>>, %arg7: memref<1x128xf32, #tpu.memory_space<vmem>>, %arg8: memref<1x128xf32, #tpu.memory_space<vmem>>, %arg9: memref<1x16x16x128xf32, #tpu.memory_space<vmem>>, %arg10: memref<1x18x32x128xf32, #tpu.memory_space<vmem>>, %arg11: memref<2x16x16x128xf32, #tpu.memory_space<vmem>>, %arg12: memref<1x128xf32, #tpu.memory_space<vmem>>, %arg13: memref<1x128xf32, #tpu.memory_space<vmem>>, %arg14: memref<1x128xf32, #tpu.memory_space<vmem>>, %arg15: memref<1x128xf32, #tpu.memory_space<vmem>>) attributes {dimension_semantics = [#tpu.dimension_semantics<arbitrary>, #tpu.dimension_semantics<arbitrary>], iteration_bounds = array<i64: 3, 2>, scalar_prefetch = 0 : i64, scratch_operands = 6 : i64, tpu.core_type = #tpu.core_type<tc>, window_params = [{transform_indices = @transform_0, window_bounds = array<i64: 1, 16, 16, 128>}, {pipeline_mode = #tpu.pipeline_mode<synchronous>, transform_indices = @transform_1, window_bounds = array<i64: 1152, 128>}, {pipeline_mode = #tpu.pipeline_mode<synchronous>, transform_indices = @transform_2, window_bounds = array<i64: 1, 128>}, {pipeline_mode = #tpu.pipeline_mode<synchronous>, transform_indices = @transform_3, window_bounds = array<i64: 1, 128>}, {pipeline_mode = #tpu.pipeline_mode<synchronous>, transform_indices = @transform_4, window_bounds = array<i64: 1152, 128>}, {pipeline_mode = #tpu.pipeline_mode<synchronous>, transform_indices = @transform_5, window_bounds = array<i64: 1, 128>}, {pipeline_mode = #tpu.pipeline_mode<synchronous>, transform_indices = @transform_6, window_bounds = array<i64: 1, 128>}, {transform_indices = @transform_7, window_bounds = array<i64: 1, 16, 16, 128>}]} {
    %c1_i32 = arith.constant 1 : i32
    %0 = arith.muli %arg1, %c1_i32 : i32
    %1 = tpu.assume_multiple %0, 1 : i32
    %c0_i32 = arith.constant 0 : i32
    %2 = arith.cmpi eq, %arg0, %c0_i32 : i32
    %c0_i32_0 = arith.constant 0 : i32
    %3 = arith.cmpi eq, %arg1, %c0_i32_0 : i32
    %4 = arith.andi %2, %3 : i1
    %5 = arith.extui %4 : i1 to i32
    %c0_i32_1 = arith.constant 0 : i32
    %6 = arith.cmpi ne, %5, %c0_i32_1 : i32
    scf.if %6 {
      %cst = arith.constant 0.000000e+00 : f32
      %26 = vector.broadcast %cst : f32 to vector<1x18x32x128xf32>
      %c0 = arith.constant 0 : index
      %c0_13 = arith.constant 0 : index
      %c0_14 = arith.constant 0 : index
      %c0_15 = arith.constant 0 : index
      %27 = vector.load %arg10[%c0, %c0_13, %c0_14, %c0_15] : memref<1x18x32x128xf32, #tpu.memory_space<vmem>>, vector<1x18x32x128xf32>
      tpu.vector_store %arg10[%c0, %c0_13, %c0_14, %c0_15], %26 {strides = array<i32>} : memref<1x18x32x128xf32, #tpu.memory_space<vmem>>, vector<1x18x32x128xf32>,
      %cst_16 = arith.constant 0.000000e+00 : f32
      %28 = vector.broadcast %cst_16 : f32 to vector<1x128xf32>
      %c0_17 = arith.constant 0 : index
      %c0_18 = arith.constant 0 : index
      %29 = vector.load %arg12[%c0_17, %c0_18] : memref<1x128xf32, #tpu.memory_space<vmem>>, vector<1x128xf32>
      tpu.vector_store %arg12[%c0_17, %c0_18], %28 {strides = array<i32>} : memref<1x128xf32, #tpu.memory_space<vmem>>, vector<1x128xf32>,
      %cst_19 = arith.constant 0.000000e+00 : f32
      %30 = vector.broadcast %cst_19 : f32 to vector<1x128xf32>
      %c0_20 = arith.constant 0 : index
      %c0_21 = arith.constant 0 : index
      %31 = vector.load %arg13[%c0_20, %c0_21] : memref<1x128xf32, #tpu.memory_space<vmem>>, vector<1x128xf32>
      tpu.vector_store %arg13[%c0_20, %c0_21], %30 {strides = array<i32>} : memref<1x128xf32, #tpu.memory_space<vmem>>, vector<1x128xf32>,
    } else {
    }
    %c0_i32_2 = arith.constant 0 : i32
    %7 = arith.cmpi eq, %arg0, %c0_i32_2 : i32
    %8 = arith.extui %7 : i1 to i32
    %c0_i32_3 = arith.constant 0 : i32
    %9 = arith.cmpi ne, %8, %c0_i32_3 : i32
    scf.if %9 {
      %c0 = arith.constant 0 : index
      %c0_13 = arith.constant 0 : index
      %c0_14 = arith.constant 0 : index
      %c0_15 = arith.constant 0 : index
      %26 = vector.load %arg2[%c0, %c0_13, %c0_14, %c0_15] : memref<1x16x16x128xf32, #tpu.memory_space<vmem>>, vector<1x16x16x128xf32>
      %c0_16 = arith.constant 0 : index
      %c1 = arith.constant 1 : index
      %c8 = arith.constant 8 : index
      %c0_17 = arith.constant 0 : index
      %27 = vector.load %arg10[%c0_16, %c1, %c8, %c0_17] : memref<1x18x32x128xf32, #tpu.memory_space<vmem>>, vector<1x16x16x128xf32>
      tpu.vector_store %arg10[%c0_16, %c1, %c8, %c0_17], %26 {strides = array<i32>} : memref<1x18x32x128xf32, #tpu.memory_space<vmem>>, vector<1x16x16x128xf32>,
      %c0_18 = arith.constant 0 : index
      %c0_19 = arith.constant 0 : index
      %c7 = arith.constant 7 : index
      %c0_20 = arith.constant 0 : index
      %28 = vector.load %arg10[%c0_18, %c0_19, %c7, %c0_20] : memref<1x18x32x128xf32, #tpu.memory_space<vmem>>, vector<1x16x16x128xf32>
      %29 = vector.shape_cast %28 : vector<1x16x16x128xf32> to vector<256x128xf32>
      %30 = arith.truncf %29 : vector<256x128xf32> to vector<256x128xbf16>
      %c0_21 = arith.constant 0 : index
      %c0_22 = arith.constant 0 : index
      %c8_23 = arith.constant 8 : index
      %c0_24 = arith.constant 0 : index
      %31 = vector.load %arg10[%c0_21, %c0_22, %c8_23, %c0_24] : memref<1x18x32x128xf32, #tpu.memory_space<vmem>>, vector<1x16x16x128xf32>
      %32 = vector.shape_cast %31 : vector<1x16x16x128xf32> to vector<256x128xf32>
      %33 = arith.truncf %32 : vector<256x128xf32> to vector<256x128xbf16>
      %c0_25 = arith.constant 0 : index
      %c0_26 = arith.constant 0 : index
      %c9 = arith.constant 9 : index
      %c0_27 = arith.constant 0 : index
      %34 = vector.load %arg10[%c0_25, %c0_26, %c9, %c0_27] : memref<1x18x32x128xf32, #tpu.memory_space<vmem>>, vector<1x16x16x128xf32>
      %35 = vector.shape_cast %34 : vector<1x16x16x128xf32> to vector<256x128xf32>
      %36 = arith.truncf %35 : vector<256x128xf32> to vector<256x128xbf16>
      %37 = tpu.concatenate %30, %33, %36 in 1 : vector<256x128xbf16>, vector<256x128xbf16>, vector<256x128xbf16> -> vector<256x384xbf16>
      %c0_28 = arith.constant 0 : index
      %c0_29 = arith.constant 0 : index
      %38 = vector.load %arg3[%c0_28, %c0_29] : memref<1152x128xbf16, #tpu.memory_space<vmem>>, vector<384x128xbf16>
      %cst = arith.constant dense<0.000000e+00> : vector<256x128xf32>
      %39 = tpu.matmul %37, %38, %cst {dimension_numbers = #tpu.dot_dimension_numbers<[1], [0], [0], [1], [0, 0, 1, 1], [], []>} : vector<256x384xbf16>, vector<384x128xbf16>, vector<256x128xf32> -> vector<256x128xf32>
      %c0_30 = arith.constant 0 : index
      %c1_31 = arith.constant 1 : index
      %c7_32 = arith.constant 7 : index
      %c0_33 = arith.constant 0 : index
      %40 = vector.load %arg10[%c0_30, %c1_31, %c7_32, %c0_33] : memref<1x18x32x128xf32, #tpu.memory_space<vmem>>, vector<1x16x16x128xf32>
      %41 = vector.shape_cast %40 : vector<1x16x16x128xf32> to vector<256x128xf32>
      %42 = arith.truncf %41 : vector<256x128xf32> to vector<256x128xbf16>
      %c0_34 = arith.constant 0 : index
      %c1_35 = arith.constant 1 : index
      %c8_36 = arith.constant 8 : index
      %c0_37 = arith.constant 0 : index
      %43 = vector.load %arg10[%c0_34, %c1_35, %c8_36, %c0_37] : memref<1x18x32x128xf32, #tpu.memory_space<vmem>>, vector<1x16x16x128xf32>
      %44 = vector.shape_cast %43 : vector<1x16x16x128xf32> to vector<256x128xf32>
      %45 = arith.truncf %44 : vector<256x128xf32> to vector<256x128xbf16>
      %c0_38 = arith.constant 0 : index
      %c1_39 = arith.constant 1 : index
      %c9_40 = arith.constant 9 : index
      %c0_41 = arith.constant 0 : index
      %46 = vector.load %arg10[%c0_38, %c1_39, %c9_40, %c0_41] : memref<1x18x32x128xf32, #tpu.memory_space<vmem>>, vector<1x16x16x128xf32>
      %47 = vector.shape_cast %46 : vector<1x16x16x128xf32> to vector<256x128xf32>
      %48 = arith.truncf %47 : vector<256x128xf32> to vector<256x128xbf16>
      %49 = tpu.concatenate %42, %45, %48 in 1 : vector<256x128xbf16>, vector<256x128xbf16>, vector<256x128xbf16> -> vector<256x384xbf16>
      %c384 = arith.constant 384 : index
      %c0_42 = arith.constant 0 : index
      %50 = vector.load %arg3[%c384, %c0_42] : memref<1152x128xbf16, #tpu.memory_space<vmem>>, vector<384x128xbf16>
      %cst_43 = arith.constant dense<0.000000e+00> : vector<256x128xf32>
      %51 = tpu.matmul %49, %50, %cst_43 {dimension_numbers = #tpu.dot_dimension_numbers<[1], [0], [0], [1], [0, 0, 1, 1], [], []>} : vector<256x384xbf16>, vector<384x128xbf16>, vector<256x128xf32> -> vector<256x128xf32>
      %52 = arith.addf %39, %51 : vector<256x128xf32>
      %c0_44 = arith.constant 0 : index
      %c2 = arith.constant 2 : index
      %c7_45 = arith.constant 7 : index
      %c0_46 = arith.constant 0 : index
      %53 = vector.load %arg10[%c0_44, %c2, %c7_45, %c0_46] : memref<1x18x32x128xf32, #tpu.memory_space<vmem>>, vector<1x16x16x128xf32>
      %54 = vector.shape_cast %53 : vector<1x16x16x128xf32> to vector<256x128xf32>
      %55 = arith.truncf %54 : vector<256x128xf32> to vector<256x128xbf16>
      %c0_47 = arith.constant 0 : index
      %c2_48 = arith.constant 2 : index
      %c8_49 = arith.constant 8 : index
      %c0_50 = arith.constant 0 : index
      %56 = vector.load %arg10[%c0_47, %c2_48, %c8_49, %c0_50] : memref<1x18x32x128xf32, #tpu.memory_space<vmem>>, vector<1x16x16x128xf32>
      %57 = vector.shape_cast %56 : vector<1x16x16x128xf32> to vector<256x128xf32>
      %58 = arith.truncf %57 : vector<256x128xf32> to vector<256x128xbf16>
      %c0_51 = arith.constant 0 : index
      %c2_52 = arith.constant 2 : index
      %c9_53 = arith.constant 9 : index
      %c0_54 = arith.constant 0 : index
      %59 = vector.load %arg10[%c0_51, %c2_52, %c9_53, %c0_54] : memref<1x18x32x128xf32, #tpu.memory_space<vmem>>, vector<1x16x16x128xf32>
      %60 = vector.shape_cast %59 : vector<1x16x16x128xf32> to vector<256x128xf32>
      %61 = arith.truncf %60 : vector<256x128xf32> to vector<256x128xbf16>
      %62 = tpu.concatenate %55, %58, %61 in 1 : vector<256x128xbf16>, vector<256x128xbf16>, vector<256x128xbf16> -> vector<256x384xbf16>
      %c768 = arith.constant 768 : index
      %c0_55 = arith.constant 0 : index
      %63 = vector.load %arg3[%c768, %c0_55] : memref<1152x128xbf16, #tpu.memory_space<vmem>>, vector<384x128xbf16>
      %cst_56 = arith.constant dense<0.000000e+00> : vector<256x128xf32>
      %64 = tpu.matmul %62, %63, %cst_56 {dimension_numbers = #tpu.dot_dimension_numbers<[1], [0], [0], [1], [0, 0, 1, 1], [], []>} : vector<256x384xbf16>, vector<384x128xbf16>, vector<256x128xf32> -> vector<256x128xf32>
      %65 = arith.addf %52, %64 : vector<256x128xf32>
      %66 = vector.shape_cast %65 : vector<256x128xf32> to vector<1x16x16x128xf32>
      %67 = arith.index_cast %1 : i32 to index
      %c0_57 = arith.constant 0 : index
      %c0_58 = arith.constant 0 : index
      %c0_59 = arith.constant 0 : index
      %68 = vector.load %arg11[%67, %c0_57, %c0_58, %c0_59] : memref<2x16x16x128xf32, #tpu.memory_space<vmem>>, vector<1x16x16x128xf32>
      tpu.vector_store %arg11[%67, %c0_57, %c0_58, %c0_59], %66 {strides = array<i32>} : memref<2x16x16x128xf32, #tpu.memory_space<vmem>>, vector<1x16x16x128xf32>,
      %c0_60 = arith.constant 0 : index
      %c0_61 = arith.constant 0 : index
      %69 = vector.load %arg12[%c0_60, %c0_61] : memref<1x128xf32, #tpu.memory_space<vmem>>, vector<1x128xf32>
      %cst_62 = arith.constant dense<0.000000e+00> : vector<128xf32>
      %70 = vector.multi_reduction <add>, %65, %cst_62 [0] : vector<256x128xf32> to vector<128xf32>
      %71 = vector.shape_cast %70 : vector<128xf32> to vector<1x128xf32>
      %72 = arith.addf %69, %71 : vector<1x128xf32>
      %c0_63 = arith.constant 0 : index
      %c0_64 = arith.constant 0 : index
      %73 = vector.load %arg12[%c0_63, %c0_64] : memref<1x128xf32, #tpu.memory_space<vmem>>, vector<1x128xf32>
      tpu.vector_store %arg12[%c0_63, %c0_64], %72 {strides = array<i32>} : memref<1x128xf32, #tpu.memory_space<vmem>>, vector<1x128xf32>,
      %c0_65 = arith.constant 0 : index
      %c0_66 = arith.constant 0 : index
      %74 = vector.load %arg13[%c0_65, %c0_66] : memref<1x128xf32, #tpu.memory_space<vmem>>, vector<1x128xf32>
      %75 = arith.mulf %65, %65 : vector<256x128xf32>
      %cst_67 = arith.constant dense<0.000000e+00> : vector<128xf32>
      %76 = vector.multi_reduction <add>, %75, %cst_67 [0] : vector<256x128xf32> to vector<128xf32>
      %77 = vector.shape_cast %76 : vector<128xf32> to vector<1x128xf32>
      %78 = arith.addf %74, %77 : vector<1x128xf32>
      %c0_68 = arith.constant 0 : index
      %c0_69 = arith.constant 0 : index
      %79 = vector.load %arg13[%c0_68, %c0_69] : memref<1x128xf32, #tpu.memory_space<vmem>>, vector<1x128xf32>
      tpu.vector_store %arg13[%c0_68, %c0_69], %78 {strides = array<i32>} : memref<1x128xf32, #tpu.memory_space<vmem>>, vector<1x128xf32>,
    } else {
    }
    %c1_i32_4 = arith.constant 1 : i32
    %10 = arith.cmpi eq, %arg0, %c1_i32_4 : i32
    %c0_i32_5 = arith.constant 0 : i32
    %11 = arith.cmpi eq, %arg1, %c0_i32_5 : i32
    %12 = arith.andi %10, %11 : i1
    %13 = arith.extui %12 : i1 to i32
    %c0_i32_6 = arith.constant 0 : i32
    %14 = arith.cmpi ne, %13, %c0_i32_6 : i32
    scf.if %14 {
      %c0 = arith.constant 0 : index
      %c0_13 = arith.constant 0 : index
      %26 = vector.load %arg12[%c0, %c0_13] : memref<1x128xf32, #tpu.memory_space<vmem>>, vector<1x128xf32>
      %cst = arith.constant 0.001953125 : f32
      %27 = vector.broadcast %cst : f32 to vector<1x128xf32>
      %28 = arith.mulf %26, %27 : vector<1x128xf32>
      %c0_14 = arith.constant 0 : index
      %c0_15 = arith.constant 0 : index
      %29 = vector.load %arg13[%c0_14, %c0_15] : memref<1x128xf32, #tpu.memory_space<vmem>>, vector<1x128xf32>
      %cst_16 = arith.constant 0.001953125 : f32
      %30 = vector.broadcast %cst_16 : f32 to vector<1x128xf32>
      %31 = arith.mulf %29, %30 : vector<1x128xf32>
      %32 = arith.mulf %28, %28 : vector<1x128xf32>
      %33 = arith.subf %31, %32 : vector<1x128xf32>
      %cst_17 = arith.constant 0.000000e+00 : f32
      %34 = vector.broadcast %cst_17 : f32 to vector<1x128xf32>
      %35 = arith.maximumf %33, %34 : vector<1x128xf32>
      %c0_18 = arith.constant 0 : index
      %c0_19 = arith.constant 0 : index
      %36 = vector.load %arg4[%c0_18, %c0_19] : memref<1x128xf32, #tpu.memory_space<vmem>>, vector<1x128xf32>
      %cst_20 = arith.constant 9.99999974E-6 : f32
      %37 = vector.broadcast %cst_20 : f32 to vector<1x128xf32>
      %38 = arith.addf %35, %37 : vector<1x128xf32>
      %39 = math.rsqrt %38 : vector<1x128xf32>
      %40 = arith.mulf %36, %39 : vector<1x128xf32>
      %c0_21 = arith.constant 0 : index
      %c0_22 = arith.constant 0 : index
      %41 = vector.load %arg14[%c0_21, %c0_22] : memref<1x128xf32, #tpu.memory_space<vmem>>, vector<1x128xf32>
      tpu.vector_store %arg14[%c0_21, %c0_22], %40 {strides = array<i32>} : memref<1x128xf32, #tpu.memory_space<vmem>>, vector<1x128xf32>,
      %c0_23 = arith.constant 0 : index
      %c0_24 = arith.constant 0 : index
      %42 = vector.load %arg5[%c0_23, %c0_24] : memref<1x128xf32, #tpu.memory_space<vmem>>, vector<1x128xf32>
      %43 = arith.mulf %28, %40 : vector<1x128xf32>
      %44 = arith.subf %42, %43 : vector<1x128xf32>
      %c0_25 = arith.constant 0 : index
      %c0_26 = arith.constant 0 : index
      %45 = vector.load %arg15[%c0_25, %c0_26] : memref<1x128xf32, #tpu.memory_space<vmem>>, vector<1x128xf32>
      tpu.vector_store %arg15[%c0_25, %c0_26], %44 {strides = array<i32>} : memref<1x128xf32, #tpu.memory_space<vmem>>, vector<1x128xf32>,
      %cst_27 = arith.constant 0.000000e+00 : f32
      %46 = vector.broadcast %cst_27 : f32 to vector<1x128xf32>
      %c0_28 = arith.constant 0 : index
      %c0_29 = arith.constant 0 : index
      %47 = vector.load %arg12[%c0_28, %c0_29] : memref<1x128xf32, #tpu.memory_space<vmem>>, vector<1x128xf32>
      tpu.vector_store %arg12[%c0_28, %c0_29], %46 {strides = array<i32>} : memref<1x128xf32, #tpu.memory_space<vmem>>, vector<1x128xf32>,
      %cst_30 = arith.constant 0.000000e+00 : f32
      %48 = vector.broadcast %cst_30 : f32 to vector<1x128xf32>
      %c0_31 = arith.constant 0 : index
      %c0_32 = arith.constant 0 : index
      %49 = vector.load %arg13[%c0_31, %c0_32] : memref<1x128xf32, #tpu.memory_space<vmem>>, vector<1x128xf32>
      tpu.vector_store %arg13[%c0_31, %c0_32], %48 {strides = array<i32>} : memref<1x128xf32, #tpu.memory_space<vmem>>, vector<1x128xf32>,
    } else {
    }
    %c1_i32_7 = arith.constant 1 : i32
    %15 = arith.cmpi eq, %arg0, %c1_i32_7 : i32
    %16 = arith.extui %15 : i1 to i32
    %c0_i32_8 = arith.constant 0 : i32
    %17 = arith.cmpi ne, %16, %c0_i32_8 : i32
    scf.if %17 {
      %26 = arith.index_cast %1 : i32 to index
      %c0 = arith.constant 0 : index
      %c0_13 = arith.constant 0 : index
      %c0_14 = arith.constant 0 : index
      %27 = vector.load %arg11[%26, %c0, %c0_13, %c0_14] : memref<2x16x16x128xf32, #tpu.memory_space<vmem>>, vector<1x16x16x128xf32>
      %28 = vector.shape_cast %27 : vector<1x16x16x128xf32> to vector<256x128xf32>
      %c0_15 = arith.constant 0 : index
      %c0_16 = arith.constant 0 : index
      %29 = vector.load %arg14[%c0_15, %c0_16] : memref<1x128xf32, #tpu.memory_space<vmem>>, vector<1x128xf32>
      %30 = vector.broadcast %29 : vector<1x128xf32> to vector<256x128xf32>
      %31 = arith.mulf %28, %30 : vector<256x128xf32>
      %c0_17 = arith.constant 0 : index
      %c0_18 = arith.constant 0 : index
      %32 = vector.load %arg15[%c0_17, %c0_18] : memref<1x128xf32, #tpu.memory_space<vmem>>, vector<1x128xf32>
      %33 = vector.broadcast %32 : vector<1x128xf32> to vector<256x128xf32>
      %34 = arith.addf %31, %33 : vector<256x128xf32>
      %cst = arith.constant 0.000000e+00 : f32
      %35 = vector.broadcast %cst : f32 to vector<256x128xf32>
      %36 = arith.maximumf %34, %35 : vector<256x128xf32>
      %37 = vector.shape_cast %36 : vector<256x128xf32> to vector<1x16x16x128xf32>
      %c0_19 = arith.constant 0 : index
      %c1 = arith.constant 1 : index
      %c8 = arith.constant 8 : index
      %c0_20 = arith.constant 0 : index
      %38 = vector.load %arg10[%c0_19, %c1, %c8, %c0_20] : memref<1x18x32x128xf32, #tpu.memory_space<vmem>>, vector<1x16x16x128xf32>
      tpu.vector_store %arg10[%c0_19, %c1, %c8, %c0_20], %37 {strides = array<i32>} : memref<1x18x32x128xf32, #tpu.memory_space<vmem>>, vector<1x16x16x128xf32>,
      %c0_21 = arith.constant 0 : index
      %c0_22 = arith.constant 0 : index
      %c7 = arith.constant 7 : index
      %c0_23 = arith.constant 0 : index
      %39 = vector.load %arg10[%c0_21, %c0_22, %c7, %c0_23] : memref<1x18x32x128xf32, #tpu.memory_space<vmem>>, vector<1x16x16x128xf32>
      %40 = vector.shape_cast %39 : vector<1x16x16x128xf32> to vector<256x128xf32>
      %41 = arith.truncf %40 : vector<256x128xf32> to vector<256x128xbf16>
      %c0_24 = arith.constant 0 : index
      %c0_25 = arith.constant 0 : index
      %c8_26 = arith.constant 8 : index
      %c0_27 = arith.constant 0 : index
      %42 = vector.load %arg10[%c0_24, %c0_25, %c8_26, %c0_27] : memref<1x18x32x128xf32, #tpu.memory_space<vmem>>, vector<1x16x16x128xf32>
      %43 = vector.shape_cast %42 : vector<1x16x16x128xf32> to vector<256x128xf32>
      %44 = arith.truncf %43 : vector<256x128xf32> to vector<256x128xbf16>
      %c0_28 = arith.constant 0 : index
      %c0_29 = arith.constant 0 : index
      %c9 = arith.constant 9 : index
      %c0_30 = arith.constant 0 : index
      %45 = vector.load %arg10[%c0_28, %c0_29, %c9, %c0_30] : memref<1x18x32x128xf32, #tpu.memory_space<vmem>>, vector<1x16x16x128xf32>
      %46 = vector.shape_cast %45 : vector<1x16x16x128xf32> to vector<256x128xf32>
      %47 = arith.truncf %46 : vector<256x128xf32> to vector<256x128xbf16>
      %48 = tpu.concatenate %41, %44, %47 in 1 : vector<256x128xbf16>, vector<256x128xbf16>, vector<256x128xbf16> -> vector<256x384xbf16>
      %c0_31 = arith.constant 0 : index
      %c0_32 = arith.constant 0 : index
      %49 = vector.load %arg6[%c0_31, %c0_32] : memref<1152x128xbf16, #tpu.memory_space<vmem>>, vector<384x128xbf16>
      %cst_33 = arith.constant dense<0.000000e+00> : vector<256x128xf32>
      %50 = tpu.matmul %48, %49, %cst_33 {dimension_numbers = #tpu.dot_dimension_numbers<[1], [0], [0], [1], [0, 0, 1, 1], [], []>} : vector<256x384xbf16>, vector<384x128xbf16>, vector<256x128xf32> -> vector<256x128xf32>
      %c0_34 = arith.constant 0 : index
      %c1_35 = arith.constant 1 : index
      %c7_36 = arith.constant 7 : index
      %c0_37 = arith.constant 0 : index
      %51 = vector.load %arg10[%c0_34, %c1_35, %c7_36, %c0_37] : memref<1x18x32x128xf32, #tpu.memory_space<vmem>>, vector<1x16x16x128xf32>
      %52 = vector.shape_cast %51 : vector<1x16x16x128xf32> to vector<256x128xf32>
      %53 = arith.truncf %52 : vector<256x128xf32> to vector<256x128xbf16>
      %c0_38 = arith.constant 0 : index
      %c1_39 = arith.constant 1 : index
      %c8_40 = arith.constant 8 : index
      %c0_41 = arith.constant 0 : index
      %54 = vector.load %arg10[%c0_38, %c1_39, %c8_40, %c0_41] : memref<1x18x32x128xf32, #tpu.memory_space<vmem>>, vector<1x16x16x128xf32>
      %55 = vector.shape_cast %54 : vector<1x16x16x128xf32> to vector<256x128xf32>
      %56 = arith.truncf %55 : vector<256x128xf32> to vector<256x128xbf16>
      %c0_42 = arith.constant 0 : index
      %c1_43 = arith.constant 1 : index
      %c9_44 = arith.constant 9 : index
      %c0_45 = arith.constant 0 : index
      %57 = vector.load %arg10[%c0_42, %c1_43, %c9_44, %c0_45] : memref<1x18x32x128xf32, #tpu.memory_space<vmem>>, vector<1x16x16x128xf32>
      %58 = vector.shape_cast %57 : vector<1x16x16x128xf32> to vector<256x128xf32>
      %59 = arith.truncf %58 : vector<256x128xf32> to vector<256x128xbf16>
      %60 = tpu.concatenate %53, %56, %59 in 1 : vector<256x128xbf16>, vector<256x128xbf16>, vector<256x128xbf16> -> vector<256x384xbf16>
      %c384 = arith.constant 384 : index
      %c0_46 = arith.constant 0 : index
      %61 = vector.load %arg6[%c384, %c0_46] : memref<1152x128xbf16, #tpu.memory_space<vmem>>, vector<384x128xbf16>
      %cst_47 = arith.constant dense<0.000000e+00> : vector<256x128xf32>
      %62 = tpu.matmul %60, %61, %cst_47 {dimension_numbers = #tpu.dot_dimension_numbers<[1], [0], [0], [1], [0, 0, 1, 1], [], []>} : vector<256x384xbf16>, vector<384x128xbf16>, vector<256x128xf32> -> vector<256x128xf32>
      %63 = arith.addf %50, %62 : vector<256x128xf32>
      %c0_48 = arith.constant 0 : index
      %c2 = arith.constant 2 : index
      %c7_49 = arith.constant 7 : index
      %c0_50 = arith.constant 0 : index
      %64 = vector.load %arg10[%c0_48, %c2, %c7_49, %c0_50] : memref<1x18x32x128xf32, #tpu.memory_space<vmem>>, vector<1x16x16x128xf32>
      %65 = vector.shape_cast %64 : vector<1x16x16x128xf32> to vector<256x128xf32>
      %66 = arith.truncf %65 : vector<256x128xf32> to vector<256x128xbf16>
      %c0_51 = arith.constant 0 : index
      %c2_52 = arith.constant 2 : index
      %c8_53 = arith.constant 8 : index
      %c0_54 = arith.constant 0 : index
      %67 = vector.load %arg10[%c0_51, %c2_52, %c8_53, %c0_54] : memref<1x18x32x128xf32, #tpu.memory_space<vmem>>, vector<1x16x16x128xf32>
      %68 = vector.shape_cast %67 : vector<1x16x16x128xf32> to vector<256x128xf32>
      %69 = arith.truncf %68 : vector<256x128xf32> to vector<256x128xbf16>
      %c0_55 = arith.constant 0 : index
      %c2_56 = arith.constant 2 : index
      %c9_57 = arith.constant 9 : index
      %c0_58 = arith.constant 0 : index
      %70 = vector.load %arg10[%c0_55, %c2_56, %c9_57, %c0_58] : memref<1x18x32x128xf32, #tpu.memory_space<vmem>>, vector<1x16x16x128xf32>
      %71 = vector.shape_cast %70 : vector<1x16x16x128xf32> to vector<256x128xf32>
      %72 = arith.truncf %71 : vector<256x128xf32> to vector<256x128xbf16>
      %73 = tpu.concatenate %66, %69, %72 in 1 : vector<256x128xbf16>, vector<256x128xbf16>, vector<256x128xbf16> -> vector<256x384xbf16>
      %c768 = arith.constant 768 : index
      %c0_59 = arith.constant 0 : index
      %74 = vector.load %arg6[%c768, %c0_59] : memref<1152x128xbf16, #tpu.memory_space<vmem>>, vector<384x128xbf16>
      %cst_60 = arith.constant dense<0.000000e+00> : vector<256x128xf32>
      %75 = tpu.matmul %73, %74, %cst_60 {dimension_numbers = #tpu.dot_dimension_numbers<[1], [0], [0], [1], [0, 0, 1, 1], [], []>} : vector<256x384xbf16>, vector<384x128xbf16>, vector<256x128xf32> -> vector<256x128xf32>
      %76 = arith.addf %63, %75 : vector<256x128xf32>
      %77 = vector.shape_cast %76 : vector<256x128xf32> to vector<1x16x16x128xf32>
      %78 = arith.index_cast %1 : i32 to index
      %c0_61 = arith.constant 0 : index
      %c0_62 = arith.constant 0 : index
      %c0_63 = arith.constant 0 : index
      %79 = vector.load %arg11[%78, %c0_61, %c0_62, %c0_63] : memref<2x16x16x128xf32, #tpu.memory_space<vmem>>, vector<1x16x16x128xf32>
      tpu.vector_store %arg11[%78, %c0_61, %c0_62, %c0_63], %77 {strides = array<i32>} : memref<2x16x16x128xf32, #tpu.memory_space<vmem>>, vector<1x16x16x128xf32>,
      %c0_64 = arith.constant 0 : index
      %c0_65 = arith.constant 0 : index
      %80 = vector.load %arg12[%c0_64, %c0_65] : memref<1x128xf32, #tpu.memory_space<vmem>>, vector<1x128xf32>
      %cst_66 = arith.constant dense<0.000000e+00> : vector<128xf32>
      %81 = vector.multi_reduction <add>, %76, %cst_66 [0] : vector<256x128xf32> to vector<128xf32>
      %82 = vector.shape_cast %81 : vector<128xf32> to vector<1x128xf32>
      %83 = arith.addf %80, %82 : vector<1x128xf32>
      %c0_67 = arith.constant 0 : index
      %c0_68 = arith.constant 0 : index
      %84 = vector.load %arg12[%c0_67, %c0_68] : memref<1x128xf32, #tpu.memory_space<vmem>>, vector<1x128xf32>
      tpu.vector_store %arg12[%c0_67, %c0_68], %83 {strides = array<i32>} : memref<1x128xf32, #tpu.memory_space<vmem>>, vector<1x128xf32>,
      %c0_69 = arith.constant 0 : index
      %c0_70 = arith.constant 0 : index
      %85 = vector.load %arg13[%c0_69, %c0_70] : memref<1x128xf32, #tpu.memory_space<vmem>>, vector<1x128xf32>
      %86 = arith.mulf %76, %76 : vector<256x128xf32>
      %cst_71 = arith.constant dense<0.000000e+00> : vector<128xf32>
      %87 = vector.multi_reduction <add>, %86, %cst_71 [0] : vector<256x128xf32> to vector<128xf32>
      %88 = vector.shape_cast %87 : vector<128xf32> to vector<1x128xf32>
      %89 = arith.addf %85, %88 : vector<1x128xf32>
      %c0_72 = arith.constant 0 : index
      %c0_73 = arith.constant 0 : index
      %90 = vector.load %arg13[%c0_72, %c0_73] : memref<1x128xf32, #tpu.memory_space<vmem>>, vector<1x128xf32>
      tpu.vector_store %arg13[%c0_72, %c0_73], %89 {strides = array<i32>} : memref<1x128xf32, #tpu.memory_space<vmem>>, vector<1x128xf32>,
    } else {
    }
    %c2_i32 = arith.constant 2 : i32
    %18 = arith.cmpi eq, %arg0, %c2_i32 : i32
    %c0_i32_9 = arith.constant 0 : i32
    %19 = arith.cmpi eq, %arg1, %c0_i32_9 : i32
    %20 = arith.andi %18, %19 : i1
    %21 = arith.extui %20 : i1 to i32
    %c0_i32_10 = arith.constant 0 : i32
    %22 = arith.cmpi ne, %21, %c0_i32_10 : i32
    scf.if %22 {
      %c0 = arith.constant 0 : index
      %c0_13 = arith.constant 0 : index
      %26 = vector.load %arg12[%c0, %c0_13] : memref<1x128xf32, #tpu.memory_space<vmem>>, vector<1x128xf32>
      %cst = arith.constant 0.001953125 : f32
      %27 = vector.broadcast %cst : f32 to vector<1x128xf32>
      %28 = arith.mulf %26, %27 : vector<1x128xf32>
      %c0_14 = arith.constant 0 : index
      %c0_15 = arith.constant 0 : index
      %29 = vector.load %arg13[%c0_14, %c0_15] : memref<1x128xf32, #tpu.memory_space<vmem>>, vector<1x128xf32>
      %cst_16 = arith.constant 0.001953125 : f32
      %30 = vector.broadcast %cst_16 : f32 to vector<1x128xf32>
      %31 = arith.mulf %29, %30 : vector<1x128xf32>
      %32 = arith.mulf %28, %28 : vector<1x128xf32>
      %33 = arith.subf %31, %32 : vector<1x128xf32>
      %cst_17 = arith.constant 0.000000e+00 : f32
      %34 = vector.broadcast %cst_17 : f32 to vector<1x128xf32>
      %35 = arith.maximumf %33, %34 : vector<1x128xf32>
      %c0_18 = arith.constant 0 : index
      %c0_19 = arith.constant 0 : index
      %36 = vector.load %arg7[%c0_18, %c0_19] : memref<1x128xf32, #tpu.memory_space<vmem>>, vector<1x128xf32>
      %cst_20 = arith.constant 9.99999974E-6 : f32
      %37 = vector.broadcast %cst_20 : f32 to vector<1x128xf32>
      %38 = arith.addf %35, %37 : vector<1x128xf32>
      %39 = math.rsqrt %38 : vector<1x128xf32>
      %40 = arith.mulf %36, %39 : vector<1x128xf32>
      %c0_21 = arith.constant 0 : index
      %c0_22 = arith.constant 0 : index
      %41 = vector.load %arg14[%c0_21, %c0_22] : memref<1x128xf32, #tpu.memory_space<vmem>>, vector<1x128xf32>
      tpu.vector_store %arg14[%c0_21, %c0_22], %40 {strides = array<i32>} : memref<1x128xf32, #tpu.memory_space<vmem>>, vector<1x128xf32>,
      %c0_23 = arith.constant 0 : index
      %c0_24 = arith.constant 0 : index
      %42 = vector.load %arg8[%c0_23, %c0_24] : memref<1x128xf32, #tpu.memory_space<vmem>>, vector<1x128xf32>
      %43 = arith.mulf %28, %40 : vector<1x128xf32>
      %44 = arith.subf %42, %43 : vector<1x128xf32>
      %c0_25 = arith.constant 0 : index
      %c0_26 = arith.constant 0 : index
      %45 = vector.load %arg15[%c0_25, %c0_26] : memref<1x128xf32, #tpu.memory_space<vmem>>, vector<1x128xf32>
      tpu.vector_store %arg15[%c0_25, %c0_26], %44 {strides = array<i32>} : memref<1x128xf32, #tpu.memory_space<vmem>>, vector<1x128xf32>,
    } else {
    }
    %c2_i32_11 = arith.constant 2 : i32
    %23 = arith.cmpi eq, %arg0, %c2_i32_11 : i32
    %24 = arith.extui %23 : i1 to i32
    %c0_i32_12 = arith.constant 0 : i32
    %25 = arith.cmpi ne, %24, %c0_i32_12 : i32
    scf.if %25 {
      %26 = arith.index_cast %1 : i32 to index
      %c0 = arith.constant 0 : index
      %c0_13 = arith.constant 0 : index
      %c0_14 = arith.constant 0 : index
      %27 = vector.load %arg11[%26, %c0, %c0_13, %c0_14] : memref<2x16x16x128xf32, #tpu.memory_space<vmem>>, vector<1x16x16x128xf32>
      %28 = vector.shape_cast %27 : vector<1x16x16x128xf32> to vector<256x128xf32>
      %c0_15 = arith.constant 0 : index
      %c0_16 = arith.constant 0 : index
      %29 = vector.load %arg14[%c0_15, %c0_16] : memref<1x128xf32, #tpu.memory_space<vmem>>, vector<1x128xf32>
      %30 = vector.broadcast %29 : vector<1x128xf32> to vector<256x128xf32>
      %31 = arith.mulf %28, %30 : vector<256x128xf32>
      %c0_17 = arith.constant 0 : index
      %c0_18 = arith.constant 0 : index
      %32 = vector.load %arg15[%c0_17, %c0_18] : memref<1x128xf32, #tpu.memory_space<vmem>>, vector<1x128xf32>
      %33 = vector.broadcast %32 : vector<1x128xf32> to vector<256x128xf32>
      %34 = arith.addf %31, %33 : vector<256x128xf32>
      %c0_19 = arith.constant 0 : index
      %c0_20 = arith.constant 0 : index
      %c0_21 = arith.constant 0 : index
      %c0_22 = arith.constant 0 : index
      %35 = vector.load %arg2[%c0_19, %c0_20, %c0_21, %c0_22] : memref<1x16x16x128xf32, #tpu.memory_space<vmem>>, vector<1x16x16x128xf32>
      %36 = vector.shape_cast %35 : vector<1x16x16x128xf32> to vector<256x128xf32>
      %37 = arith.addf %34, %36 : vector<256x128xf32>
      %cst = arith.constant 0.000000e+00 : f32
      %38 = vector.broadcast %cst : f32 to vector<256x128xf32>
      %39 = arith.maximumf %37, %38 : vector<256x128xf32>
      %40 = vector.shape_cast %39 : vector<256x128xf32> to vector<1x16x16x128xf32>
      %c0_23 = arith.constant 0 : index
      %c0_24 = arith.constant 0 : index
      %c0_25 = arith.constant 0 : index
      %c0_26 = arith.constant 0 : index
      %41 = vector.load %arg9[%c0_23, %c0_24, %c0_25, %c0_26] : memref<1x16x16x128xf32, #tpu.memory_space<vmem>>, vector<1x16x16x128xf32>
      tpu.vector_store %arg9[%c0_23, %c0_24, %c0_25, %c0_26], %40 {strides = array<i32>} : memref<1x16x16x128xf32, #tpu.memory_space<vmem>>, vector<1x16x16x128xf32>,
    } else {
    }
    return
  }
  func.func @transform_0(%arg0: i32, %arg1: i32) -> (i32, i32, i32, i32) {
    %c1_i32 = arith.constant 1 : i32
    %0 = arith.cmpi eq, %arg0, %c1_i32 : i32
    %c1_i32_0 = arith.constant 1 : i32
    %1 = arith.select %0, %c1_i32_0, %arg1 : i32
    %c0_i32 = arith.constant 0 : i32
    %c0_i32_1 = arith.constant 0 : i32
    %c0_i32_2 = arith.constant 0 : i32
    %c0_i32_3 = arith.constant 0 : i32
    return %1, %c0_i32, %c0_i32_1, %c0_i32_2 : i32, i32, i32, i32
  }
  func.func @transform_1(%arg0: i32, %arg1: i32) -> (i32, i32) {
    %c0_i32 = arith.constant 0 : i32
    %c0_i32_0 = arith.constant 0 : i32
    %c0_i32_1 = arith.constant 0 : i32
    return %c0_i32, %c0_i32_0 : i32, i32
  }
  func.func @transform_2(%arg0: i32, %arg1: i32) -> (i32, i32) {
    %c0_i32 = arith.constant 0 : i32
    %c0_i32_0 = arith.constant 0 : i32
    %c0_i32_1 = arith.constant 0 : i32
    return %c0_i32, %c0_i32_0 : i32, i32
  }
  func.func @transform_3(%arg0: i32, %arg1: i32) -> (i32, i32) {
    %c0_i32 = arith.constant 0 : i32
    %c0_i32_0 = arith.constant 0 : i32
    %c0_i32_1 = arith.constant 0 : i32
    return %c0_i32, %c0_i32_0 : i32, i32
  }
  func.func @transform_4(%arg0: i32, %arg1: i32) -> (i32, i32) {
    %c0_i32 = arith.constant 0 : i32
    %c0_i32_0 = arith.constant 0 : i32
    %c0_i32_1 = arith.constant 0 : i32
    return %c0_i32, %c0_i32_0 : i32, i32
  }
  func.func @transform_5(%arg0: i32, %arg1: i32) -> (i32, i32) {
    %c0_i32 = arith.constant 0 : i32
    %c0_i32_0 = arith.constant 0 : i32
    %c0_i32_1 = arith.constant 0 : i32
    return %c0_i32, %c0_i32_0 : i32, i32
  }
  func.func @transform_6(%arg0: i32, %arg1: i32) -> (i32, i32) {
    %c0_i32 = arith.constant 0 : i32
    %c0_i32_0 = arith.constant 0 : i32
    %c0_i32_1 = arith.constant 0 : i32
    return %c0_i32, %c0_i32_0 : i32, i32
  }
  func.func @transform_7(%arg0: i32, %arg1: i32) -> (i32, i32, i32, i32) {
    %c1_i32 = arith.constant 1 : i32
    %0 = arith.subi %arg0, %c1_i32 : i32
    %c0_i32 = arith.constant 0 : i32
    %1 = arith.maxsi %0, %c0_i32 : i32
    %2 = arith.muli %arg1, %1 : i32
    %c0_i32_0 = arith.constant 0 : i32
    %c0_i32_1 = arith.constant 0 : i32
    %c0_i32_2 = arith.constant 0 : i32
    %c0_i32_3 = arith.constant 0 : i32
    return %2, %c0_i32_0, %c0_i32_1, %c0_i32_2 : i32, i32, i32, i32
  }
}

</mosaic_0001>

<bundles_post_ra>
// kernel: resnet_block_forward.1
= control target key start
LH: loop header
LB: loop body
LE: loop exit
PB: predicated region body
PF: predicated region fallthrough
CT: control target
= control target key end

     0   :  { %s7228_s24 = smov 0   ;;  %s7230_s25 = smov 0   ;;  %s9282_s0 = inlined_call_operand.vmem [shape: f32[2,16,16,128], index: 0, kind: input, shape index: {}]   ;;  %s9283_s1 = inlined_call_operand.vmem [shape: bf16[1152,128], index: 1, kind: input, shape index: {}]   ;;  %s9284_s2 = inlined_call_operand.vmem [shape: f32[1,128], index: 2, kind: input, shape index: {}]   ;;  %s9285_s3 = inlined_call_operand.vmem [shape: f32[1,128], index: 3, kind: input, shape index: {}]   ;;  %s9286_s4 = inlined_call_operand.vmem [shape: bf16[1152,128], index: 4, kind: input, shape index: {}]   ;;  %s9287_s5 = inlined_call_operand.vmem [shape: f32[1,128], index: 5, kind: input, shape index: {}]   ;;  %s9288_s6 = inlined_call_operand.vmem [shape: f32[1,128], index: 6, kind: input, shape index: {}]   ;;  %s9289_s7 = inlined_call_operand.vmem [shape: f32[2,16,16,128], index: 7, kind: output, shape index: {}]  }
   0x1   :  { %s7232_s26 = smov 0   ;;  %s7234_s27 = smov 0  }
   0x2   :  { %s7236_s28 = smov 0  }
   0x3 LB: > { %s26_s29 = sadd.s32 1, %s7176_s26  ;;  %s29_s30 = sadd.s32 1, %s7180_s27  ;;  %s7184_s28 = sphi %s7236_s28, %s17_s28   ;;  %s7180_s27 = sphi %s7234_s27, %s9297_s27   ;;  %s7176_s26 = sphi %s7232_s26, %s9296_s26   ;;  %s7172_s25 = sphi %s7230_s25, %s9295_s25   ;;  %s7168_s24 = sphi %s7228_s24, %s9294_s24  }
   0x4   : > { %p27_p0 = scmp.ge.s32.totalorder %s26_s29, 2  ;;  %p5336_p1 = scmp.ge.s32.totalorder %s7184_s28, 1 }
   0x5   : > { %p265_p2 = scmp.lt.s32.totalorder %s7184_s28, 7 }
   0x6   : > { %s9299_s29 = smov (%p27_p0, %s26_s29), 0  ;;  %s9301_s30 = smov (!%p27_p0, %s29_s30), %s7180_s27 }
   0x7   : > { %p266_p3 = pnand %p5336_p1, %p265_p2  ;;  %p31_p4 = scmp.ge.s32.totalorder %s9301_s30, 3 }
   0x8   : > { %p303_p5 = scmp.eq.s32.totalorder (!%p266_p3), %s7172_s25, 1  ;;  %s5339_s8 = sadd.s32 (!%p266_p3), 4294967295, %s7172_s25 }
   0x9   : > { %s9303_s30 = smov (%p31_p4, %s9301_s30), 0  ;;  %269 = sbr.rel (%p266_p3) target bundleno = 1295 (0x50f), region = 48 }
   0xa   : > { %p313_p6 = scmp.gt.s32.totalorder (!%p266_p3), %s5339_s8, 0  ;;  %p326_p7 = scmp.eq.s32.totalorder (!%p266_p3), %s7172_s25, 0 }
   0xb   : > { %p327_p9 = scmp.eq.s32.totalorder (!%p266_p3), %s7168_s24, 0 }
   0xd   : > { %p328_p11 = pnand (!%p266_p3), %p327_p9, %p326_p7 }
  0x10   : > { %s304_s9 = scalar_select %p303_p5, 1, %s7168_s24 }
  0x11   : > { %s9305_s8 = smov (!%p313_p6, %s5339_s8), 0  ;;  %v7186_v0 = vmov (!%p328_p11), 0.0  }
  0x12   : > { %p305_p8 = scmp.lt.s32.totalorder %s304_s9, 1  ;;  %s315_s10 = smul.u32 %s7168_s24, %s9305_s8  ;;  %332 = vst [vmem:[#allocation2] sm:$0xff] (!%p328_p11), %v7186_v0  ;;  %333 = vst [vmem:[#allocation2 + $0x8] sm:$0xff] (!%p328_p11), %v7186_v0 }
  0x13   : > { %331 = sbr.rel (%p328_p11) target bundleno = 55 (0x37), region = 52  ;;  %334 = vst [vmem:[#allocation2 + $0x10] sm:$0xff] (!%p328_p11), %v7186_v0  ;;  %335 = vst [vmem:[#allocation2 + $0x18] sm:$0xff] (!%p328_p11), %v7186_v0 }
  0x14   : > { %s9307_s9 = smov (!%p305_p8, %s304_s9), 1  ;;  %p316_p10 = scmp.lt.s32.totalorder %s315_s10, 1  ;;  %336 = vst [vmem:[#allocation2 + $0x20] sm:$0xff] (!%p328_p11), %v7186_v0  ;;  %337 = vst [vmem:[#allocation2 + $0x28] sm:$0xff] (!%p328_p11), %v7186_v0 }
  0x15   : > { %s5498_s11 = sshll.u32 %s9307_s9, 8  ;;  %338 = vst [vmem:[#allocation2 + $0x30] sm:$0xff] (!%p328_p11), %v7186_v0  ;;  %339 = vst [vmem:[#allocation2 + $0x38] sm:$0xff] (!%p328_p11), %v7186_v0 }
  0x16   : > { %s7275_s14 = scalar_lea.vmem %s9282_s0, %s5498_s11  ;;  %s9309_s10 = smov (!%p316_p10, %s315_s10), 1  ;;  %340 = vst [vmem:[#allocation2 + $0x40] sm:$0xff] (!%p328_p11), %v7186_v0  ;;  %341 = vst [vmem:[#allocation2 + $0x48] sm:$0xff] (!%p328_p11), %v7186_v0 }
  0x17   : > { %s5499_s15 = sshll.u32 %s9309_s10, 8  ;;  %342 = vst [vmem:[#allocation2 + $0x50] sm:$0xff] (!%p328_p11), %v7186_v0  ;;  %343 = vst [vmem:[#allocation2 + $0x58] sm:$0xff] (!%p328_p11), %v7186_v0 }
  0x18   : > { %s7280_s18 = scalar_lea.vmem %s9289_s7, %s5499_s15  ;;  %344 = vst [vmem:[#allocation2 + $0x60] sm:$0xff] (!%p328_p11), %v7186_v0  ;;  %345 = vst [vmem:[#allocation2 + $0x68] sm:$0xff] (!%p328_p11), %v7186_v0 }
  0x19   : > { %346 = vst [vmem:[#allocation2 + $0x70] sm:$0xff] (!%p328_p11), %v7186_v0  ;;  %347 = vst [vmem:[#allocation2 + $0x78] sm:$0xff] (!%p328_p11), %v7186_v0 }
  0x1a   : > { %348 = vst [vmem:[#allocation2 + $0x80] sm:$0xff] %v7186_v0  ;;  %349 = vst [vmem:[#allocation2 + $0x88] sm:$0xff] %v7186_v0 }
  0x1b   : > { %350 = vst [vmem:[#allocation2 + $0x90] sm:$0xff] %v7186_v0  ;;  %351 = vst [vmem:[#allocation2 + $0x98] sm:$0xff] %v7186_v0 }
  0x1c   : > { %352 = vst [vmem:[#allocation2 + $0xa0] sm:$0xff] %v7186_v0  ;;  %353 = vst [vmem:[#allocation2 + $0xa8] sm:$0xff] %v7186_v0 }
  0x1d   : > { %354 = vst [vmem:[#allocation2 + $0xb0] sm:$0xff] %v7186_v0  ;;  %355 = vst [vmem:[#allocation2 + $0xb8] sm:$0xff] %v7186_v0 }
  0x1e   : > { %356 = vst [vmem:[#allocation2 + $0xc0] sm:$0xff] %v7186_v0  ;;  %357 = vst [vmem:[#allocation2 + $0xc8] sm:$0xff] %v7186_v0 }
  0x1f   : > { %358 = vst [vmem:[#allocation2 + $0xd0] sm:$0xff] %v7186_v0  ;;  %359 = vst [vmem:[#allocation2 + $0xd8] sm:$0xff] %v7186_v0 }
  0x20   : > { %360 = vst [vmem:[#allocation2 + $0xe0] sm:$0xff] %v7186_v0  ;;  %361 = vst [vmem:[#allocation2 + $0xe8] sm:$0xff] %v7186_v0 }
  0x21   : > { %362 = vst [vmem:[#allocation2 + $0xf0] sm:$0xff] %v7186_v0  ;;  %363 = vst [vmem:[#allocation2 + $0xf8] sm:$0xff] %v7186_v0 }
  0x22   : > { %364 = vst [vmem:[#allocation2 + $0x100] sm:$0xff] %v7186_v0  ;;  %365 = vst [vmem:[#allocation2 + $0x108] sm:$0xff] %v7186_v0 }
  0x23   : > { %366 = vst [vmem:[#allocation2 + $0x110] sm:$0xff] %v7186_v0  ;;  %367 = vst [vmem:[#allocation2 + $0x118] sm:$0xff] %v7186_v0 }
  0x24   : > { %368 = vst [vmem:[#allocation2 + $0x120] sm:$0xff] %v7186_v0  ;;  %369 = vst [vmem:[#allocation2 + $0x128] sm:$0xff] %v7186_v0 }
  0x25   : > { %370 = vst [vmem:[#allocation2 + $0x130] sm:$0xff] %v7186_v0  ;;  %371 = vst [vmem:[#allocation2 + $0x138] sm:$0xff] %v7186_v0 }
  0x26   : > { %372 = vst [vmem:[#allocation2 + $0x140] sm:$0xff] %v7186_v0  ;;  %373 = vst [vmem:[#allocation2 + $0x148] sm:$0xff] %v7186_v0 }
  0x27   : > { %374 = vst [vmem:[#allocation2 + $0x150] sm:$0xff] %v7186_v0  ;;  %375 = vst [vmem:[#allocation2 + $0x158] sm:$0xff] %v7186_v0 }
  0x28   : > { %376 = vst [vmem:[#allocation2 + $0x160] sm:$0xff] %v7186_v0  ;;  %377 = vst [vmem:[#allocation2 + $0x168] sm:$0xff] %v7186_v0 }
  0x29   : > { %378 = vst [vmem:[#allocation2 + $0x170] sm:$0xff] %v7186_v0  ;;  %379 = vst [vmem:[#allocation2 + $0x178] sm:$0xff] %v7186_v0 }
  0x2a   : > { %380 = vst [vmem:[#allocation2 + $0x180] sm:$0xff] %v7186_v0  ;;  %381 = vst [vmem:[#allocation2 + $0x188] sm:$0xff] %v7186_v0 }
  0x2b   : > { %382 = vst [vmem:[#allocation2 + $0x190] sm:$0xff] %v7186_v0  ;;  %383 = vst [vmem:[#allocation2 + $0x198] sm:$0xff] %v7186_v0 }
  0x2c   : > { %384 = vst [vmem:[#allocation2 + $0x1a0] sm:$0xff] %v7186_v0  ;;  %385 = vst [vmem:[#allocation2 + $0x1a8] sm:$0xff] %v7186_v0 }
  0x2d   : > { %386 = vst [vmem:[#allocation2 + $0x1b0] sm:$0xff] %v7186_v0  ;;  %387 = vst [vmem:[#allocation2 + $0x1b8] sm:$0xff] %v7186_v0 }
  0x2e   : > { %388 = vst [vmem:[#allocation2 + $0x1c0] sm:$0xff] %v7186_v0  ;;  %389 = vst [vmem:[#allocation2 + $0x1c8] sm:$0xff] %v7186_v0 }
  0x2f   : > { %390 = vst [vmem:[#allocation2 + $0x1d0] sm:$0xff] %v7186_v0  ;;  %391 = vst [vmem:[#allocation2 + $0x1d8] sm:$0xff] %v7186_v0 }
  0x30   : > { %392 = vst [vmem:[#allocation2 + $0x1e0] sm:$0xff] %v7186_v0  ;;  %393 = vst [vmem:[#allocation2 + $0x1e8] sm:$0xff] %v7186_v0 }
  0x31   : > { %394 = vst [vmem:[#allocation2 + $0x1f0] sm:$0xff] %v7186_v0  ;;  %395 = vst [vmem:[#allocation2 + $0x1f8] sm:$0xff] %v7186_v0 }
  0x32   : > { %396 = vst [vmem:[#allocation2 + $0x200] sm:$0xff] %v7186_v0  ;;  %397 = vst [vmem:[#allocation2 + $0x208] sm:$0xff] %v7186_v0 }
  0x33   : > { %398 = vst [vmem:[#allocation2 + $0x210] sm:$0xff] %v7186_v0  ;;  %399 = vst [vmem:[#allocation2 + $0x218] sm:$0xff] %v7186_v0 }
  0x34   : > { %400 = vst [vmem:[#allocation2 + $0x220] sm:$0xff] %v7186_v0  ;;  %401 = vst [vmem:[#allocation2 + $0x228] sm:$0xff] %v7186_v0 }
  0x35   : > { %402 = vst [vmem:[#allocation2 + $0x230] sm:$0xff] %v7186_v0  ;;  %403 = vst [vmem:[#allocation2 + $0x238] sm:$0xff] %v7186_v0 }
  0x36   : > { %404 = vst [vmem:[#allocation4] sm:$0x1] %v7186_v0  ;;  %405 = vst [vmem:[#allocation5] sm:$0x1] %v7186_v0 }
  0x37 PF: > { %p5342_p12 = scmp.ne.s32.totalorder %s7172_s25, 0 }
  0x39   : > { %408 = sbr.rel (%p5342_p12) target bundleno = 621 (0x26d), region = 56 }
  0x40   : > { %v6998_v1 = vld [vmem:[%s9283_s1 + $0x100] sm:$0xff]   ;;  %v7001_v4 = vld [vmem:[%s9283_s1 + $0x108] sm:$0xff]   ;;  %v7004_v7 = vld [vmem:[%s9283_s1 + $0x110] sm:$0xff]   ;;  %s5415_s23 = sshll.u32 %s7168_s24, 8 }
  0x41   : > { %v7363_v2 = vld [vmem:[%s9283_s1 + $0x140] sm:$0xff]   ;;  %5500 = vmatprep.subr.bf16.mxu0 %v6998_v1  ;;  %v7376_v5 = vld [vmem:[%s9283_s1 + $0x148] sm:$0xff]   ;;  %v7388_v8 = vld [vmem:[%s9283_s1 + $0x150] sm:$0xff]   ;;  %s8107_s8 = scalar_lea.vmem [#allocation3], %s5415_s23 }
  0x42   : > { %v7000_v3 = vld [vmem:[%s9283_s1 + $0xc0] sm:$0xff]   ;;  %6604 = vmatprep.subr.bf16.mxu1 %v7363_v2  ;;  %v7003_v6 = vld [vmem:[%s9283_s1 + $0xc8] sm:$0xff]   ;;  %v7006_v9 = vld [vmem:[%s9283_s1 + $0xd0] sm:$0xff]  }
  0x43   : > { %5501 = vmatpush3.bf16.msra.mxu0 %v7000_v3  ;;  %6612 = vmatpush3.bf16.msra.mxu1 %v7363_v2  ;;  %v7007_v10 = vld [vmem:[%s9283_s1 + $0x118] sm:$0xff]   ;;  %v7010_v13 = vld [vmem:[%s9283_s1 + $0x120] sm:$0xff]   ;;  %v7013_v16 = vld [vmem:[%s9283_s1 + $0x128] sm:$0xff]  }
  0x44   : > { %5502 = vmatprep.subr.bf16.mxu0 %v7001_v4  ;;  %6605 = vmatprep.subr.bf16.mxu1 %v7376_v5  ;;  %v7401_v11 = vld [vmem:[%s9283_s1 + $0x158] sm:$0xff]   ;;  %v7414_v14 = vld [vmem:[%s9283_s1 + $0x160] sm:$0xff]   ;;  %v7427_v17 = vld [vmem:[%s9283_s1 + $0x168] sm:$0xff]  }
  0x45   : > { %v7009_v12 = vld [vmem:[%s9283_s1 + $0xd8] sm:$0xff]   ;;  %v7012_v15 = vld [vmem:[%s9283_s1 + $0xe0] sm:$0xff]   ;;  %v7015_v18 = vld [vmem:[%s9283_s1 + $0xe8] sm:$0xff]  }
  0x46   : > { %v7016_v19 = vld [vmem:[%s9283_s1 + $0x130] sm:$0xff]   ;;  %v7019_v22 = vld [vmem:[%s9283_s1 + $0x138] sm:$0xff]   ;;  %v409_v24 = vld [vmem:[%s7275_s14] sm:$0xff] }
  0x47   : > { %5503 = vmatpush3.bf16.msra.mxu0 %v7003_v6  ;;  %6613 = vmatpush3.bf16.msra.mxu1 %v7376_v5  ;;  %v7440_v20 = vld [vmem:[%s9283_s1 + $0x170] sm:$0xff]   ;;  %v7451_v23 = vld [vmem:[%s9283_s1 + $0x178] sm:$0xff]   ;;  %v410_v25 = vld [vmem:[%s7275_s14 + $0x8] sm:$0xff]  ;;  %442 = vst [vmem:[#allocation2 + $0x28] sm:$0xff] %v409_v24 }
  0x48   : > { %5504 = vmatprep.subr.bf16.mxu0 %v7004_v7  ;;  %6606 = vmatprep.subr.bf16.mxu1 %v7388_v8  ;;  %v7018_v21 = vld [vmem:[%s9283_s1 + $0xf0] sm:$0xff]   ;;  %v425_v26 = vld [vmem:[%s7275_s14 + $0x80] sm:$0xff]  ;;  %443 = vst [vmem:[#allocation2 + $0x30] sm:$0xff] %v410_v25  ;;  %v7458_v27 = vpack.c.bf16 %v410_v25, %v409_v24  ;;  %v426_v28 = vld [vmem:[%s7275_s14 + $0x88] sm:$0xff] }
  0x49   : > { %458 = vst [vmem:[#allocation2 + $0x128] sm:$0xff] %v425_v26  ;;  %v427_v29 = vld [vmem:[%s7275_s14 + $0x90] sm:$0xff]  ;;  %v428_v30 = vld [vmem:[%s7275_s14 + $0x98] sm:$0xff]  ;;  %459 = vst [vmem:[#allocation2 + $0x130] sm:$0xff] %v426_v28  ;;  %v7463_v31 = vpack.c.bf16 %v426_v28, %v425_v26 }
  0x4a   : > { %460 = vst [vmem:[#allocation2 + $0x148] sm:$0xff] %v427_v29  ;;  %461 = vst [vmem:[#allocation2 + $0x150] sm:$0xff] %v428_v30  ;;  %v7465_v32 = vpack.c.bf16 %v428_v30, %v427_v29  ;;  %1034 = vmatprep.mubr.bf16.mxu0 %v7458_v27  ;;  %v7021_v33 = vld [vmem:[%s9283_s1 + $0xf8] sm:$0xff]   ;;  %v7022_v34 = vld [vmem:[%s9283_s1 + $0x40] sm:$0xff]  }
  0x4b   : > { %5505 = vmatpush3.bf16.msra.mxu0 %v7006_v9  ;;  %6614 = vmatpush3.bf16.msra.mxu1 %v7388_v8  ;;  %v411_v35 = vld [vmem:[%s7275_s14 + $0x10] sm:$0xff]  ;;  %v412_v36 = vld [vmem:[%s7275_s14 + $0x18] sm:$0xff]  ;;  %v429_v37 = vld [vmem:[%s7275_s14 + $0xa0] sm:$0xff] }
  0x4c   : > { %5506 = vmatprep.subr.bf16.mxu0 %v7007_v10  ;;  %6607 = vmatprep.subr.bf16.mxu1 %v7401_v11  ;;  %444 = vst [vmem:[#allocation2 + $0x48] sm:$0xff] %v411_v35  ;;  %445 = vst [vmem:[#allocation2 + $0x50] sm:$0xff] %v412_v36  ;;  %v430_v38 = vld [vmem:[%s7275_s14 + $0xa8] sm:$0xff]  ;;  %v431_v39 = vld [vmem:[%s7275_s14 + $0xb0] sm:$0xff]  ;;  %v7490_v49 = vpack.c.bf16 %v412_v36, %v411_v35 }
  0x4d   : > { %462 = vst [vmem:[#allocation2 + $0x168] sm:$0xff] %v429_v37  ;;  %v432_v40 = vld [vmem:[%s7275_s14 + $0xb8] sm:$0xff]  ;;  %463 = vst [vmem:[#allocation2 + $0x170] sm:$0xff] %v430_v38  ;;  %v7483_v43 = vpack.c.bf16 %v430_v38, %v429_v37  ;;  %v7023_v52 = vld [vmem:[%s9283_s1] sm:$0xff]  }
  0x4e   : > { %v666_v41 = vld [vmem:[#allocation2 + $0x27] sm:$0xff]  ;;  %464 = vst [vmem:[#allocation2 + $0x188] sm:$0xff] %v431_v39  ;;  %465 = vst [vmem:[#allocation2 + $0x190] sm:$0xff] %v432_v40  ;;  %v7485_v44 = vpack.c.bf16 %v432_v40, %v431_v39  ;;  %v7026_v56 = vld [vmem:[%s9283_s1 + $0x50] sm:$0xff]  }
  0x4f   : > { %5507 = vmatpush3.bf16.msra.mxu0 %v7009_v12  ;;  %6615 = vmatpush3.bf16.msra.mxu1 %v7401_v11  ;;  %v667_v42 = vld [vmem:[#allocation2 + $0x2f] sm:$0xff]  ;;  %v413_v59 = vld [vmem:[%s7275_s14 + $0x20] sm:$0xff]  ;;  %v436_v10 = vld [vmem:[%s7275_s14 + $0xd8] sm:$0xff] }
  0x50   : > { %5508 = vmatprep.subr.bf16.mxu0 %v7010_v13  ;;  %6608 = vmatprep.subr.bf16.mxu1 %v7414_v14  ;;  %v778_v45 = vld [vmem:[#allocation2 + $0x129] sm:$0xff]  ;;  %v779_v46 = vld [vmem:[#allocation2 + $0x131] sm:$0xff]  ;;  %v7487_v47 = vpack.c.bf16 %v667_v42, %v666_v41  ;;  %446 = vst [vmem:[#allocation2 + $0x68] sm:$0xff] %v413_v59  ;;  %v433_v3 = vld [vmem:[%s7275_s14 + $0xc0] sm:$0xff] }
  0x51   : > { %v780_v48 = vld [vmem:[#allocation2 + $0x149] sm:$0xff]  ;;  %v802_v50 = vpack.c.bf16 %v779_v46, %v778_v45  ;;  %v781_v51 = vld [vmem:[#allocation2 + $0x151] sm:$0xff]  ;;  %466 = vst [vmem:[#allocation2 + $0x1a8] sm:$0xff] %v433_v3  ;;  %469 = vst [vmem:[#allocation2 + $0x1d0] sm:$0xff] %v436_v10 }
  0x52   : > { %v803_v53 = vpack.c.bf16 %v781_v51, %v780_v48  ;;  %v7024_v54 = vld [vmem:[%s9283_s1 + $0x48] sm:$0xff]   ;;  %v435_v9 = vld [vmem:[%s7275_s14 + $0xd0] sm:$0xff]  ;;  %v437_v24 = vld [vmem:[%s7275_s14 + $0xe0] sm:$0xff] }
  0x53   : > { %5509 = vmatpush3.bf16.msra.mxu0 %v7012_v15  ;;  %6616 = vmatpush3.bf16.msra.mxu1 %v7414_v14  ;;  %v7025_v55 = vld [vmem:[%s9283_s1 + $0x8] sm:$0xff]   ;;  %v7027_v12 = vld [vmem:[%s9283_s1 + $0x10] sm:$0xff]   ;;  %468 = vst [vmem:[#allocation2 + $0x1c8] sm:$0xff] %v435_v9  ;;  %v7525_v13 = vpack.c.bf16 %v436_v10, %v435_v9  ;;  %v7028_v15 = vld [vmem:[%s9283_s1 + $0x58] sm:$0xff]  }
  0x54   : > { %5510 = vmatprep.subr.bf16.mxu0 %v7013_v16  ;;  %6609 = vmatprep.subr.bf16.mxu1 %v7427_v17  ;;  %v668_v57 = vld [vmem:[#allocation2 + $0x47] sm:$0xff]  ;;  %v669_v58 = vld [vmem:[#allocation2 + $0x4f] sm:$0xff]  ;;  %v7029_v16 = vld [vmem:[%s9283_s1 + $0x18] sm:$0xff]   ;;  %470 = vst [vmem:[#allocation2 + $0x1e8] sm:$0xff] %v437_v24 }
  0x55   : > { %6348 = vmatprep.mubr.bf16.mxu1 %v802_v50  ;;  %v782_v60 = vld [vmem:[#allocation2 + $0x169] sm:$0xff]  ;;  %v783_v61 = vld [vmem:[#allocation2 + $0x171] sm:$0xff]  ;;  %v7509_v62 = vpack.c.bf16 %v669_v58, %v668_v57  ;;  %v417_v50 = vld [vmem:[%s7275_s14 + $0x40] sm:$0xff] }
  0x56   : > { %v784_v63 = vld [vmem:[#allocation2 + $0x189] sm:$0xff]  ;;  %v804_v0 = vpack.c.bf16 %v783_v61, %v782_v60  ;;  %v785_v1 = vld [vmem:[#allocation2 + $0x191] sm:$0xff]  ;;  %450 = vst [vmem:[#allocation2 + $0xa8] sm:$0xff] %v417_v50 }
  0x57   : > { %5511 = vmatpush3.bf16.msra.mxu0 %v7015_v18  ;;  %6617 = vmatpush3.bf16.msra.mxu1 %v7427_v17  ;;  %v805_v4 = vpack.c.bf16 %v785_v1, %v784_v63  ;;  %v434_v7 = vld [vmem:[%s7275_s14 + $0xc8] sm:$0xff]  ;;  %v7030_v18 = vld [vmem:[%s9283_s1 + $0x60] sm:$0xff]   ;;  %v7545_v26 = vld [vmem:[%s7275_s14 + $0xf0] sm:$0xff] }
  0x58   : > { %5512 = vmatprep.subr.bf16.mxu0 %v7016_v19  ;;  %6610 = vmatprep.subr.bf16.mxu1 %v7440_v20  ;;  %467 = vst [vmem:[#allocation2 + $0x1b0] sm:$0xff] %v434_v7  ;;  %v670_v19 = vld [vmem:[#allocation2 + $0x67] sm:$0xff]  ;;  %v7550_v29 = vld [vmem:[%s7275_s14 + $0xf8] sm:$0xff]  ;;  %472 = vst [vmem:[#allocation2 + $0x208] sm:$0xff] %v7545_v26 }
  0x59   : > { %v438_v25 = vld [vmem:[%s7275_s14 + $0xe8] sm:$0xff]  ;;  %473 = vst [vmem:[#allocation2 + $0x210] sm:$0xff] %v7550_v29  ;;  %v761_v37 = vpack.c.bf16 %v7550_v29, %v7545_v26  ;;  %v789_v39 = vld [vmem:[#allocation2 + $0x1d1] sm:$0xff] }
  0x5a   : > { %471 = vst [vmem:[#allocation2 + $0x1f0] sm:$0xff] %v438_v25  ;;  %v7554_v30 = vpack.c.bf16 %v438_v25, %v437_v24  ;;  %v788_v36 = vld [vmem:[#allocation2 + $0x1c9] sm:$0xff]  ;;  %v7036_v63 = vld [vmem:[%s9283_s1 + $0x78] sm:$0xff]  }
  0x5b   : > { %5513 = vmatpush3.bf16.msra.mxu0 %v7018_v21  ;;  %6618 = vmatpush3.bf16.msra.mxu1 %v7440_v20  ;;  %v415_v21 = vld [vmem:[%s7275_s14 + $0x30] sm:$0xff]  ;;  %v807_v40 = vpack.c.bf16 %v789_v39, %v788_v36  ;;  %v7032_v41 = vld [vmem:[%s9283_s1 + $0x68] sm:$0xff]   ;;  %v424_v10 = vld [vmem:[%s7275_s14 + $0x78] sm:$0xff] }
  0x5c   : > { %5514 = vmatprep.subr.bf16.mxu0 %v7019_v22  ;;  %6611 = vmatprep.subr.bf16.mxu1 %v7451_v23  ;;  %v416_v22 = vld [vmem:[%s7275_s14 + $0x38] sm:$0xff]  ;;  %448 = vst [vmem:[#allocation2 + $0x88] sm:$0xff] %v415_v21  ;;  %v7033_v42 = vld [vmem:[%s9283_s1 + $0x28] sm:$0xff]   ;;  %v7034_v45 = vld [vmem:[%s9283_s1 + $0x70] sm:$0xff]  }
  0x5d   : > { %449 = vst [vmem:[#allocation2 + $0x90] sm:$0xff] %v416_v22  ;;  %v7547_v28 = vpack.c.bf16 %v416_v22, %v415_v21  ;;  %v522_v58 = vld [vmem:[#allocation2 + $0x8] sm:$0xff]  ;;  %v7035_v60 = vld [vmem:[%s9283_s1 + $0x30] sm:$0xff]   ;;  %457 = vst [vmem:[#allocation2 + $0x110] sm:$0xff] %v424_v10 }
  0x5e   : > { %v523_v61 = vld [vmem:[#allocation2 + $0x10] sm:$0xff] }
  0x5f   : > { %5515 = vmatpush3.bf16.msra.mxu0 %v7021_v33  ;;  %6619 = vmatpush3.bf16.msra.mxu1 %v7451_v23  ;;  %v786_v33 = vld [vmem:[#allocation2 + $0x1a9] sm:$0xff] }
  0x60   : > { %6316 = vmatprep.subr.bf16.mxu0 %v7363_v2  ;;  %5636 = vmatprep.subr.bf16.mxu1 %v7022_v34  ;;  %v787_v34 = vld [vmem:[#allocation2 + $0x1b1] sm:$0xff] }
  0x61   : > { %v806_v38 = vpack.c.bf16 %v787_v34, %v786_v33  ;;  %v790_v51 = vld [vmem:[#allocation2 + $0x1e9] sm:$0xff]  ;;  %v793_v57 = vld [vmem:[#allocation2 + $0x211] sm:$0xff] }
  0x62   : > { %1035 = vmatmul.mubr.bf16.vlgmr.msra.gmra.mrb[0].mxu0 %v7487_v47  ;;  %6349 = vmatmul.mubr.bf16.vlgmr.msra.gmra.mrb[0].mxu1 %v803_v53  ;;  %v419_v1 = vld [vmem:[%s7275_s14 + $0x50] sm:$0xff]  ;;  %v7041_v34 = vld [vmem:[%s9283_s1 + $0x98] sm:$0xff]  }
  0x63   : > { %6317 = vmatpush3.bf16.msra.mxu0 %v7363_v2  ;;  %1042 = vmatprep.mubr.bf16.mxu0 %v7490_v49  ;;  %v414_v2 = vld [vmem:[%s7275_s14 + $0x28] sm:$0xff]  ;;  %452 = vst [vmem:[#allocation2 + $0xc8] sm:$0xff] %v419_v1  ;;  %v423_v9 = vld [vmem:[%s7275_s14 + $0x70] sm:$0xff] }
  0x64   : > { %5637 = vmatpush3.bf16.msra.mxu1 %v7023_v52  ;;  %6318 = vmatprep.subr.bf16.mxu0 %v7376_v5  ;;  %447 = vst [vmem:[#allocation2 + $0x70] sm:$0xff] %v414_v2  ;;  %v7514_v6 = vpack.c.bf16 %v414_v2, %v413_v59  ;;  %v672_v46 = vld [vmem:[#allocation2 + $0x87] sm:$0xff]  ;;  %v673_v48 = vld [vmem:[#allocation2 + $0x8f] sm:$0xff]  ;;  %v420_v2 = vld [vmem:[%s7275_s14 + $0x58] sm:$0xff] }
  0x65   : > { %5638 = vmatprep.subr.bf16.mxu1 %v7024_v54  ;;  %6352 = vmatprep.mubr.bf16.mxu1 %v804_v0  ;;  %v791_v52 = vld [vmem:[#allocation2 + $0x1f1] sm:$0xff]  ;;  %v7579_v53 = vpack.c.bf16 %v673_v48, %v672_v46  ;;  %v418_v54 = vld [vmem:[%s7275_s14 + $0x48] sm:$0xff]  ;;  %v554_v0 = vpack.c.bf16 %v523_v61, %v522_v58  ;;  %453 = vst [vmem:[#allocation2 + $0xd0] sm:$0xff] %v420_v2  ;;  %456 = vst [vmem:[#allocation2 + $0x108] sm:$0xff] %v423_v9 }
  0x66   : > { %451 = vst [vmem:[#allocation2 + $0xb0] sm:$0xff] %v418_v54  ;;  %v7610_v21 = vpack.c.bf16 %v420_v2, %v419_v1  ;;  %v7053_v46 = vld [vmem:[%s9283_s1 + $0xb8] sm:$0xff]   ;;  %v683_v48 = vld [vmem:[#allocation2 + $0x12f] sm:$0xff]  ;;  %v692_v2 = vld [vmem:[#allocation2 + $0x1c7] sm:$0xff] }
  0x67   : > { %6319 = vmatpush3.bf16.msra.mxu0 %v7376_v5  ;;  %v7523_v5 = vpack.c.bf16 %v434_v7, %v433_v3  ;;  %v421_v3 = vld [vmem:[%s7275_s14 + $0x60] sm:$0xff] }
  0x68   : > { %6320 = vmatprep.subr.bf16.mxu0 %v7388_v8  ;;  %5639 = vmatpush3.bf16.msra.mxu1 %v7025_v55  ;;  %v808_v55 = vpack.c.bf16 %v791_v52, %v790_v51  ;;  %454 = vst [vmem:[#allocation2 + $0xe8] sm:$0xff] %v421_v3  ;;  %v474_v7 = vld [vmem:[#allocation2 + $0x7] sm:$0xff]  ;;  %v685_v52 = vld [vmem:[#allocation2 + $0x14f] sm:$0xff] }
  0x69   : > { %5640 = vmatprep.subr.bf16.mxu1 %v7026_v56  ;;  %v792_v56 = vld [vmem:[#allocation2 + $0x209] sm:$0xff] }
  0x6a   : > { %1043 = vmatmul.mubr.bf16.gmra.mrb[4].mxu0 %v7509_v62  ;;  %6353 = vmatmul.mubr.bf16.gmra.mrb[4].mxu1 %v805_v4  ;;  %v809_v59 = vpack.c.bf16 %v793_v57, %v792_v56  ;;  %v7037_v4 = vld [vmem:[%s9283_s1 + $0x38] sm:$0xff]   ;;  %v676_v24 = vld [vmem:[#allocation2 + $0xc7] sm:$0xff]  ;;  %v687_v57 = vld [vmem:[#allocation2 + $0x16f] sm:$0xff] }
  0x6b   : > { %1050 = vmatprep.mubr.bf16.mxu0 %v7514_v6  ;;  %6321 = vmatpush3.bf16.msra.mxu0 %v7388_v8  ;;  %v671_v8 = vld [vmem:[#allocation2 + $0x6f] sm:$0xff]  ;;  %v684_v51 = vld [vmem:[#allocation2 + $0x147] sm:$0xff] }
  0x6c   : > { %6322 = vmatprep.subr.bf16.mxu0 %v7401_v11  ;;  %5641 = vmatpush3.bf16.msra.mxu1 %v7027_v12  ;;  %v7556_v35 = vpack.c.bf16 %v671_v8, %v670_v19  ;;  %v674_v12 = vld [vmem:[#allocation2 + $0xa7] sm:$0xff]  ;;  %v677_v25 = vld [vmem:[#allocation2 + $0xcf] sm:$0xff] }
  0x6d   : > { %5642 = vmatprep.subr.bf16.mxu1 %v7028_v15  ;;  %6356 = vmatprep.mubr.bf16.mxu1 %v806_v38  ;;  %v475_v15 = vld [vmem:[#allocation2 + $0xf] sm:$0xff]  ;;  %v7619_v8 = vpack.c.bf16 %v677_v25, %v676_v24  ;;  %v7045_v38 = vld [vmem:[%s9283_s1 + $0x1c0] sm:$0xff]  }
  0x6e   : > { %v506_v22 = vpack.c.bf16 %v475_v15, %v474_v7  ;;  %v686_v56 = vld [vmem:[#allocation2 + $0x167] sm:$0xff]  ;;  %v695_v7 = vld [vmem:[#allocation2 + $0x1ef] sm:$0xff] }
  0x6f   : > { %6323 = vmatpush3.bf16.msra.mxu0 %v7401_v11  ;;  %v7031_v11 = vld [vmem:[%s9283_s1 + $0x20] sm:$0xff]   ;;  %v7680_v58 = vpack.c.bf16 %v687_v57, %v686_v56  ;;  %v763_v15 = vld [vmem:[#allocation2 + $0x31] sm:$0xff]  ;;  %v766_v26 = vld [vmem:[#allocation2 + $0x69] sm:$0xff] }
  0x70   : > { %6324 = vmatprep.subr.bf16.mxu0 %v7414_v14  ;;  %5643 = vmatpush3.bf16.msra.mxu1 %v7029_v16  ;;  %v7038_v16 = vld [vmem:[%s9283_s1 + $0x80] sm:$0xff]   ;;  %v767_v29 = vld [vmem:[#allocation2 + $0x71] sm:$0xff]  ;;  %v7047_v24 = vld [vmem:[%s9283_s1 + $0x1c8] sm:$0xff]  }
  0x71   : > { %5644 = vmatprep.subr.bf16.mxu1 %v7030_v18  ;;  %v675_v18 = vld [vmem:[#allocation2 + $0xaf] sm:$0xff]  ;;  %v678_v36 = vld [vmem:[#allocation2 + $0xe7] sm:$0xff] }
  0x72   : > { %1051 = vmatmul.mubr.bf16.gmra.mrb[8].mxu0 %v7556_v35  ;;  %6357 = vmatmul.mubr.bf16.gmra.mrb[8].mxu1 %v807_v40  ;;  %v7608_v19 = vpack.c.bf16 %v675_v18, %v674_v12  ;;  %v7641_v40 = vpack.c.bf16 %v424_v10, %v423_v9  ;;  %v697_v10 = vld [vmem:[#allocation2 + $0x20f] sm:$0xff] }
  0x73   : > { %1058 = vmatprep.mubr.bf16.mxu0 %v7547_v28  ;;  %6325 = vmatpush3.bf16.msra.mxu0 %v7414_v14  ;;  %v7582_v14 = vpack.c.bf16 %v418_v54, %v417_v50  ;;  %v7669_v54 = vld [vmem:[%s9283_s1 + $0x200] sm:$0xff]   ;;  %v762_v12 = vld [vmem:[#allocation2 + $0x29] sm:$0xff] }
  0x74   : > { %5645 = vmatpush3.bf16.msra.mxu1 %v7031_v11  ;;  %6326 = vmatprep.subr.bf16.mxu0 %v7427_v17  ;;  %v7042_v11 = vld [vmem:[%s9283_s1 + $0xa0] sm:$0xff]   ;;  %v7714_v18 = vpack.c.bf16 %v763_v15, %v762_v12  ;;  %v7048_v25 = vld [vmem:[%s9283_s1 + $0x188] sm:$0xff]   ;;  %v7060_v12 = vld [vmem:[%s9283_s1 + $0x1f8] sm:$0xff]  }
  0x75   : > { %5646 = vmatprep.subr.bf16.mxu1 %v7032_v41  ;;  %6360 = vmatprep.mubr.bf16.mxu1 %v808_v55  ;;  %v680_v41 = vld [vmem:[#allocation2 + $0x107] sm:$0xff]  ;;  %v7674_v55 = vpack.c.bf16 %v685_v52, %v684_v51 }
  0x76   : > { %v7055_v52 = vld [vmem:[%s9283_s1 + $0x1a0] sm:$0xff]   ;;  %v7056_v57 = vld [vmem:[%s9283_s1 + $0x1e8] sm:$0xff]  }
  0x77   : > { %6327 = vmatpush3.bf16.msra.mxu0 %v7427_v17  ;;  %v422_v17 = vld [vmem:[%s7275_s14 + $0x68] sm:$0xff] }
  0x78   : > { %5647 = vmatpush3.bf16.msra.mxu1 %v7033_v42  ;;  %6328 = vmatprep.subr.bf16.mxu0 %v7440_v20  ;;  %455 = vst [vmem:[#allocation2 + $0xf0] sm:$0xff] %v422_v17  ;;  %v7624_v33 = vpack.c.bf16 %v422_v17, %v421_v3  ;;  %v693_v3 = vld [vmem:[#allocation2 + $0x1cf] sm:$0xff]  ;;  %v694_v17 = vld [vmem:[#allocation2 + $0x1e7] sm:$0xff] }
  0x79   : > { %5648 = vmatprep.subr.bf16.mxu1 %v7034_v45  ;;  %v7044_v45 = vld [vmem:[%s9283_s1 + $0xb0] sm:$0xff]   ;;  %v7704_v9 = vpack.c.bf16 %v695_v7, %v694_v17 }
  0x7a   : > { %1059 = vmatmul.mubr.bf16.gmra.mrb[12].mxu0 %v7579_v53  ;;  %6361 = vmatmul.mubr.bf16.gmra.mrb[12].mxu1 %v809_v59  ;;  %v688_v59 = vld [vmem:[#allocation2 + $0x187] sm:$0xff]  ;;  %v571_v7 = vld [vmem:[#allocation2 + $0x11] sm:$0xff] }
  0x7b   : > { %1066 = vmatprep.mubr.bf16.mxu0 %v7582_v14  ;;  %6329 = vmatpush3.bf16.msra.mxu0 %v7440_v20  ;;  %v7039_v20 = vld [vmem:[%s9283_s1 + $0x88] sm:$0xff]  }
  0x7c   : > { %5649 = vmatpush3.bf16.msra.mxu1 %v7035_v60  ;;  %1500 = vmatprep.mubr.bf16.mxu1 %v554_v0  ;;  %v689_v60 = vld [vmem:[#allocation2 + $0x18f] sm:$0xff] }
  0x7d   : > { %5650 = vmatprep.subr.bf16.mxu1 %v7036_v63  ;;  %6330 = vmatprep.subr.bf16.mxu0 %v7451_v23  ;;  %v7686_v61 = vpack.c.bf16 %v689_v60, %v688_v59  ;;  %v690_v63 = vld [vmem:[#allocation2 + $0x1a7] sm:$0xff]  ;;  %v691_v0 = vld [vmem:[#allocation2 + $0x1af] sm:$0xff] }
  0x7e   : > { %v7692_v1 = vpack.c.bf16 %v691_v0, %v690_v63  ;;  %v776_v59 = vld [vmem:[#allocation2 + $0x109] sm:$0xff]  ;;  %v777_v60 = vld [vmem:[#allocation2 + $0x111] sm:$0xff] }
  0x7f   : > { %6331 = vmatpush3.bf16.msra.mxu0 %v7451_v23  ;;  %v7040_v23 = vld [vmem:[%s9283_s1 + $0x90] sm:$0xff]   ;;  %v1839_v0 = vld [vmem:[#allocation2 + $0x48] sm:$0xff] }
  0x80   : > { %5651 = vmatpush3.bf16.msra.mxu1 %v7037_v4  ;;  %5772 = vmatprep.subr.bf16.mxu0 %v7045_v38  ;;  %v7698_v4 = vpack.c.bf16 %v693_v3, %v692_v2  ;;  %v7058_v63 = vld [vmem:[%s9283_s1 + $0x1f0] sm:$0xff]   ;;  %v7780_v3 = vpack.c.bf16 %v777_v60, %v776_v59 }
  0x81   : > { %6364 = vmatprep.subr.bf16.mxu1 %v7038_v16  ;;  %v1840_v2 = vld [vmem:[#allocation2 + $0x50] sm:$0xff] }
  0x82   : > { %1067 = vmatmul.mubr.bf16.gmra.mrb[16].mxu0 %v7608_v19  ;;  %v570_v17 = vld [vmem:[#allocation2 + $0x9] sm:$0xff] }
  0x83   : > { %1074 = vmatprep.mubr.bf16.mxu0 %v7610_v21  ;;  %1501 = vmatmul.mubr.bf16.vlgmr.msra.gmra.mrb[16].mxu1 %v506_v22  ;;  %v765_v22 = vld [vmem:[#allocation2 + $0x51] sm:$0xff]  ;;  %v602_v15 = vpack.c.bf16 %v571_v7, %v570_v17 }
  0x84   : > { %6365 = vmatpush3.bf16.msra.mxu1 %v7038_v16  ;;  %1508 = vmatprep.mubr.bf16.mxu1 %v7458_v27  ;;  %v679_v27 = vld [vmem:[#allocation2 + $0xef] sm:$0xff] }
  0x85   : > { %6366 = vmatprep.subr.bf16.mxu1 %v7039_v20  ;;  %v7636_v39 = vpack.c.bf16 %v679_v27, %v678_v36  ;;  %v770_v36 = vld [vmem:[#allocation2 + $0xa9] sm:$0xff]  ;;  %v771_v27 = vld [vmem:[#allocation2 + $0xb1] sm:$0xff] }
  0x88   : > { %6367 = vmatpush3.bf16.msra.mxu1 %v7039_v20  ;;  %v7725_v20 = vpack.c.bf16 %v767_v29, %v766_v26  ;;  %v7063_v29 = vld [vmem:[%s9283_s1 + $0x208] sm:$0xff]  }
  0x89   : > { %6368 = vmatprep.subr.bf16.mxu1 %v7040_v23 }
  0x8a   : > { %1075 = vmatmul.mubr.bf16.gmra.mrb[20].mxu0 %v7619_v8 }
  0x8b   : > { %1082 = vmatprep.mubr.bf16.mxu0 %v7624_v33  ;;  %1509 = vmatmul.mubr.bf16.gmra.mrb[20].mxu1 %v7487_v47  ;;  %v7043_v47 = vld [vmem:[%s9283_s1 + $0xa8] sm:$0xff]  }
  0x8c   : > { %1516 = vmatprep.mubr.bf16.mxu1 %v7490_v49  ;;  %6369 = vmatpush3.bf16.msra.mxu1 %v7040_v23  ;;  %v681_v49 = vld [vmem:[#allocation2 + $0x10f] sm:$0xff] }
  0x8d   : > { %6370 = vmatprep.subr.bf16.mxu1 %v7041_v34  ;;  %v7650_v42 = vpack.c.bf16 %v681_v49, %v680_v41  ;;  %v769_v23 = vld [vmem:[#allocation2 + $0x91] sm:$0xff]  ;;  %v7745_v41 = vpack.c.bf16 %v771_v27, %v770_v36  ;;  %v772_v49 = vld [vmem:[#allocation2 + $0xc9] sm:$0xff] }
  0x8e   : > { %v595_v36 = vld [vmem:[#allocation2 + $0x191] sm:$0xff] }
  0x90   : > { %6371 = vmatpush3.bf16.msra.mxu1 %v7041_v34  ;;  %v7049_v34 = vld [vmem:[%s9283_s1 + $0x1d0] sm:$0xff]  }
  0x91   : > { %6372 = vmatprep.subr.bf16.mxu1 %v7042_v11 }
  0x92   : > { %1083 = vmatmul.mubr.bf16.gmra.mrb[24].mxu0 %v7636_v39 }
  0x93   : > { %1090 = vmatprep.mubr.bf16.mxu0 %v7641_v40  ;;  %1517 = vmatmul.mubr.bf16.gmra.mrb[24].mxu1 %v7509_v62  ;;  %v682_v62 = vld [vmem:[#allocation2 + $0x127] sm:$0xff] }
  0x94   : > { %1524 = vmatprep.mubr.bf16.mxu1 %v7514_v6  ;;  %6373 = vmatpush3.bf16.msra.mxu1 %v7042_v11  ;;  %v7662_v50 = vpack.c.bf16 %v683_v48, %v682_v62  ;;  %v7050_v11 = vld [vmem:[%s9283_s1 + $0x190] sm:$0xff]  }
  0x95   : > { %6374 = vmatprep.subr.bf16.mxu1 %v7043_v47  ;;  %v774_v62 = vld [vmem:[#allocation2 + $0xe9] sm:$0xff]  ;;  %v775_v48 = vld [vmem:[#allocation2 + $0xf1] sm:$0xff] }
  0x96   : > { %v7765_v56 = vpack.c.bf16 %v775_v48, %v774_v62 }
  0x98   : > { %6375 = vmatpush3.bf16.msra.mxu1 %v7043_v47  ;;  %v7051_v47 = vld [vmem:[%s9283_s1 + $0x1d8] sm:$0xff]  }
  0x99   : > { %6376 = vmatprep.subr.bf16.mxu1 %v7044_v45 }
  0x9a   : > { %1091 = vmatmul.mubr.bf16.gmra.mrb[28].mxu0 %v7650_v42 }
  0x9b   : > { %1098 = vmatprep.mubr.bf16.mxu0 %v7463_v31  ;;  %1525 = vmatmul.mubr.bf16.gmra.mrb[28].mxu1 %v7556_v35 }
  0x9c   : > { %1532 = vmatprep.mubr.bf16.mxu1 %v7547_v28  ;;  %6377 = vmatpush3.bf16.msra.mxu1 %v7044_v45  ;;  %v773_v45 = vld [vmem:[#allocation2 + $0xd1] sm:$0xff] }
  0x9d   : > { %6378 = vmatprep.subr.bf16.mxu1 %v7053_v46  ;;  %v7760_v51 = vpack.c.bf16 %v773_v45, %v772_v49  ;;  %v598_v49 = vld [vmem:[#allocation2 + $0x1c9] sm:$0xff]  ;;  %v599_v45 = vld [vmem:[#allocation2 + $0x1d1] sm:$0xff] }
  0x9e   : > { %v7848_v48 = vpack.c.bf16 %v599_v45, %v598_v49 }
  0xa0   : > { %6379 = vmatpush3.bf16.msra.mxu1 %v7053_v46  ;;  %v7054_v46 = vld [vmem:[%s9283_s1 + $0x1e0] sm:$0xff]  }
  0xa1   : > { %6412 = vmatprep.subr.bf16.mxu1 %v7669_v54 }
  0xa2   : > { %1099 = vmatmul.mubr.bf16.gmra.mrb[32].mxu0 %v7662_v50 }
  0xa3   : > { %1106 = vmatprep.mubr.bf16.mxu0 %v7465_v32  ;;  %1533 = vmatmul.mubr.bf16.gmra.mrb[32].mxu1 %v7579_v53 }
  0xa4   : > { %1540 = vmatprep.mubr.bf16.mxu1 %v7582_v14 }
  0xaa   : > { %1107 = vmatmul.mubr.bf16.gmra.mrb[36].mxu0 %v7674_v55 }
  0xab   : > { %1114 = vmatprep.mubr.bf16.mxu0 %v7483_v43  ;;  %1541 = vmatmul.mubr.bf16.gmra.mrb[36].mxu1 %v7608_v19 }
  0xac   : > { %1548 = vmatprep.mubr.bf16.mxu1 %v7610_v21 }
  0xb2   : > { %1115 = vmatmul.mubr.bf16.gmra.mrb[40].mxu0 %v7680_v58 }
  0xb3   : > { %1122 = vmatprep.mubr.bf16.mxu0 %v7485_v44  ;;  %1549 = vmatmul.mubr.bf16.gmra.mrb[40].mxu1 %v7619_v8 }
  0xb4   : > { %1556 = vmatprep.mubr.bf16.mxu1 %v7624_v33 }
  0xba   : > { %1123 = vmatmul.mubr.bf16.gmra.mrb[44].mxu0 %v7686_v61 }
  0xbb   : > { %1130 = vmatprep.mubr.bf16.mxu0 %v7523_v5  ;;  %1557 = vmatmul.mubr.bf16.gmra.mrb[44].mxu1 %v7636_v39 }
  0xbc   : > { %1564 = vmatprep.mubr.bf16.mxu1 %v7641_v40 }
  0xc2   : > { %1131 = vmatmul.mubr.bf16.gmra.mrb[48].mxu0 %v7692_v1 }
  0xc3   : > { %1138 = vmatprep.mubr.bf16.mxu0 %v7525_v13  ;;  %1565 = vmatmul.mubr.bf16.gmra.mrb[48].mxu1 %v7650_v42 }
  0xc4   : > { %1572 = vmatprep.mubr.bf16.mxu1 %v7463_v31  ;;  %v696_v31 = vld [vmem:[#allocation2 + $0x207] sm:$0xff] }
  0xc5   : > { %v7712_v16 = vpack.c.bf16 %v697_v10, %v696_v31  ;;  %v7059_v31 = vld [vmem:[%s9283_s1 + $0x1b0] sm:$0xff]   ;;  %v1871_v10 = vpack.c.bf16 %v1840_v2, %v1839_v0 }
  0xca   : > { %1139 = vmatmul.mubr.bf16.gmra.mrb[52].mxu0 %v7698_v4 }
  0xcb   : > { %1146 = vmatprep.mubr.bf16.mxu0 %v7554_v30  ;;  %1573 = vmatmul.mubr.bf16.gmra.mrb[52].mxu1 %v7662_v50 }
  0xcc   : > { %1580 = vmatprep.mubr.bf16.mxu1 %v7465_v32  ;;  %v764_v32 = vld [vmem:[#allocation2 + $0x49] sm:$0xff] }
  0xd2   : > { %1147 = vmatmul.mubr.bf16.gmra.mrb[56].mxu0 %v7704_v9 }
  0xd3   : > { %1154 = vmatprep.mubr.bf16.mxu0 %v761_v37  ;;  %1581 = vmatmul.mubr.bf16.gmra.mrb[56].mxu1 %v7674_v55  ;;  %v7720_v37 = vpack.c.bf16 %v765_v22, %v764_v32  ;;  %v1791_v32 = vld [vmem:[#allocation2 + $0x47] sm:$0xff]  ;;  %v1792_v22 = vld [vmem:[#allocation2 + $0x4f] sm:$0xff] }
  0xd4   : > { %1588 = vmatprep.mubr.bf16.mxu1 %v7483_v43  ;;  %v7046_v43 = vld [vmem:[%s9283_s1 + $0x180] sm:$0xff]   ;;  %v1823_v26 = vpack.c.bf16 %v1792_v22, %v1791_v32 }
  0xda   : > { %1155 = vmatmul.mubr.bf16.gmra.mrb[60].mxu0 %v7712_v16 }
  0xdb   : > { %6332 = vmatprep.mubr.bf16.mxu0 %v7714_v18  ;;  %1589 = vmatmul.mubr.bf16.gmra.mrb[60].mxu1 %v7680_v58 }
  0xdc   : > { %1596 = vmatprep.mubr.bf16.mxu1 %v7485_v44  ;;  %v768_v44 = vld [vmem:[#allocation2 + $0x89] sm:$0xff] }
  0xdd   : > { %v7740_v38 = vpack.c.bf16 %v769_v23, %v768_v44  ;;  %v593_v23 = vld [vmem:[#allocation2 + $0x171] sm:$0xff] }
  0xe2   : > { %6333 = vmatmul.mubr.bf16.vlgmr.msra.gmra.mrb[64].mxu0 %v7720_v37 }
  0xe3   : > { %5773 = vmatpush3.bf16.msra.mxu0 %v7046_v43  ;;  %6336 = vmatprep.mubr.bf16.mxu0 %v7725_v20  ;;  %v7064_v43 = vld [vmem:[%s9283_s1 + $0x210] sm:$0xff]  }
  0xe4   : > { %1597 = vmatmul.mubr.bf16.gmra.mrb[64].mxu1 %v7686_v61  ;;  %5774 = vmatprep.subr.bf16.mxu0 %v7047_v24  ;;  %v7065_v24 = vld [vmem:[%s9283_s1 + $0x218] sm:$0xff]  }
  0xe5   : > { %1604 = vmatprep.mubr.bf16.mxu1 %v7523_v5  ;;  %v7052_v5 = vld [vmem:[%s9283_s1 + $0x198] sm:$0xff]  }
  0xe7   : > { %5775 = vmatpush3.bf16.msra.mxu0 %v7048_v25  ;;  %v591_v25 = vld [vmem:[#allocation2 + $0x151] sm:$0xff] }
  0xe8   : > { %5776 = vmatprep.subr.bf16.mxu0 %v7049_v34  ;;  %v594_v34 = vld [vmem:[#allocation2 + $0x189] sm:$0xff] }
  0xea   : > { %6337 = vmatmul.mubr.bf16.gmra.mrb[68].mxu0 %v7740_v38 }
  0xeb   : > { %5777 = vmatpush3.bf16.msra.mxu0 %v7050_v11  ;;  %6340 = vmatprep.mubr.bf16.mxu0 %v7745_v41  ;;  %v7840_v11 = vpack.c.bf16 %v595_v36, %v594_v34 }
  0xec   : > { %1605 = vmatmul.mubr.bf16.gmra.mrb[68].mxu1 %v7692_v1  ;;  %5778 = vmatprep.subr.bf16.mxu0 %v7051_v47  ;;  %v596_v47 = vld [vmem:[#allocation2 + $0x1a9] sm:$0xff] }
  0xed   : > { %1612 = vmatprep.mubr.bf16.mxu1 %v7525_v13  ;;  %v7057_v13 = vld [vmem:[%s9283_s1 + $0x1a8] sm:$0xff]  }
  0xef   : > { %5779 = vmatpush3.bf16.msra.mxu0 %v7052_v5  ;;  %v597_v5 = vld [vmem:[#allocation2 + $0x1b1] sm:$0xff] }
  0xf0   : > { %5780 = vmatprep.subr.bf16.mxu0 %v7054_v46  ;;  %v7846_v62 = vpack.c.bf16 %v597_v5, %v596_v47 }
  0xf2   : > { %6341 = vmatmul.mubr.bf16.gmra.mrb[72].mxu0 %v7760_v51 }
  0xf3   : > { %5781 = vmatpush3.bf16.msra.mxu0 %v7055_v52  ;;  %6344 = vmatprep.mubr.bf16.mxu0 %v7765_v56 }
  0xf4   : > { %1613 = vmatmul.mubr.bf16.gmra.mrb[72].mxu1 %v7698_v4  ;;  %5782 = vmatprep.subr.bf16.mxu0 %v7056_v57  ;;  %v600_v57 = vld [vmem:[#allocation2 + $0x1e9] sm:$0xff] }
  0xf5   : > { %1620 = vmatprep.mubr.bf16.mxu1 %v7554_v30  ;;  %v7061_v30 = vld [vmem:[%s9283_s1 + $0x1b8] sm:$0xff]  }
  0xf7   : > { %5783 = vmatpush3.bf16.msra.mxu0 %v7057_v13  ;;  %v601_v13 = vld [vmem:[#allocation2 + $0x1f1] sm:$0xff] }
  0xf8   : > { %5784 = vmatprep.subr.bf16.mxu0 %v7058_v63  ;;  %v7855_v17 = vpack.c.bf16 %v601_v13, %v600_v57 }
  0xfa   : > { %6345 = vmatmul.mubr.bf16.gmra.mrb[76].mxu0 %v7780_v3 }
  0xfb   : > { %5785 = vmatpush3.bf16.msra.mxu0 %v7059_v31  ;;  %2159 = vmatprep.mubr.bf16.mxu0 %v1871_v10  ;;  %v1858_v31 = vld [vmem:[#allocation2 + $0x170] sm:$0xff] }
  0xfc   : > { %1621 = vmatmul.mubr.bf16.gmra.mrb[76].mxu1 %v7704_v9  ;;  %5786 = vmatprep.subr.bf16.mxu0 %v7060_v12 }
  0xfd   : > { %6380 = vmatprep.mubr.bf16.mxu1 %v602_v15 }
  0xff   : > { %5787 = vmatpush3.bf16.msra.mxu0 %v7061_v30 }
 0x102   : > { %2160 = vmatmul.mubr.bf16.vlgmr.msra.gmra.mrb[80].mxu0 %v1823_v26 }
 0x103   : > { %2167 = vmatprep.mubr.bf16.mxu0 %v7514_v6  ;;  %v7066_v6 = vld [vmem:[%s9283_s1 + $0x220] sm:$0xff]  }
 0x104   : > { %6381 = vmatmul.mubr.bf16.vlgmr.msra.gmra.mrb[80].mxu1 %v7714_v18  ;;  %v590_v18 = vld [vmem:[#allocation2 + $0x149] sm:$0xff] }
 0x105   : > { %6413 = vmatpush3.bf16.msra.mxu1 %v7669_v54  ;;  %6384 = vmatprep.mubr.bf16.mxu1 %v7720_v37  ;;  %v589_v54 = vld [vmem:[#allocation2 + $0x131] sm:$0xff] }
 0x106   : > { %6414 = vmatprep.subr.bf16.mxu1 %v7063_v29 }
 0x109   : > { %6415 = vmatpush3.bf16.msra.mxu1 %v7063_v29  ;;  %v1860_v29 = vld [vmem:[#allocation2 + $0x190] sm:$0xff] }
 0x10a   : > { %2168 = vmatmul.mubr.bf16.gmra.mrb[84].mxu0 %v7556_v35  ;;  %6416 = vmatprep.subr.bf16.mxu1 %v7064_v43  ;;  %v7067_v35 = vld [vmem:[%s9283_s1 + $0x228] sm:$0xff]  }
 0x10b   : > { %2175 = vmatprep.mubr.bf16.mxu0 %v7547_v28  ;;  %v7068_v28 = vld [vmem:[%s9283_s1 + $0x230] sm:$0xff]  }
 0x10c   : > { %6385 = vmatmul.mubr.bf16.gmra.mrb[84].mxu1 %v7725_v20 }
 0x10d   : > { %6388 = vmatprep.mubr.bf16.mxu1 %v7740_v38  ;;  %6417 = vmatpush3.bf16.msra.mxu1 %v7064_v43 }
 0x10e   : > { %6418 = vmatprep.subr.bf16.mxu1 %v7065_v24 }
 0x111   : > { %6419 = vmatpush3.bf16.msra.mxu1 %v7065_v24 }
 0x112   : > { %2176 = vmatmul.mubr.bf16.gmra.mrb[88].mxu0 %v7579_v53  ;;  %6420 = vmatprep.subr.bf16.mxu1 %v7066_v6  ;;  %v7069_v53 = vld [vmem:[%s9283_s1 + $0x238] sm:$0xff]  }
 0x113   : > { %2183 = vmatprep.mubr.bf16.mxu0 %v7582_v14  ;;  %v588_v14 = vld [vmem:[#allocation2 + $0x129] sm:$0xff] }
 0x114   : > { %6389 = vmatmul.mubr.bf16.gmra.mrb[88].mxu1 %v7745_v41  ;;  %v7830_v44 = vpack.c.bf16 %v589_v54, %v588_v14 }
 0x115   : > { %6392 = vmatprep.mubr.bf16.mxu1 %v7760_v51  ;;  %6421 = vmatpush3.bf16.msra.mxu1 %v7066_v6 }
 0x116   : > { %6422 = vmatprep.subr.bf16.mxu1 %v7067_v35 }
 0x119   : > { %6423 = vmatpush3.bf16.msra.mxu1 %v7067_v35 }
 0x11a   : > { %2184 = vmatmul.mubr.bf16.gmra.mrb[92].mxu0 %v7608_v19  ;;  %6424 = vmatprep.subr.bf16.mxu1 %v7068_v28  ;;  %v7832_v19 = vpack.c.bf16 %v591_v25, %v590_v18 }
 0x11b   : > { %2191 = vmatprep.mubr.bf16.mxu0 %v7610_v21  ;;  %v592_v21 = vld [vmem:[#allocation2 + $0x169] sm:$0xff] }
 0x11c   : > { %6393 = vmatmul.mubr.bf16.gmra.mrb[92].mxu1 %v7765_v56  ;;  %v7838_v27 = vpack.c.bf16 %v593_v23, %v592_v21 }
 0x11d   : > { %6396 = vmatprep.mubr.bf16.mxu1 %v7780_v3  ;;  %6425 = vmatpush3.bf16.msra.mxu1 %v7068_v28 }
 0x11e   : > { %6426 = vmatprep.subr.bf16.mxu1 %v7069_v53 }
 0x121   : > { %6427 = vmatpush3.bf16.msra.mxu1 %v7069_v53 }
 0x122   : > { %2192 = vmatmul.mubr.bf16.gmra.mrb[96].mxu0 %v7619_v8  ;;  %v1853_v8 = vld [vmem:[#allocation2 + $0x128] sm:$0xff] }
 0x123   : > { %2199 = vmatprep.mubr.bf16.mxu0 %v7624_v33  ;;  %v1854_v33 = vld [vmem:[#allocation2 + $0x130] sm:$0xff] }
 0x124   : > { %6397 = vmatmul.mubr.bf16.gmra.mrb[0].mxu1 %v7830_v44  ;;  %v1878_v46 = vpack.c.bf16 %v1854_v33, %v1853_v8 }
 0x125   : > { %6400 = vmatprep.mubr.bf16.mxu1 %v7832_v19 }
 0x12a   : > { %2200 = vmatmul.mubr.bf16.gmra.mrb[100].mxu0 %v7636_v39  ;;  %v1855_v39 = vld [vmem:[#allocation2 + $0x148] sm:$0xff] }
 0x12b   : > { %2207 = vmatprep.mubr.bf16.mxu0 %v7641_v40  ;;  %v1856_v40 = vld [vmem:[#allocation2 + $0x150] sm:$0xff] }
 0x12c   : > { %6401 = vmatmul.mubr.bf16.gmra.mrb[4].mxu1 %v7838_v27  ;;  %v1879_v0 = vpack.c.bf16 %v1856_v40, %v1855_v39  ;;  %v1866_v40 = vld [vmem:[#allocation2 + $0x1f0] sm:$0xff] }
 0x12d   : > { %6404 = vmatprep.mubr.bf16.mxu1 %v7840_v11 }
 0x132   : > { %2208 = vmatmul.mubr.bf16.gmra.mrb[104].mxu0 %v7650_v42  ;;  %v1857_v42 = vld [vmem:[#allocation2 + $0x168] sm:$0xff] }
 0x133   : > { %2215 = vmatprep.mubr.bf16.mxu0 %v1878_v46  ;;  %v1880_v32 = vpack.c.bf16 %v1858_v31, %v1857_v42 }
 0x134   : > { %6405 = vmatmul.mubr.bf16.gmra.mrb[8].mxu1 %v7846_v62 }
 0x135   : > { %v5516_v52 = vpop.f32.mrb[0].mxu0  ;;  %6408 = vmatprep.mubr.bf16.mxu1 %v7848_v48 }
 0x136   : > { %v5517_v59 = vpop.f32.mrb[1].mxu0 }
 0x137   : > { %v7853_v60 = vadd.f32 %v5517_v59, %v5516_v52  ;;  %v5519_v63 = vpop.f32.mrb[2].mxu0 }
 0x138   : > { %v5520_v2 = vpop.f32.mrb[3].mxu0 }
 0x139   : > { %v7857_v7 = vadd.f32 %v5520_v2, %v5519_v63 }
 0x13a   : > { %2216 = vmatmul.mubr.bf16.gmra.mrb[108].mxu0 %v7662_v50  ;;  %v1859_v50 = vld [vmem:[#allocation2 + $0x188] sm:$0xff] }
 0x13b   : > { %2223 = vmatprep.mubr.bf16.mxu0 %v1879_v0  ;;  %v1881_v35 = vpack.c.bf16 %v1860_v29, %v1859_v50 }
 0x13c   : > { %6409 = vmatmul.mubr.bf16.gmra.mrb[12].mxu1 %v7855_v17 }
 0x13d   : > { %v5522_v10 = vpop.f32.mrb[4].mxu0  ;;  %6428 = vmatprep.mubr.bf16.mxu1 %v7720_v37 }
 0x13e   : > { %v5523_v12 = vpop.f32.mrb[5].mxu0 }
 0x13f   : > { %v7862_v15 = vadd.f32 %v5523_v12, %v5522_v10  ;;  %v5525_v30 = vpop.f32.mrb[6].mxu0 }
 0x140   : > { %v5526_v22 = vpop.f32.mrb[7].mxu0 }
 0x141   : > { %v7864_v26 = vadd.f32 %v5526_v22, %v5525_v30  ;;  %v1868_v30 = vld [vmem:[#allocation2 + $0x210] sm:$0xff] }
 0x142   : > { %2224 = vmatmul.mubr.bf16.gmra.mrb[112].mxu0 %v7674_v55  ;;  %v1861_v55 = vld [vmem:[#allocation2 + $0x1a8] sm:$0xff] }
 0x143   : > { %2231 = vmatprep.mubr.bf16.mxu0 %v1880_v32 }
 0x144   : > { %6429 = vmatmul.mubr.bf16.vlgmr.msra.gmra.mrb[80].mxu1 %v7725_v20  ;;  %v1862_v20 = vld [vmem:[#allocation2 + $0x1b0] sm:$0xff] }
 0x145   : > { %v5528_v43 = vpop.f32.mrb[8].mxu0  ;;  %6432 = vmatprep.mubr.bf16.mxu1 %v7740_v38  ;;  %v1882_v25 = vpack.c.bf16 %v1862_v20, %v1861_v55 }
 0x146   : > { %v5529_v24 = vpop.f32.mrb[9].mxu0 }
 0x147   : > { %v7869_v37 = vadd.f32 %v5529_v24, %v5528_v43  ;;  %v5531_v6 = vpop.f32.mrb[10].mxu0 }
 0x148   : > { %v5532_v28 = vpop.f32.mrb[11].mxu0 }
 0x149   : > { %v7871_v53 = vadd.f32 %v5532_v28, %v5531_v6 }
 0x14a   : > { %2232 = vmatmul.mubr.bf16.gmra.mrb[116].mxu0 %v7680_v58  ;;  %v1863_v58 = vld [vmem:[#allocation2 + $0x1c8] sm:$0xff] }
 0x14b   : > { %2239 = vmatprep.mubr.bf16.mxu0 %v1881_v35 }
 0x14c   : > { %6433 = vmatmul.mubr.bf16.gmra.mrb[84].mxu1 %v7745_v41  ;;  %v1864_v41 = vld [vmem:[#allocation2 + $0x1d0] sm:$0xff] }
 0x14d   : > { %v5534_v14 = vpop.f32.mrb[12].mxu0  ;;  %6436 = vmatprep.mubr.bf16.mxu1 %v7760_v51  ;;  %v1883_v47 = vpack.c.bf16 %v1864_v41, %v1863_v58 }
 0x14e   : > { %v5535_v54 = vpop.f32.mrb[13].mxu0 }
 0x14f   : > { %v7876_v38 = vadd.f32 %v5535_v54, %v5534_v14  ;;  %v5537_v18 = vpop.f32.mrb[14].mxu0  ;;  %v1870_v14 = vld [vmem:[#allocation2 + $0x230] sm:$0xff] }
 0x150   : > { %v5538_v21 = vpop.f32.mrb[15].mxu0 }
 0x151   : > { %v7878_v23 = vadd.f32 %v5538_v21, %v5537_v18  ;;  %v1916_v21 = vld [vmem:[#allocation2 + $0x211] sm:$0xff] }
 0x152   : > { %2240 = vmatmul.mubr.bf16.gmra.mrb[120].mxu0 %v7686_v61 }
 0x153   : > { %2247 = vmatprep.mubr.bf16.mxu0 %v1882_v25  ;;  %v1915_v25 = vld [vmem:[#allocation2 + $0x209] sm:$0xff] }
 0x154   : > { %6437 = vmatmul.mubr.bf16.gmra.mrb[88].mxu1 %v7765_v56 }
 0x155   : > { %v5540_v34 = vpop.f32.mrb[16].mxu0  ;;  %6440 = vmatprep.mubr.bf16.mxu1 %v7780_v3  ;;  %v1865_v3 = vld [vmem:[#allocation2 + $0x1e8] sm:$0xff] }
 0x156   : > { %v5541_v36 = vpop.f32.mrb[17].mxu0  ;;  %v5652_v51 = vpop.f32.mrb[16].mxu1  ;;  %v1884_v0 = vpack.c.bf16 %v1866_v40, %v1865_v3  ;;  %v1917_v40 = vld [vmem:[#allocation2 + $0x229] sm:$0xff] }
 0x157   : > { %v7883_v8 = vadd.f32 %v5541_v36, %v5540_v34  ;;  %v5543_v33 = vpop.f32.mrb[18].mxu0  ;;  %v5653_v5 = vpop.f32.mrb[17].mxu1 }
 0x158   : > { %v5544_v49 = vpop.f32.mrb[19].mxu0  ;;  %v7885_v45 = vadd.f32 %v5653_v5, %v5652_v51  ;;  %v5655_v46 = vpop.f32.mrb[18].mxu1 }
 0x159   : > { %v7887_v61 = vadd.f32 %v5544_v49, %v5543_v33  ;;  %v5656_v39 = vpop.f32.mrb[19].mxu1 }
 0x15a   : > { %2248 = vmatmul.mubr.bf16.gmra.mrb[124].mxu0 %v7692_v1  ;;  %v7890_v56 = vadd.f32 %v5656_v39, %v5655_v46  ;;  %v1821_v46 = vld [vmem:[#allocation2 + $0x227] sm:$0xff]  ;;  %v1822_v39 = vld [vmem:[#allocation2 + $0x22f] sm:$0xff] }
 0x15b   : > { %2255 = vmatprep.mubr.bf16.mxu0 %v1883_v47 }
 0x15c   : > { %6441 = vmatmul.mubr.bf16.gmra.mrb[92].mxu1 %v7830_v44 }
 0x15d   : > { %v5546_v52 = vpop.f32.mrb[20].mxu0  ;;  %6444 = vmatprep.mubr.bf16.mxu1 %v7832_v19  ;;  %v1867_v19 = vld [vmem:[#allocation2 + $0x208] sm:$0xff] }
 0x15e   : > { %v5547_v57 = vpop.f32.mrb[21].mxu0  ;;  %v5658_v13 = vpop.f32.mrb[20].mxu1  ;;  %v1885_v24 = vpack.c.bf16 %v1868_v30, %v1867_v19 }
 0x15f   : > { %v7894_v59 = vadd.f32 %v5547_v57, %v5546_v52  ;;  %v5549_v63 = vpop.f32.mrb[22].mxu0  ;;  %v5659_v2 = vpop.f32.mrb[21].mxu1  ;;  %v1918_v52 = vld [vmem:[#allocation2 + $0x231] sm:$0xff] }
 0x160   : > { %v5550_v42 = vpop.f32.mrb[23].mxu0  ;;  %v7896_v31 = vadd.f32 %v5659_v2, %v5658_v13  ;;  %v5661_v1 = vpop.f32.mrb[22].mxu1  ;;  %v1838_v13 = vpack.c.bf16 %v1822_v39, %v1821_v46 }
 0x161   : > { %v7898_v10 = vadd.f32 %v5550_v42, %v5549_v63  ;;  %v5662_v12 = vpop.f32.mrb[23].mxu1 }
 0x162   : > { %2256 = vmatmul.mubr.bf16.gmra.mrb[128].mxu0 %v7698_v4  ;;  %v7901_v44 = vadd.f32 %v5662_v12, %v5661_v1  ;;  %v1934_v12 = vpack.c.bf16 %v1918_v52, %v1917_v40 }
 0x163   : > { %2263 = vmatprep.mubr.bf16.mxu0 %v1884_v0 }
 0x164   : > { %6445 = vmatmul.mubr.bf16.gmra.mrb[0].mxu1 %v7838_v27 }
 0x165   : > { %v5552_v32 = vpop.f32.mrb[24].mxu0  ;;  %6448 = vmatprep.mubr.bf16.mxu1 %v7840_v11  ;;  %v1869_v11 = vld [vmem:[#allocation2 + $0x228] sm:$0xff] }
 0x166   : > { %v5553_v22 = vpop.f32.mrb[25].mxu0  ;;  %v5664_v50 = vpop.f32.mrb[24].mxu1  ;;  %v1886_v36 = vpack.c.bf16 %v1870_v14, %v1869_v11 }
 0x167   : > { %v7905_v29 = vadd.f32 %v5553_v22, %v5552_v32  ;;  %v5555_v43 = vpop.f32.mrb[26].mxu0  ;;  %v5665_v6 = vpop.f32.mrb[25].mxu1 }
 0x168   : > { %v5556_v35 = vpop.f32.mrb[27].mxu0  ;;  %v7907_v28 = vadd.f32 %v5665_v6, %v5664_v50  ;;  %v5667_v4 = vpop.f32.mrb[26].mxu1 }
 0x169   : > { %v7909_v55 = vadd.f32 %v5556_v35, %v5555_v43  ;;  %v5668_v20 = vpop.f32.mrb[27].mxu1 }
 0x16a   : > { %2264 = vmatmul.mubr.bf16.gmra.mrb[132].mxu0 %v7704_v9  ;;  %v7912_v27 = vadd.f32 %v5668_v20, %v5667_v4 }
 0x16b   : > { %2271 = vmatprep.mubr.bf16.mxu0 %v1885_v24 }
 0x16c   : > { %6449 = vmatmul.mubr.bf16.gmra.mrb[4].mxu1 %v7846_v62  ;;  %v1933_v62 = vpack.c.bf16 %v1916_v21, %v1915_v25 }
 0x16d   : > { %v5558_v54 = vpop.f32.mrb[28].mxu0  ;;  %6452 = vmatprep.mubr.bf16.mxu1 %v7848_v48 }
 0x16e   : > { %v5559_v18 = vpop.f32.mrb[29].mxu0  ;;  %v5670_v58 = vpop.f32.mrb[28].mxu1 }
 0x16f   : > { %v7916_v41 = vadd.f32 %v5559_v18, %v5558_v54  ;;  %v5561_v34 = vpop.f32.mrb[30].mxu0  ;;  %v5671_v51 = vpop.f32.mrb[29].mxu1 }
 0x170   : > { %v5562_v9 = vpop.f32.mrb[31].mxu0  ;;  %v7918_v33 = vadd.f32 %v5671_v51, %v5670_v58  ;;  %v5673_v47 = vpop.f32.mrb[30].mxu1 }
 0x171   : > { %v7920_v5 = vadd.f32 %v5562_v9, %v5561_v34  ;;  %v5674_v49 = vpop.f32.mrb[31].mxu1 }
 0x172   : > { %2272 = vmatmul.mubr.bf16.gmra.mrb[136].mxu0 %v7712_v16  ;;  %v7923_v48 = vadd.f32 %v5674_v49, %v5673_v47 }
 0x173   : > { %2279 = vmatprep.mubr.bf16.mxu0 %v1886_v36 }
 0x174   : > { %6453 = vmatmul.mubr.bf16.gmra.mrb[8].mxu1 %v7855_v17 }
 0x175   : > { %v5564_v3 = vpop.f32.mrb[32].mxu0  ;;  %6456 = vmatprep.mubr.bf16.mxu1 %v1933_v62 }
 0x176   : > { %v5565_v57 = vpop.f32.mrb[33].mxu0  ;;  %v5676_v63 = vpop.f32.mrb[32].mxu1 }
 0x177   : > { %v5566_v0 = vadd.f32 %v5565_v57, %v5564_v3  ;;  %v5567_v2 = vpop.f32.mrb[34].mxu0  ;;  %v5677_v42 = vpop.f32.mrb[33].mxu1 }
 0x178   : > { %v5568_v1 = vpop.f32.mrb[35].mxu0  ;;  %v7926_v16 = vadd.f32 %v5677_v42, %v5676_v63  ;;  %v5679_v19 = vpop.f32.mrb[34].mxu1 }
 0x179   : > { %v5569_v30 = vadd.f32 %v5568_v1, %v5567_v2  ;;  %v5680_v32 = vpop.f32.mrb[35].mxu1 }
 0x17a   : > { %2280 = vmatmul.mubr.bf16.gmra.mrb[140].mxu0 %v1838_v13  ;;  %v7928_v22 = vadd.f32 %v5680_v32, %v5679_v19 }
 0x17c   : > { %6457 = vmatmul.mubr.bf16.gmra.mrb[12].mxu1 %v1934_v12 }
 0x17d   : > { %v5570_v17 = vpop.f32.mrb[36].mxu0 }
 0x17e   : > { %v5571_v50 = vpop.f32.mrb[37].mxu0  ;;  %v5682_v43 = vpop.f32.mrb[36].mxu1 }
 0x17f   : > { %v5572_v24 = vadd.f32 %v5571_v50, %v5570_v17  ;;  %v5573_v6 = vpop.f32.mrb[38].mxu0  ;;  %v5683_v35 = vpop.f32.mrb[37].mxu1 }
 0x180   : > { %v5574_v4 = vpop.f32.mrb[39].mxu0  ;;  %v7930_v20 = vadd.f32 %v5683_v35, %v5682_v43  ;;  %v5685_v11 = vpop.f32.mrb[38].mxu1 }
 0x181   : > { %v5575_v14 = vadd.f32 %v5574_v4, %v5573_v6  ;;  %v5686_v54 = vpop.f32.mrb[39].mxu1 }
 0x182   : > { %v7932_v18 = vadd.f32 %v5686_v54, %v5685_v11 }
 0x185   : > { %v5576_v25 = vpop.f32.mrb[40].mxu0 }
 0x186   : > { %v5577_v21 = vpop.f32.mrb[41].mxu0  ;;  %v5688_v58 = vpop.f32.mrb[40].mxu1 }
 0x187   : > { %v5578_v34 = vadd.f32 %v5577_v21, %v5576_v25  ;;  %v5579_v36 = vpop.f32.mrb[42].mxu0  ;;  %v5689_v51 = vpop.f32.mrb[41].mxu1 }
 0x188   : > { %v5580_v9 = vpop.f32.mrb[43].mxu0  ;;  %v7934_v47 = vadd.f32 %v5689_v51, %v5688_v58  ;;  %v5691_v62 = vpop.f32.mrb[42].mxu1 }
 0x189   : > { %v5581_v49 = vadd.f32 %v5580_v9, %v5579_v36  ;;  %v5692_v46 = vpop.f32.mrb[43].mxu1 }
 0x18a   : > { %v7936_v39 = vadd.f32 %v5692_v46, %v5691_v62 }
 0x18d   : > { %v5582_v3 = vpop.f32.mrb[44].mxu0 }
 0x18e   : > { %v5583_v40 = vpop.f32.mrb[45].mxu0  ;;  %v5694_v52 = vpop.f32.mrb[44].mxu1 }
 0x18f   : > { %v5584_v57 = vadd.f32 %v5583_v40, %v5582_v3  ;;  %v5585_v13 = vpop.f32.mrb[46].mxu0  ;;  %v5695_v63 = vpop.f32.mrb[45].mxu1 }
 0x190   : > { %v5586_v2 = vpop.f32.mrb[47].mxu0  ;;  %v7938_v42 = vadd.f32 %v5695_v63, %v5694_v52  ;;  %v5697_v1 = vpop.f32.mrb[46].mxu1 }
 0x191   : > { %v5587_v12 = vadd.f32 %v5586_v2, %v5585_v13  ;;  %v5698_v19 = vpop.f32.mrb[47].mxu1 }
 0x192   : > { %v7940_v32 = vadd.f32 %v5698_v19, %v5697_v1 }
 0x195   : > { %v5588_v17 = vpop.f32.mrb[48].mxu0 }
 0x196   : > { %v5589_v50 = vpop.f32.mrb[49].mxu0  ;;  %v5700_v43 = vpop.f32.mrb[48].mxu1 }
 0x197   : > { %v7942_v6 = vadd.f32 %v5589_v50, %v5588_v17  ;;  %v5591_v35 = vpop.f32.mrb[50].mxu0  ;;  %v5701_v4 = vpop.f32.mrb[49].mxu1 }
 0x198   : > { %v5592_v11 = vpop.f32.mrb[51].mxu0  ;;  %v5702_v54 = vadd.f32 %v5701_v4, %v5700_v43  ;;  %v5703_v25 = vpop.f32.mrb[50].mxu1 }
 0x199   : > { %v7944_v21 = vadd.f32 %v5592_v11, %v5591_v35  ;;  %v5704_v58 = vpop.f32.mrb[51].mxu1 }
 0x19a   : > { %v7946_v36 = vadd.f32 %v5702_v54, %v5566_v0  ;;  %v5705_v51 = vadd.f32 %v5704_v58, %v5703_v25 }
 0x19c   : > { %v7948_v9 = vadd.f32 %v5705_v51, %v5569_v30 }
 0x19d   : > { %v5594_v62 = vpop.f32.mrb[52].mxu0 }
 0x19e   : > { %v5595_v46 = vpop.f32.mrb[53].mxu0  ;;  %v5706_v3 = vpop.f32.mrb[52].mxu1 }
 0x19f   : > { %v7950_v40 = vadd.f32 %v5595_v46, %v5594_v62  ;;  %v5597_v52 = vpop.f32.mrb[54].mxu0  ;;  %v5707_v13 = vpop.f32.mrb[53].mxu1 }
 0x1a0   : > { %v5598_v63 = vpop.f32.mrb[55].mxu0  ;;  %v5708_v2 = vadd.f32 %v5707_v13, %v5706_v3  ;;  %v5709_v1 = vpop.f32.mrb[54].mxu1 }
 0x1a1   : > { %v7952_v19 = vadd.f32 %v5598_v63, %v5597_v52  ;;  %v5710_v17 = vpop.f32.mrb[55].mxu1 }
 0x1a2   : > { %v7954_v50 = vadd.f32 %v5708_v2, %v5572_v24  ;;  %v5711_v0 = vadd.f32 %v5710_v17, %v5709_v1 }
 0x1a4   : > { %v7956_v43 = vadd.f32 %v5711_v0, %v5575_v14 }
 0x1a5   : > { %v5600_v30 = vpop.f32.mrb[56].mxu0 }
 0x1a6   : > { %9290 = vst [vmem:[#allocation8_spill] sm:$0xff] %v7956_v43  ;;  %v5601_v35 = vpop.f32.mrb[57].mxu0  ;;  %v5712_v4 = vpop.f32.mrb[56].mxu1 }
 0x1a7   : > { %v7958_v11 = vadd.f32 %v5601_v35, %v5600_v30  ;;  %v5603_v54 = vpop.f32.mrb[58].mxu0  ;;  %v5713_v25 = vpop.f32.mrb[57].mxu1 }
 0x1a8   : > { %v5604_v58 = vpop.f32.mrb[59].mxu0  ;;  %v5714_v51 = vadd.f32 %v5713_v25, %v5712_v4  ;;  %v5715_v62 = vpop.f32.mrb[58].mxu1 }
 0x1a9   : > { %v7960_v46 = vadd.f32 %v5604_v58, %v5603_v54  ;;  %v5716_v3 = vpop.f32.mrb[59].mxu1 }
 0x1aa   : > { %v7962_v52 = vadd.f32 %v5714_v51, %v5578_v34  ;;  %v5717_v24 = vadd.f32 %v5716_v3, %v5715_v62 }
 0x1ac   : > { %v7964_v13 = vadd.f32 %v5717_v24, %v5581_v49 }
 0x1ad   : > { %v5606_v14 = vpop.f32.mrb[60].mxu0 }
 0x1ae   : > { %v5607_v63 = vpop.f32.mrb[61].mxu0  ;;  %v5718_v2 = vpop.f32.mrb[60].mxu1 }
 0x1af   : > { %v7966_v1 = vadd.f32 %v5607_v63, %v5606_v14  ;;  %v5609_v17 = vpop.f32.mrb[62].mxu0  ;;  %v5719_v0 = vpop.f32.mrb[61].mxu1 }
 0x1b0   : > { %v5610_v30 = vpop.f32.mrb[63].mxu0  ;;  %v5720_v35 = vadd.f32 %v5719_v0, %v5718_v2  ;;  %v5721_v43 = vpop.f32.mrb[62].mxu1 }
 0x1b1   : > { %v7968_v4 = vadd.f32 %v5610_v30, %v5609_v17  ;;  %v5722_v54 = vpop.f32.mrb[63].mxu1 }
 0x1b2   : > { %v7970_v25 = vadd.f32 %v5720_v35, %v5584_v57  ;;  %v5723_v34 = vadd.f32 %v5722_v54, %v5721_v43 }
 0x1b4   : > { %v7972_v58 = vadd.f32 %v5723_v34, %v5587_v12 }
 0x1b5   : > { %v6334_v49 = vpop.f32.mrb[64].mxu0 }
 0x1b6   : > { %v1206_v51 = vadd.f32 %v6334_v49, %v7862_v15  ;;  %v1197_v62 = vpop.f32.mrb[65].mxu0 }
 0x1b7   : > { %v5724_v3 = vpop.f32.mrb[64].mxu1  ;;  %v1198_v24 = vadd.f32 %v7853_v60, %v1197_v62  ;;  %v6335_v14 = vpop.f32.mrb[66].mxu0 }
 0x1b8   : > { %v7977_v63 = vadd.f32 %v7896_v31, %v1206_v51  ;;  %v5725_v2 = vpop.f32.mrb[65].mxu1  ;;  %v1209_v17 = vadd.f32 %v6335_v14, %v7864_v26  ;;  %v1200_v0 = vpop.f32.mrb[67].mxu0 }
 0x1b9   : > { %v7981_v57 = vadd.f32 %v7885_v45, %v1198_v24  ;;  %v5726_v12 = vadd.f32 %v5725_v2, %v5724_v3  ;;  %v5727_v43 = vpop.f32.mrb[66].mxu1  ;;  %v1201_v30 = vadd.f32 %v7857_v7, %v1200_v0 }
 0x1ba   : > { %v7985_v15 = vadd.f32 %v7901_v44, %v1209_v17  ;;  %v5728_v35 = vpop.f32.mrb[67].mxu1 }
 0x1bb   : > { %v7988_v60 = vadd.f32 %v5726_v12, %v7942_v6  ;;  %v7991_v31 = vadd.f32 %v7890_v56, %v1201_v30  ;;  %v5729_v54 = vadd.f32 %v5728_v35, %v5727_v43 }
 0x1bd   : > { %v7994_v26 = vadd.f32 %v5729_v54, %v7944_v21  ;;  %v6338_v45 = vpop.f32.mrb[68].mxu0 }
 0x1be   : > { %v1222_v34 = vadd.f32 %v6338_v45, %v7876_v38  ;;  %v1213_v49 = vpop.f32.mrb[69].mxu0 }
 0x1bf   : > { %v5730_v51 = vpop.f32.mrb[68].mxu1  ;;  %v1214_v7 = vadd.f32 %v7869_v37, %v1213_v49  ;;  %v6339_v44 = vpop.f32.mrb[70].mxu0 }
 0x1c0   : > { %v7999_v62 = vadd.f32 %v7918_v33, %v1222_v34  ;;  %v5731_v6 = vpop.f32.mrb[69].mxu1  ;;  %v1225_v3 = vadd.f32 %v6339_v44, %v7878_v23  ;;  %v1216_v56 = vpop.f32.mrb[71].mxu0 }
 0x1c1   : > { %v8003_v24 = vadd.f32 %v7907_v28, %v1214_v7  ;;  %v5732_v21 = vadd.f32 %v5731_v6, %v5730_v51  ;;  %v5733_v14 = vpop.f32.mrb[70].mxu1  ;;  %v1217_v2 = vadd.f32 %v7871_v53, %v1216_v56 }
 0x1c2   : > { %v8007_v38 = vadd.f32 %v7923_v48, %v1225_v3  ;;  %v5734_v17 = vpop.f32.mrb[71].mxu1 }
 0x1c3   : > { %v8010_v37 = vadd.f32 %v5732_v21, %v7950_v40  ;;  %v8013_v33 = vadd.f32 %v7912_v27, %v1217_v2  ;;  %v5735_v0 = vadd.f32 %v5734_v17, %v5733_v14 }
 0x1c5   : > { %v8016_v23 = vadd.f32 %v5735_v0, %v7952_v19  ;;  %v6342_v28 = vpop.f32.mrb[72].mxu0 }
 0x1c6   : > { %v1238_v12 = vadd.f32 %v6342_v28, %v7894_v59  ;;  %v1229_v43 = vpop.f32.mrb[73].mxu0 }
 0x1c7   : > { %v5736_v30 = vpop.f32.mrb[72].mxu1  ;;  %v1230_v53 = vadd.f32 %v7883_v8, %v1229_v43  ;;  %v6343_v48 = vpop.f32.mrb[74].mxu0 }
 0x1c8   : > { %v8021_v35 = vadd.f32 %v7930_v20, %v1238_v12  ;;  %v5737_v40 = vpop.f32.mrb[73].mxu1  ;;  %v1241_v54 = vadd.f32 %v6343_v48, %v7898_v10  ;;  %v1232_v27 = vpop.f32.mrb[75].mxu0 }
 0x1c9   : > { %v8025_v45 = vadd.f32 %v7926_v16, %v1230_v53  ;;  %v5738_v19 = vadd.f32 %v5737_v40, %v5736_v30  ;;  %v5739_v34 = vpop.f32.mrb[74].mxu1  ;;  %v1233_v49 = vadd.f32 %v7887_v61, %v1232_v27 }
 0x1ca   : > { %v8029_v59 = vadd.f32 %v7932_v18, %v1241_v54  ;;  %v5740_v51 = vpop.f32.mrb[75].mxu1 }
 0x1cb   : > { %v8032_v8 = vadd.f32 %v5738_v19, %v7958_v11  ;;  %v1538_v20 = vadd.f32 %v7928_v22, %v1233_v49  ;;  %v5741_v7 = vadd.f32 %v5740_v51, %v5739_v34 }
 0x1cd   : > { %v8036_v10 = vadd.f32 %v5741_v7, %v7960_v46  ;;  %v6346_v44 = vpop.f32.mrb[76].mxu0 }
 0x1ce   : > { %v1254_v16 = vadd.f32 %v6346_v44, %v7916_v41  ;;  %v1245_v6 = vpop.f32.mrb[77].mxu0 }
 0x1cf   : > { %v5742_v3 = vpop.f32.mrb[76].mxu1  ;;  %v1246_v61 = vadd.f32 %v7905_v29, %v1245_v6  ;;  %v6347_v56 = vpop.f32.mrb[78].mxu0 }
 0x1d0   : > { %v8041_v18 = vadd.f32 %v7938_v42, %v1254_v16  ;;  %v5743_v21 = vpop.f32.mrb[77].mxu1  ;;  %v1257_v11 = vadd.f32 %v6347_v56, %v7920_v5  ;;  %v1248_v14 = vpop.f32.mrb[79].mxu0 }
 0x1d1   : > { %v8045_v22 = vadd.f32 %v7934_v47, %v1246_v61  ;;  %v5744_v46 = vadd.f32 %v5743_v21, %v5742_v3  ;;  %v5745_v2 = vpop.f32.mrb[78].mxu1  ;;  %v1249_v17 = vadd.f32 %v7909_v55, %v1248_v14 }
 0x1d2   : > { %v8049_v41 = vadd.f32 %v7940_v32, %v1257_v11  ;;  %v5746_v0 = vpop.f32.mrb[79].mxu1 }
 0x1d3   : > { %v8052_v29 = vadd.f32 %v5744_v46, %v7966_v1  ;;  %v1554_v42 = vadd.f32 %v7936_v39, %v1249_v17  ;;  %v5747_v28 = vadd.f32 %v5746_v0, %v5745_v2 }
 0x1d5   : > { %v8056_v5 = vadd.f32 %v5747_v28, %v7968_v4  ;;  %v5788_v12 = vpop.f32.mrb[80].mxu0 }
 0x1d6   : > { %v5789_v47 = vpop.f32.mrb[81].mxu0 }
 0x1d7   : > { %v5790_v43 = vadd.f32 %v5789_v47, %v5788_v12  ;;  %v5791_v30 = vpop.f32.mrb[82].mxu0 }
 0x1d8   : > { %v5792_v53 = vpop.f32.mrb[83].mxu0 }
 0x1d9   : > { %v5793_v48 = vadd.f32 %v5792_v53, %v5791_v30  ;;  %v8059_v55 = vadd.f32 %v5790_v43, %v7981_v57 }
 0x1db   : > { %v8062_v32 = vadd.f32 %v5793_v48, %v7991_v31 }
 0x1dd   : > { %v5794_v1 = vpop.f32.mrb[84].mxu0 }
 0x1de   : > { %v5795_v40 = vpop.f32.mrb[85].mxu0 }
 0x1df   : > { %v5796_v54 = vadd.f32 %v5795_v40, %v5794_v1  ;;  %v5797_v39 = vpop.f32.mrb[86].mxu0 }
 0x1e0   : > { %v5798_v27 = vpop.f32.mrb[87].mxu0 }
 0x1e1   : > { %v5799_v19 = vadd.f32 %v5798_v27, %v5797_v39  ;;  %v6622_v4 = vadd.f32 %v5796_v54, %v7977_v63 }
 0x1e3   : > { %v8066_v34 = vadd.f32 %v5799_v19, %v7985_v15 }
 0x1e5   : > { %v5800_v49 = vpop.f32.mrb[88].mxu0 }
 0x1e6   : > { %v5801_v51 = vpop.f32.mrb[89].mxu0 }
 0x1e7   : > { %v5802_v7 = vadd.f32 %v5801_v51, %v5800_v49  ;;  %v5803_v44 = vpop.f32.mrb[90].mxu0 }
 0x1e8   : > { %v5804_v57 = vpop.f32.mrb[91].mxu0 }
 0x1e9   : > { %v5805_v16 = vadd.f32 %v5804_v57, %v5803_v44  ;;  %v8069_v31 = vadd.f32 %v5802_v7, %v8003_v24 }
 0x1eb   : > { %v8072_v6 = vadd.f32 %v5805_v16, %v8013_v33 }
 0x1ed   : > { %v5806_v3 = vpop.f32.mrb[92].mxu0 }
 0x1ee   : > { %v5807_v61 = vpop.f32.mrb[93].mxu0 }
 0x1ef   : > { %v5808_v56 = vadd.f32 %v5807_v61, %v5806_v3  ;;  %v5809_v21 = vpop.f32.mrb[94].mxu0 }
 0x1f0   : > { %v5810_v63 = vpop.f32.mrb[95].mxu0 }
 0x1f1   : > { %v5811_v11 = vadd.f32 %v5810_v63, %v5809_v21  ;;  %v8075_v15 = vadd.f32 %v5808_v56, %v7999_v62 }
 0x1f3   : > { %v8078_v14 = vadd.f32 %v5811_v11, %v8007_v38 }
 0x1f5   : > { %v5812_v46 = vpop.f32.mrb[96].mxu0 }
 0x1f6   : > { %v5813_v2 = vpop.f32.mrb[97].mxu0 }
 0x1f7   : > { %v5814_v17 = vadd.f32 %v5813_v2, %v5812_v46  ;;  %v5815_v24 = vpop.f32.mrb[98].mxu0 }
 0x1f8   : > { %v5816_v0 = vpop.f32.mrb[99].mxu0 }
 0x1f9   : > { %v5817_v28 = vadd.f32 %v5816_v0, %v5815_v24  ;;  %v8081_v33 = vadd.f32 %v5814_v17, %v8025_v45 }
 0x1fb   : > { %v8083_v12 = vadd.f32 %v5817_v28, %v1538_v20 }
 0x1fd   : > { %v5818_v47 = vpop.f32.mrb[100].mxu0 }
 0x1fe   : > { %v5819_v43 = vpop.f32.mrb[101].mxu0 }
 0x1ff   : > { %v5820_v30 = vadd.f32 %v5819_v43, %v5818_v47  ;;  %v5821_v53 = vpop.f32.mrb[102].mxu0 }
 0x200   : > { %v5822_v62 = vpop.f32.mrb[103].mxu0 }
 0x201   : > { %v5823_v48 = vadd.f32 %v5822_v62, %v5821_v53  ;;  %v8086_v38 = vadd.f32 %v5820_v30, %v8021_v35 }
 0x203   : > { %v8089_v1 = vadd.f32 %v5823_v48, %v8029_v59 }
 0x205   : > { %v5824_v40 = vpop.f32.mrb[104].mxu0 }
 0x206   : > { %v5825_v54 = vpop.f32.mrb[105].mxu0 }
 0x207   : > { %v5826_v39 = vadd.f32 %v5825_v54, %v5824_v40  ;;  %v5827_v45 = vpop.f32.mrb[106].mxu0 }
 0x208   : > { %v5828_v27 = vpop.f32.mrb[107].mxu0 }
 0x209   : > { %v5829_v20 = vadd.f32 %v5828_v27, %v5827_v45  ;;  %v8092_v19 = vadd.f32 %v5826_v39, %v8045_v22 }
 0x20b   : > { %v8094_v49 = vadd.f32 %v5829_v20, %v1554_v42 }
 0x20d   : > { %v5830_v51 = vpop.f32.mrb[108].mxu0 }
 0x20e   : > { %v5831_v7 = vpop.f32.mrb[109].mxu0 }
 0x20f   : > { %v5832_v44 = vadd.f32 %v5831_v7, %v5830_v51  ;;  %v5833_v35 = vpop.f32.mrb[110].mxu0 }
 0x210   : > { %v5834_v57 = vpop.f32.mrb[111].mxu0 }
 0x211   : > { %v5835_v16 = vadd.f32 %v5834_v57, %v5833_v35  ;;  %v8097_v59 = vadd.f32 %v5832_v44, %v8041_v18 }
 0x213   : > { %v8100_v3 = vadd.f32 %v5835_v16, %v8049_v41 }
 0x215   : > { %v5836_v61 = vpop.f32.mrb[112].mxu0 }
 0x216   : > { %v5837_v56 = vpop.f32.mrb[113].mxu0 }
 0x217   : > { %v6430_v21 = vpop.f32.mrb[80].mxu1  ;;  %v5838_v22 = vadd.f32 %v5837_v56, %v5836_v61  ;;  %v5839_v63 = vpop.f32.mrb[114].mxu0 }
 0x218   : > { %v6623_v42 = vadd.f32 %v6622_v4, %v6430_v21  ;;  %v2322_v11 = vpop.f32.mrb[81].mxu1  ;;  %v5840_v46 = vpop.f32.mrb[115].mxu0 }
 0x219   : > { %v6627_v2 = vadd.f32 %v8059_v55, %v2322_v11  ;;  %v6431_v17 = vpop.f32.mrb[82].mxu1  ;;  %v5841_v24 = vadd.f32 %v5840_v46, %v5839_v63  ;;  %v8105_v0 = vadd.f32 %v7946_v36, %v5838_v22  ;;  %v9291_v22 = vld [vmem:[#allocation8_spill] sm:$0xff] }
 0x21a   : > { %2485 = vst [vmem:[%s8107_s8 + $0x10] sm:$0xff] %v6623_v42  ;;  %v6631_v18 = vadd.f32 %v8066_v34, %v6431_v17  ;;  %v2325_v41 = vpop.f32.mrb[83].mxu1  ;;  %v2558_v53 = vmul.f32 %v6623_v42, %v6623_v42 }
 0x21b   : > { %2483 = vst [vmem:[%s8107_s8] sm:$0xff] %v6627_v2  ;;  %v6635_v4 = vadd.f32 %v8062_v32, %v2325_v41  ;;  %v8114_v55 = vadd.f32 %v7948_v9, %v5841_v24  ;;  %v2556_v28 = vmul.f32 %v6627_v2, %v6627_v2 }
 0x21c   : > { %2486 = vst [vmem:[%s8107_s8 + $0x18] sm:$0xff] %v6631_v18  ;;  %v2559_v39 = vmul.f32 %v6631_v18, %v6631_v18 }
 0x21d   : > { %2484 = vst [vmem:[%s8107_s8 + $0x8] sm:$0xff] %v6635_v4  ;;  %v2516_v36 = vadd.f32 %v6635_v4, %v6627_v2  ;;  %v2557_v47 = vmul.f32 %v6635_v4, %v6635_v4  ;;  %v5842_v43 = vpop.f32.mrb[116].mxu0 }
 0x21e   : > { %v5843_v30 = vpop.f32.mrb[117].mxu0 }
 0x21f   : > { %v2517_v62 = vadd.f32 %v6623_v42, %v2516_v36  ;;  %v2588_v48 = vadd.f32 %v2557_v47, %v2556_v28  ;;  %v6434_v40 = vpop.f32.mrb[84].mxu1  ;;  %v5844_v34 = vadd.f32 %v5843_v30, %v5842_v43  ;;  %v5845_v54 = vpop.f32.mrb[118].mxu0 }
 0x220   : > { %v6639_v32 = vadd.f32 %v8075_v15, %v6434_v40  ;;  %v2338_v9 = vpop.f32.mrb[85].mxu1  ;;  %v5846_v45 = vpop.f32.mrb[119].mxu0 }
 0x221   : > { %v2589_v27 = vadd.f32 %v2588_v48, %v2558_v53  ;;  %v6643_v20 = vadd.f32 %v8069_v31, %v2338_v9  ;;  %v2518_v51 = vadd.f32 %v6631_v18, %v2517_v62  ;;  %v6435_v7 = vpop.f32.mrb[86].mxu1  ;;  %v5847_v44 = vadd.f32 %v5846_v45, %v5845_v54 }
 0x222   : > { %2489 = vst [vmem:[%s8107_s8 + $0x30] sm:$0xff] %v6639_v32  ;;  %v6647_v35 = vadd.f32 %v8078_v14, %v6435_v7  ;;  %v2341_v57 = vpop.f32.mrb[87].mxu1  ;;  %v8123_v16 = vadd.f32 %v7954_v50, %v5844_v34  ;;  %v2562_v2 = vmul.f32 %v6639_v32, %v6639_v32 }
 0x223   : > { %2487 = vst [vmem:[%s8107_s8 + $0x20] sm:$0xff] %v6643_v20  ;;  %v2519_v61 = vadd.f32 %v6643_v20, %v2518_v51  ;;  %v2560_v15 = vmul.f32 %v6643_v20, %v6643_v20  ;;  %v2590_v56 = vadd.f32 %v2589_v27, %v2559_v39  ;;  %v6651_v21 = vadd.f32 %v8072_v6, %v2341_v57 }
 0x224   : > { %2490 = vst [vmem:[%s8107_s8 + $0x38] sm:$0xff] %v6647_v35  ;;  %v8129_v31 = vadd.f32 %v9291_v22, %v5847_v44  ;;  %v2563_v4 = vmul.f32 %v6647_v35, %v6647_v35 }
 0x225   : > { %v2591_v63 = vadd.f32 %v2590_v56, %v2560_v15  ;;  %2488 = vst [vmem:[%s8107_s8 + $0x28] sm:$0xff] %v6651_v21  ;;  %v2520_v42 = vadd.f32 %v6651_v21, %v2519_v61  ;;  %v2561_v11 = vmul.f32 %v6651_v21, %v6651_v21  ;;  %v5848_v46 = vpop.f32.mrb[120].mxu0 }
 0x226   : > { %v5849_v14 = vpop.f32.mrb[121].mxu0 }
 0x227   : > { %v2521_v50 = vadd.f32 %v6639_v32, %v2520_v42  ;;  %v2592_v17 = vadd.f32 %v2591_v63, %v2561_v11  ;;  %v6438_v24 = vpop.f32.mrb[88].mxu1  ;;  %v5850_v18 = vadd.f32 %v5849_v14, %v5848_v46  ;;  %v5851_v41 = vpop.f32.mrb[122].mxu0 }
 0x228   : > { %v6655_v6 = vadd.f32 %v8086_v38, %v6438_v24  ;;  %v2354_v28 = vpop.f32.mrb[89].mxu1  ;;  %v5852_v36 = vpop.f32.mrb[123].mxu0 }
 0x229   : > { %v2593_v47 = vadd.f32 %v2592_v17, %v2562_v2  ;;  %v6659_v43 = vadd.f32 %v8081_v33, %v2354_v28  ;;  %v2522_v30 = vadd.f32 %v6647_v35, %v2521_v50  ;;  %v6439_v53 = vpop.f32.mrb[90].mxu1  ;;  %v5853_v62 = vadd.f32 %v5852_v36, %v5851_v41 }
 0x22a   : > { %2493 = vst [vmem:[%s8107_s8 + $0x50] sm:$0xff] %v6655_v6  ;;  %v6663_v48 = vadd.f32 %v8089_v1, %v6439_v53  ;;  %v2357_v40 = vpop.f32.mrb[91].mxu1  ;;  %v8137_v34 = vadd.f32 %v7962_v52, %v5850_v18  ;;  %v2566_v51 = vmul.f32 %v6655_v6, %v6655_v6 }
 0x22b   : > { %2491 = vst [vmem:[%s8107_s8 + $0x40] sm:$0xff] %v6659_v43  ;;  %v2523_v54 = vadd.f32 %v6659_v43, %v2522_v30  ;;  %v2564_v38 = vmul.f32 %v6659_v43, %v6659_v43  ;;  %v2594_v39 = vadd.f32 %v2593_v47, %v2563_v4  ;;  %v6667_v32 = vadd.f32 %v8083_v12, %v2357_v40 }
 0x22c   : > { %2494 = vst [vmem:[%s8107_s8 + $0x58] sm:$0xff] %v6663_v48  ;;  %v8143_v33 = vadd.f32 %v7964_v13, %v5853_v62  ;;  %v2567_v61 = vmul.f32 %v6663_v48, %v6663_v48 }
 0x22d   : > { %v2595_v9 = vadd.f32 %v2594_v39, %v2564_v38  ;;  %2492 = vst [vmem:[%s8107_s8 + $0x48] sm:$0xff] %v6667_v32  ;;  %v2524_v45 = vadd.f32 %v6667_v32, %v2523_v54  ;;  %v2565_v27 = vmul.f32 %v6667_v32, %v6667_v32  ;;  %v5854_v20 = vpop.f32.mrb[124].mxu0 }
 0x22e   : > { %v5855_v1 = vpop.f32.mrb[125].mxu0 }
 0x22f   : > { %v2525_v52 = vadd.f32 %v6655_v6, %v2524_v45  ;;  %v2596_v7 = vadd.f32 %v2595_v9, %v2565_v27  ;;  %v6442_v44 = vpop.f32.mrb[92].mxu1  ;;  %v5856_v35 = vadd.f32 %v5855_v1, %v5854_v20  ;;  %v5857_v57 = vpop.f32.mrb[126].mxu0 }
 0x230   : > { %v6671_v12 = vadd.f32 %v8097_v59, %v6442_v44  ;;  %v2370_v15 = vpop.f32.mrb[93].mxu1  ;;  %v5858_v13 = vpop.f32.mrb[127].mxu0 }
 0x231   : > { %v2597_v56 = vadd.f32 %v2596_v7, %v2566_v51  ;;  %v6675_v21 = vadd.f32 %v8092_v19, %v2370_v15  ;;  %v2526_v22 = vadd.f32 %v6663_v48, %v2525_v52  ;;  %v6443_v63 = vpop.f32.mrb[94].mxu1  ;;  %v5859_v42 = vadd.f32 %v5858_v13, %v5857_v57 }
 0x232   : > { %2497 = vst [vmem:[%s8107_s8 + $0x70] sm:$0xff] %v6671_v12  ;;  %v6679_v11 = vadd.f32 %v8100_v3, %v6443_v63  ;;  %v2373_v46 = vpop.f32.mrb[95].mxu1  ;;  %v6697_v14 = vadd.f32 %v7970_v25, %v5856_v35  ;;  %v2570_v3 = vmul.f32 %v6671_v12, %v6671_v12 }
 0x233   : > { %2495 = vst [vmem:[%s8107_s8 + $0x60] sm:$0xff] %v6675_v21  ;;  %v2527_v2 = vadd.f32 %v6675_v21, %v2526_v22  ;;  %v2568_v50 = vmul.f32 %v6675_v21, %v6675_v21  ;;  %v2598_v59 = vadd.f32 %v2597_v56, %v2567_v61  ;;  %v6683_v17 = vadd.f32 %v8094_v49, %v2373_v46 }
 0x234   : > { %2498 = vst [vmem:[%s8107_s8 + $0x78] sm:$0xff] %v6679_v11  ;;  %v6703_v24 = vadd.f32 %v7972_v58, %v5859_v42  ;;  %v2571_v30 = vmul.f32 %v6679_v11, %v6679_v11 }
 0x235   : > { %v2599_v19 = vadd.f32 %v2598_v59, %v2568_v50  ;;  %2496 = vst [vmem:[%s8107_s8 + $0x68] sm:$0xff] %v6683_v17  ;;  %v2528_v18 = vadd.f32 %v6683_v17, %v2527_v2  ;;  %v2569_v41 = vmul.f32 %v6683_v17, %v6683_v17  ;;  %v5860_v4 = vpop.f32.mrb[128].mxu0 }
 0x236   : > { %v5861_v6 = vpop.f32.mrb[129].mxu0 }
 0x237   : > { %v2529_v28 = vadd.f32 %v6671_v12, %v2528_v18  ;;  %v2600_v36 = vadd.f32 %v2599_v19, %v2569_v41  ;;  %v6446_v25 = vpop.f32.mrb[0].mxu1  ;;  %v5862_v47 = vadd.f32 %v5861_v6, %v5860_v4  ;;  %v5863_v43 = vpop.f32.mrb[130].mxu0 }
 0x238   : > { %v6686_v49 = vadd.f32 %v8123_v16, %v6446_v25  ;;  %v2386_v53 = vpop.f32.mrb[1].mxu1  ;;  %v5864_v58 = vpop.f32.mrb[131].mxu0 }
 0x239   : > { %v2601_v62 = vadd.f32 %v2600_v36, %v2570_v3  ;;  %v6689_v48 = vadd.f32 %v8105_v0, %v2386_v53  ;;  %v2530_v40 = vadd.f32 %v6679_v11, %v2529_v28  ;;  %v6447_v54 = vpop.f32.mrb[2].mxu1  ;;  %v5865_v38 = vadd.f32 %v5864_v58, %v5863_v43 }
 0x23a   : > { %2501 = vst [vmem:[%s8107_s8 + $0x90] sm:$0xff] %v6686_v49  ;;  %v6692_v39 = vadd.f32 %v8129_v31, %v6447_v54  ;;  %v2389_v32 = vpop.f32.mrb[3].mxu1  ;;  %v6712_v9 = vadd.f32 %v7988_v60, %v5862_v47  ;;  %v2574_v31 = vmul.f32 %v6686_v49, %v6686_v49 }
 0x23b   : > { %2499 = vst [vmem:[%s8107_s8 + $0x80] sm:$0xff] %v6689_v48  ;;  %v2531_v45 = vadd.f32 %v6689_v48, %v2530_v40  ;;  %v2572_v27 = vmul.f32 %v6689_v48, %v6689_v48  ;;  %v2602_v16 = vadd.f32 %v2601_v62, %v2571_v30  ;;  %v6695_v20 = vadd.f32 %v8114_v55, %v2389_v32 }
 0x23c   : > { %2502 = vst [vmem:[%s8107_s8 + $0x98] sm:$0xff] %v6692_v39  ;;  %v6718_v1 = vadd.f32 %v7994_v26, %v5865_v38  ;;  %v2575_v15 = vmul.f32 %v6692_v39, %v6692_v39 }
 0x23d   : > { %v2603_v0 = vadd.f32 %v2602_v16, %v2572_v27  ;;  %2500 = vst [vmem:[%s8107_s8 + $0x88] sm:$0xff] %v6695_v20  ;;  %v2532_v51 = vadd.f32 %v6695_v20, %v2531_v45  ;;  %v2573_v52 = vmul.f32 %v6695_v20, %v6695_v20  ;;  %v5866_v7 = vpop.f32.mrb[132].mxu0 }
 0x23e   : > { %v5867_v44 = vpop.f32.mrb[133].mxu0 }
 0x23f   : > { %v2533_v35 = vadd.f32 %v6686_v49, %v2532_v51  ;;  %v2604_v57 = vadd.f32 %v2603_v0, %v2573_v52  ;;  %v6450_v60 = vpop.f32.mrb[4].mxu1  ;;  %v5868_v61 = vadd.f32 %v5867_v44, %v5866_v7  ;;  %v5869_v12 = vpop.f32.mrb[134].mxu0 }
 0x240   : > { %v6698_v13 = vadd.f32 %v6697_v14, %v6450_v60  ;;  %v2402_v55 = vpop.f32.mrb[5].mxu1  ;;  %v5870_v56 = vpop.f32.mrb[135].mxu0 }
 0x241   : > { %v2605_v26 = vadd.f32 %v2604_v57, %v2574_v31  ;;  %v6701_v21 = vadd.f32 %v8137_v34, %v2402_v55  ;;  %v2534_v22 = vadd.f32 %v6692_v39, %v2533_v35  ;;  %v6451_v63 = vpop.f32.mrb[6].mxu1  ;;  %v5871_v42 = vadd.f32 %v5870_v56, %v5869_v12 }
 0x242   : > { %2505 = vst [vmem:[%s8107_s8 + $0xb0] sm:$0xff] %v6698_v13  ;;  %v6704_v11 = vadd.f32 %v6703_v24, %v6451_v63  ;;  %v2405_v46 = vpop.f32.mrb[7].mxu1  ;;  %v6709_v2 = vadd.f32 %v8010_v37, %v5868_v61  ;;  %v2578_v24 = vmul.f32 %v6698_v13, %v6698_v13 }
 0x243   : > { %2503 = vst [vmem:[%s8107_s8 + $0xa0] sm:$0xff] %v6701_v21  ;;  %v2535_v50 = vadd.f32 %v6701_v21, %v2534_v22  ;;  %v2576_v59 = vmul.f32 %v6701_v21, %v6701_v21  ;;  %v2606_v17 = vadd.f32 %v2605_v26, %v2575_v15  ;;  %v6707_v14 = vadd.f32 %v8143_v33, %v2405_v46 }
 0x244   : > { %2506 = vst [vmem:[%s8107_s8 + $0xb8] sm:$0xff] %v6704_v11  ;;  %v6715_v19 = vadd.f32 %v8016_v23, %v5871_v42  ;;  %v2579_v47 = vmul.f32 %v6704_v11, %v6704_v11 }
 0x245   : > { %v2607_v18 = vadd.f32 %v2606_v17, %v2576_v59  ;;  %2504 = vst [vmem:[%s8107_s8 + $0xa8] sm:$0xff] %v6707_v14  ;;  %v2536_v34 = vadd.f32 %v6707_v14, %v2535_v50  ;;  %v2577_v41 = vmul.f32 %v6707_v14, %v6707_v14  ;;  %v5872_v4 = vpop.f32.mrb[136].mxu0 }
 0x246   : > { %v5873_v6 = vpop.f32.mrb[137].mxu0 }
 0x247   : > { %v2537_v3 = vadd.f32 %v6698_v13, %v2536_v34  ;;  %v2608_v28 = vadd.f32 %v2607_v18, %v2577_v41  ;;  %v6454_v37 = vpop.f32.mrb[8].mxu1  ;;  %v5874_v36 = vadd.f32 %v5873_v6, %v5872_v4  ;;  %v5875_v25 = vpop.f32.mrb[138].mxu0 }
 0x248   : > { %v6710_v43 = vadd.f32 %v6709_v2, %v6454_v37  ;;  %v2418_v33 = vpop.f32.mrb[9].mxu1  ;;  %v5876_v30 = vpop.f32.mrb[139].mxu0 }
 0x249   : > { %v2609_v23 = vadd.f32 %v2608_v28, %v2578_v24  ;;  %v6713_v49 = vadd.f32 %v6712_v9, %v2418_v33  ;;  %v2538_v53 = vadd.f32 %v6704_v11, %v2537_v3  ;;  %v6455_v58 = vpop.f32.mrb[10].mxu1  ;;  %v5877_v62 = vadd.f32 %v5876_v30, %v5875_v25  ;;  %v2555_v30 = vld [vmem:[#allocation5] sm:$0x1] }
 0x24a   : > { %2509 = vst [vmem:[%s8107_s8 + $0xd0] sm:$0xff] %v6710_v43  ;;  %v6716_v48 = vadd.f32 %v6715_v19, %v6455_v58  ;;  %v2421_v40 = vpop.f32.mrb[11].mxu1  ;;  %v6724_v54 = vadd.f32 %v8032_v8, %v5874_v36  ;;  %v2582_v52 = vmul.f32 %v6710_v43, %v6710_v43 }
 0x24b   : > { %2507 = vst [vmem:[%s8107_s8 + $0xc0] sm:$0xff] %v6713_v49  ;;  %v2539_v38 = vadd.f32 %v6713_v49, %v2538_v53  ;;  %v2580_v39 = vmul.f32 %v6713_v49, %v6713_v49  ;;  %v2610_v32 = vadd.f32 %v2609_v23, %v2579_v47  ;;  %v6719_v45 = vadd.f32 %v6718_v1, %v2421_v40  ;;  %v2515_v47 = vld [vmem:[#allocation4] sm:$0x1] }
 0x24c   : > { %2510 = vst [vmem:[%s8107_s8 + $0xd8] sm:$0xff] %v6716_v48  ;;  %v6730_v27 = vadd.f32 %v8036_v10, %v5877_v62  ;;  %v2583_v57 = vmul.f32 %v6716_v48, %v6716_v48 }
 0x24d   : > { %v2611_v16 = vadd.f32 %v2610_v32, %v2580_v39  ;;  %2508 = vst [vmem:[%s8107_s8 + $0xc8] sm:$0xff] %v6719_v45  ;;  %v2540_v9 = vadd.f32 %v6719_v45, %v2539_v38  ;;  %v2581_v20 = vmul.f32 %v6719_v45, %v6719_v45  ;;  %v5878_v0 = vpop.f32.mrb[140].mxu0 }
 0x24e   : > { %v5879_v51 = vpop.f32.mrb[141].mxu0 }
 0x24f   : > { %v2541_v7 = vadd.f32 %v6710_v43, %v2540_v9  ;;  %v2612_v44 = vadd.f32 %v2611_v16, %v2581_v20  ;;  %v6458_v31 = vpop.f32.mrb[12].mxu1  ;;  %v5880_v8 = vadd.f32 %v5879_v51, %v5878_v0  ;;  %v5881_v35 = vpop.f32.mrb[142].mxu0 }
 0x250   : > { %v2434_v60 = vpop.f32.mrb[13].mxu1  ;;  %v5882_v1 = vpop.f32.mrb[143].mxu0 }
 0x251   : > { %v2613_v61 = vadd.f32 %v2612_v44, %v2582_v52  ;;  %v6721_v10 = vadd.f32 %v8052_v29, %v5880_v8  ;;  %v6725_v12 = vadd.f32 %v6724_v54, %v2434_v60  ;;  %v2542_v15 = vadd.f32 %v6716_v48, %v2541_v7  ;;  %v6459_v13 = vpop.f32.mrb[14].mxu1 }
 0x252   : > { %v5883_v55 = vadd.f32 %v5882_v1, %v5881_v35  ;;  %v2437_v56 = vpop.f32.mrb[15].mxu1 }
 0x253   : > { %v6722_v26 = vadd.f32 %v6721_v10, %v6458_v31  ;;  %2511 = vst [vmem:[%s8107_s8 + $0xe0] sm:$0xff] %v6725_v12  ;;  %v2543_v21 = vadd.f32 %v6725_v12, %v2542_v15  ;;  %v2584_v22 = vmul.f32 %v6725_v12, %v6725_v12  ;;  %v2614_v63 = vadd.f32 %v2613_v61, %v2583_v57 }
 0x254   : > { %v6727_v42 = vadd.f32 %v8056_v5, %v5883_v55  ;;  %v6731_v11 = vadd.f32 %v6730_v27, %v2437_v56 }
 0x255   : > { %2513 = vst [vmem:[%s8107_s8 + $0xf0] sm:$0xff] %v6722_v26  ;;  %v2615_v46 = vadd.f32 %v2614_v63, %v2584_v22  ;;  %v2586_v2 = vmul.f32 %v6722_v26, %v6722_v26 }
 0x256   : > { %v6728_v50 = vadd.f32 %v6727_v42, %v6459_v13  ;;  %2512 = vst [vmem:[%s8107_s8 + $0xe8] sm:$0xff] %v6731_v11  ;;  %v2544_v29 = vadd.f32 %v6731_v11, %v2543_v21  ;;  %v2585_v59 = vmul.f32 %v6731_v11, %v6731_v11 }
 0x258   : > { %2514 = vst [vmem:[%s8107_s8 + $0xf8] sm:$0xff] %v6728_v50  ;;  %v2587_v17 = vmul.f32 %v6728_v50, %v6728_v50  ;;  %v2545_v14 = vadd.f32 %v6722_v26, %v2544_v29  ;;  %v2616_v19 = vadd.f32 %v2615_v46, %v2585_v59 }
 0x25a   : > { %v2546_v18 = vadd.f32 %v6728_v50, %v2545_v14  ;;  %v2617_v34 = vadd.f32 %v2616_v19, %v2586_v2 }
 0x25c   : > { %v2547_v41 = vrot.slane %v2546_v18, 4  ;;  %v2618_v4 = vadd.f32 %v2617_v34, %v2587_v17 }
 0x25e   : > { %v2548_v6 = vadd.f32 %v2547_v41, %v2546_v18  ;;  %v2619_v24 = vrot.slane %v2618_v4, 4 }
 0x260   : > { %v2549_v3 = vrot.slane %v2548_v6, 2  ;;  %v2620_v5 = vadd.f32 %v2619_v24, %v2618_v4 }
 0x262   : > { %v2550_v28 = vadd.f32 %v2549_v3, %v2548_v6  ;;  %v2621_v37 = vrot.slane %v2620_v5, 2 }
 0x264   : > { %v2551_v36 = vrot.slane %v2550_v28, 1  ;;  %v2622_v25 = vadd.f32 %v2621_v37, %v2620_v5 }
 0x266   : > { %v2552_v43 = vadd.f32 %v2551_v36, %v2550_v28  ;;  %v2623_v33 = vrot.slane %v2622_v25, 1 }
 0x268   : > { %v2553_v23 = vadd.f32 %v2552_v43, %v2515_v47  ;;  %v2624_v49 = vadd.f32 %v2623_v33, %v2622_v25 }
 0x26a   : > { %2554 = vst [vmem:[#allocation4] sm:$0x1] %v2553_v23  ;;  %v2625_v53 = vadd.f32 %v2624_v49, %v2555_v30 }
 0x26c   : > { %2626 = vst [vmem:[#allocation5] sm:$0x1] %v2625_v53 }
 0x26d PF: > { %p2628_p13 = pnand %p327_p9, %p303_p5 }
 0x26e   : > { %v7187_v54 = vmov (!%p2628_p13), 0.0   ;;  %v2639_v27 = vld [vmem:[%s9284_s2] sm:$0x1] (!%p2628_p13) }
 0x26f   : > { %2631 = sbr.rel (%p2628_p13) target bundleno = 654 (0x28e), region = 60  ;;  %v2644_v20 = vld [vmem:[%s9285_s3] sm:$0x1] (!%p2628_p13) }
 0x271   : > { %v2632_v58 = vld [vmem:[#allocation4] sm:$0x1] (!%p2628_p13) }
 0x272   : > { %v2633_v48 = vmul.f32 (!%p2628_p13), 0.001953125, %v2632_v58  ;;  %2648 = vst [vmem:[#allocation4] sm:$0x1] (!%p2628_p13), %v7187_v54 }
 0x273   : > { %v2634_v62 = vld [vmem:[#allocation5] sm:$0x1] (!%p2628_p13) }
 0x274   : > { %v2635_v40 = vmul.f32 (!%p2628_p13), 0.001953125, %v2634_v62  ;;  %2649 = vst [vmem:[#allocation5] sm:$0x1] (!%p2628_p13), %v7187_v54  ;;  %v2636_v38 = vmul.f32 (!%p2628_p13), %v2633_v48, %v2633_v48 }
 0x276   : > { %v2637_v39 = vsub.f32 %v2635_v40, %v2636_v38 }
 0x278   : > { %v2638_v32 = vmax.f32 %v2637_v39, 0.0 }
 0x27a   : > { %v2640_v45 = vadd.f32 1e-05, %v2638_v32 }
 0x27c   : > { %7070 = vrsqrt.f32 %v2640_v45 }
 0x286   : > { %v7071_v16 = vpop.eup %7070 }
 0x287   : > { %v2642_v9 = vmul.f32 %v7071_v16, %v2639_v27 }
 0x289   : > { %2643 = vst [vmem:[#allocation6] sm:$0x1] %v2642_v9  ;;  %v2645_v0 = vmul.f32 %v2642_v9, %v2633_v48 }
 0x28b   : > { %v2646_v51 = vsub.f32 %v2644_v20, %v2645_v0 }
 0x28d   : > { %2647 = vst [vmem:[#allocation7] sm:$0x1] %v2646_v51 }
 0x28e PF: > { %p5416_p0 = scmp.ne.s32.totalorder %s7172_s25, 1 }
 0x290   : > { %2652 = sbr.rel (%p5416_p0) target bundleno = 1220 (0x4c4), region = 64 }
 0x297   : > { %v7072_v52 = vld [vmem:[%s9286_s4 + $0x100] sm:$0xff]   ;;  %v7075_v31 = vld [vmem:[%s9286_s4 + $0x108] sm:$0xff]   ;;  %v7078_v57 = vld [vmem:[%s9286_s4 + $0x110] sm:$0xff]   ;;  %s5417_s21 = sshll.u32 %s7168_s24, 8 }
 0x298   : > { %v8203_v7 = vld [vmem:[%s9286_s4 + $0x140] sm:$0xff]   ;;  %5908 = vmatprep.subr.bf16.mxu0 %v7072_v52  ;;  %v8216_v8 = vld [vmem:[%s9286_s4 + $0x148] sm:$0xff]   ;;  %v8228_v60 = vld [vmem:[%s9286_s4 + $0x150] sm:$0xff]   ;;  %s8295_s20 = scalar_lea.vmem [#allocation3], %s5417_s21 }
 0x299   : > { %v7074_v44 = vld [vmem:[%s9286_s4 + $0xc0] sm:$0xff]   ;;  %6780 = vmatprep.subr.bf16.mxu1 %v8203_v7  ;;  %v7077_v35 = vld [vmem:[%s9286_s4 + $0xc8] sm:$0xff]   ;;  %v7080_v1 = vld [vmem:[%s9286_s4 + $0xd0] sm:$0xff]  }
 0x29a   : > { %5909 = vmatpush3.bf16.msra.mxu0 %v7074_v44  ;;  %6788 = vmatpush3.bf16.msra.mxu1 %v8203_v7  ;;  %v7081_v61 = vld [vmem:[%s9286_s4 + $0x118] sm:$0xff]   ;;  %v7084_v15 = vld [vmem:[%s9286_s4 + $0x120] sm:$0xff]   ;;  %v7087_v56 = vld [vmem:[%s9286_s4 + $0x128] sm:$0xff]  }
 0x29b   : > { %5910 = vmatprep.subr.bf16.mxu0 %v7075_v31  ;;  %6781 = vmatprep.subr.bf16.mxu1 %v8216_v8  ;;  %v8241_v10 = vld [vmem:[%s9286_s4 + $0x158] sm:$0xff]   ;;  %v8254_v13 = vld [vmem:[%s9286_s4 + $0x160] sm:$0xff]   ;;  %v8267_v26 = vld [vmem:[%s9286_s4 + $0x168] sm:$0xff]  }
 0x29c   : > { %v7083_v12 = vld [vmem:[%s9286_s4 + $0xd8] sm:$0xff]   ;;  %v7086_v55 = vld [vmem:[%s9286_s4 + $0xe0] sm:$0xff]   ;;  %v7089_v21 = vld [vmem:[%s9286_s4 + $0xe8] sm:$0xff]  }
 0x29d   : > { %v7090_v22 = vld [vmem:[%s9286_s4 + $0x130] sm:$0xff]   ;;  %v7093_v11 = vld [vmem:[%s9286_s4 + $0x138] sm:$0xff]   ;;  %v2655_v2 = vld [vmem:[%s8295_s20] sm:$0xff] }
 0x29e   : > { %5911 = vmatpush3.bf16.msra.mxu0 %v7077_v35  ;;  %6789 = vmatpush3.bf16.msra.mxu1 %v8216_v8  ;;  %v8281_v63 = vld [vmem:[%s9286_s4 + $0x170] sm:$0xff]   ;;  %v8292_v46 = vld [vmem:[%s9286_s4 + $0x178] sm:$0xff]   ;;  %v2656_v50 = vld [vmem:[%s8295_s20 + $0x8] sm:$0xff] }
 0x29f   : > { %5912 = vmatprep.subr.bf16.mxu0 %v7078_v57  ;;  %6782 = vmatprep.subr.bf16.mxu1 %v8228_v60  ;;  %v7092_v42 = vld [vmem:[%s9286_s4 + $0xf0] sm:$0xff]   ;;  %v8299_v29 = vld [vmem:[#allocation6] ss:$0 sm:$0xff]  ;;  %v8304_v14 = vld [vmem:[#allocation7] ss:$0 sm:$0xff] }
 0x2a0   : > { %v2694_v59 = vmul.f32 %v8299_v29, %v2655_v2  ;;  %v2695_v17 = vmul.f32 %v8299_v29, %v2656_v50  ;;  %v2671_v19 = vld [vmem:[%s8295_s20 + $0x80] sm:$0xff]  ;;  %v2672_v18 = vld [vmem:[%s8295_s20 + $0x88] sm:$0xff]  ;;  %v2673_v4 = vld [vmem:[%s8295_s20 + $0x90] sm:$0xff] }
 0x2a1   : > { %v2710_v34 = vmul.f32 %v8299_v29, %v2671_v19  ;;  %v2711_v41 = vmul.f32 %v8299_v29, %v2672_v18  ;;  %v2674_v6 = vld [vmem:[%s8295_s20 + $0x98] sm:$0xff]  ;;  %v2712_v5 = vmul.f32 %v8299_v29, %v2673_v4  ;;  %v7096_v23 = vld [vmem:[%s9286_s4 + $0x40] sm:$0xff]   ;;  %v2657_v40 = vld [vmem:[%s8295_s20 + $0x10] sm:$0xff] }
 0x2a2   : > { %5913 = vmatpush3.bf16.msra.mxu0 %v7080_v1  ;;  %6790 = vmatpush3.bf16.msra.mxu1 %v8228_v60  ;;  %v2733_v24 = vadd.f32 %v8304_v14, %v2694_v59  ;;  %v2734_v3 = vadd.f32 %v8304_v14, %v2695_v17  ;;  %v2713_v28 = vmul.f32 %v8299_v29, %v2674_v6  ;;  %v7095_v37 = vld [vmem:[%s9286_s4 + $0xf8] sm:$0xff]   ;;  %v2675_v38 = vld [vmem:[%s8295_s20 + $0xa0] sm:$0xff]  ;;  %v2676_v45 = vld [vmem:[%s8295_s20 + $0xa8] sm:$0xff] }
 0x2a3   : > { %5914 = vmatprep.subr.bf16.mxu0 %v7081_v61  ;;  %6783 = vmatprep.subr.bf16.mxu1 %v8241_v10  ;;  %v2749_v36 = vadd.f32 %v8304_v14, %v2710_v34  ;;  %v2750_v25 = vadd.f32 %v8304_v14, %v2711_v41  ;;  %v2751_v33 = vadd.f32 %v8304_v14, %v2712_v5  ;;  %v2658_v54 = vld [vmem:[%s8295_s20 + $0x18] sm:$0xff]  ;;  %v2677_v16 = vld [vmem:[%s8295_s20 + $0xb0] sm:$0xff]  ;;  %v7097_v59 = vld [vmem:[%s9286_s4] sm:$0xff]  }
 0x2a4   : > { %v2765_v47 = vmax.f32 %v2733_v24, 0.0  ;;  %v2766_v43 = vmax.f32 %v2734_v3, 0.0  ;;  %v2752_v30 = vadd.f32 %v8304_v14, %v2713_v28  ;;  %v2696_v39 = vmul.f32 %v8299_v29, %v2657_v40  ;;  %v2678_v9 = vld [vmem:[%s8295_s20 + $0xb8] sm:$0xff]  ;;  %v2660_v19 = vld [vmem:[%s8295_s20 + $0x28] sm:$0xff]  ;;  %v2679_v3 = vld [vmem:[%s8295_s20 + $0xc0] sm:$0xff] }
 0x2a5   : > { %v2781_v49 = vmax.f32 %v2749_v36, 0.0  ;;  %v2782_v53 = vmax.f32 %v2750_v25, 0.0  ;;  %v2783_v62 = vmax.f32 %v2751_v33, 0.0  ;;  %v2697_v32 = vmul.f32 %v8299_v29, %v2658_v54  ;;  %v7098_v6 = vld [vmem:[%s9286_s4 + $0x48] sm:$0xff]  }
 0x2a6   : > { %5915 = vmatpush3.bf16.msra.mxu0 %v7083_v12  ;;  %6791 = vmatpush3.bf16.msra.mxu1 %v8241_v10  ;;  %2798 = vst [vmem:[#allocation2 + $0x28] sm:$0xff] %v2765_v47  ;;  %2799 = vst [vmem:[#allocation2 + $0x30] sm:$0xff] %v2766_v43  ;;  %v8328_v58 = vpack.c.bf16 %v2766_v43, %v2765_v47  ;;  %v2784_v48 = vmax.f32 %v2752_v30, 0.0  ;;  %v2714_v27 = vmul.f32 %v8299_v29, %v2675_v38  ;;  %v2680_v43 = vld [vmem:[%s8295_s20 + $0xc8] sm:$0xff] }
 0x2a7   : > { %5916 = vmatprep.subr.bf16.mxu0 %v7084_v15  ;;  %6784 = vmatprep.subr.bf16.mxu1 %v8254_v13  ;;  %2814 = vst [vmem:[#allocation2 + $0x128] sm:$0xff] %v2781_v49  ;;  %2815 = vst [vmem:[#allocation2 + $0x130] sm:$0xff] %v2782_v53  ;;  %v2715_v20 = vmul.f32 %v8299_v29, %v2676_v45  ;;  %v2716_v0 = vmul.f32 %v8299_v29, %v2677_v16 }
 0x2a8   : > { %3390 = vmatprep.mubr.bf16.mxu0 %v8328_v58  ;;  %2816 = vst [vmem:[#allocation2 + $0x148] sm:$0xff] %v2783_v62  ;;  %2817 = vst [vmem:[#allocation2 + $0x150] sm:$0xff] %v2784_v48  ;;  %v2717_v51 = vmul.f32 %v8299_v29, %v2678_v9  ;;  %v2735_v52 = vadd.f32 %v8304_v14, %v2696_v39  ;;  %v2736_v44 = vadd.f32 %v8304_v14, %v2697_v32  ;;  %v7099_v39 = vld [vmem:[%s9286_s4 + $0x8] sm:$0xff]  }
 0x2a9   : > { %v2753_v31 = vadd.f32 %v8304_v14, %v2714_v27  ;;  %v8348_v35 = vpack.c.bf16 %v2782_v53, %v2781_v49  ;;  %v2754_v57 = vadd.f32 %v8304_v14, %v2715_v20  ;;  %v2755_v1 = vadd.f32 %v8304_v14, %v2716_v0  ;;  %v2681_v53 = vld [vmem:[%s8295_s20 + $0xd0] sm:$0xff] }
 0x2aa   : > { %5917 = vmatpush3.bf16.msra.mxu0 %v7086_v55  ;;  %6792 = vmatpush3.bf16.msra.mxu1 %v8254_v13  ;;  %v2756_v61 = vadd.f32 %v8304_v14, %v2717_v51  ;;  %v8353_v12 = vpack.c.bf16 %v2784_v48, %v2783_v62  ;;  %v2767_v15 = vmax.f32 %v2735_v52, 0.0  ;;  %v2768_v55 = vmax.f32 %v2736_v44, 0.0  ;;  %v2682_v62 = vld [vmem:[%s8295_s20 + $0xd8] sm:$0xff] }
 0x2ab   : > { %5918 = vmatprep.subr.bf16.mxu0 %v7087_v56  ;;  %6785 = vmatprep.subr.bf16.mxu1 %v8267_v26  ;;  %v2785_v56 = vmax.f32 %v2753_v31, 0.0  ;;  %v2699_v24 = vmul.f32 %v8299_v29, %v2660_v19  ;;  %v2718_v33 = vmul.f32 %v8299_v29, %v2679_v3  ;;  %v2719_v49 = vmul.f32 %v8299_v29, %v2680_v43  ;;  %v2684_v19 = vld [vmem:[%s8295_s20 + $0xe8] sm:$0xff]  ;;  %v2686_v3 = vld [vmem:[%s8295_s20 + $0xf8] sm:$0xff] }
 0x2ac   : > { %2800 = vst [vmem:[#allocation2 + $0x48] sm:$0xff] %v2767_v15  ;;  %2801 = vst [vmem:[#allocation2 + $0x50] sm:$0xff] %v2768_v55  ;;  %v8359_v17 = vpack.c.bf16 %v2768_v55, %v2767_v15  ;;  %v2720_v54 = vmul.f32 %v8299_v29, %v2681_v53  ;;  %v2721_v38 = vmul.f32 %v8299_v29, %v2682_v62 }
 0x2ad   : > { %v3022_v2 = vld [vmem:[#allocation2 + $0x27] sm:$0xff]  ;;  %v3023_v50 = vld [vmem:[#allocation2 + $0x2f] sm:$0xff]  ;;  %2818 = vst [vmem:[#allocation2 + $0x168] sm:$0xff] %v2785_v56  ;;  %v2757_v40 = vadd.f32 %v8304_v14, %v2718_v33  ;;  %v2758_v45 = vadd.f32 %v8304_v14, %v2719_v49 }
 0x2ae   : > { %5919 = vmatpush3.bf16.msra.mxu0 %v7089_v21  ;;  %6793 = vmatpush3.bf16.msra.mxu1 %v8267_v26  ;;  %v2786_v21 = vmax.f32 %v2754_v57, 0.0  ;;  %v3134_v34 = vld [vmem:[#allocation2 + $0x129] sm:$0xff]  ;;  %v3135_v41 = vld [vmem:[#allocation2 + $0x131] sm:$0xff]  ;;  %v8363_v4 = vpack.c.bf16 %v3023_v50, %v3022_v2  ;;  %v2759_v16 = vadd.f32 %v8304_v14, %v2720_v54  ;;  %v2760_v9 = vadd.f32 %v8304_v14, %v2721_v38  ;;  %v7104_v54 = vld [vmem:[%s9286_s4 + $0x60] sm:$0xff]  }
 0x2af   : > { %5920 = vmatprep.subr.bf16.mxu0 %v7090_v22  ;;  %6786 = vmatprep.subr.bf16.mxu1 %v8281_v63  ;;  %v2787_v22 = vmax.f32 %v2755_v1, 0.0  ;;  %v3136_v36 = vld [vmem:[#allocation2 + $0x149] sm:$0xff]  ;;  %v3137_v25 = vld [vmem:[#allocation2 + $0x151] sm:$0xff]  ;;  %v2789_v27 = vmax.f32 %v2757_v40, 0.0  ;;  %v2790_v51 = vmax.f32 %v2758_v45, 0.0 }
 0x2b0   : > { %2819 = vst [vmem:[#allocation2 + $0x170] sm:$0xff] %v2786_v21  ;;  %v8370_v5 = vpack.c.bf16 %v2786_v21, %v2785_v56  ;;  %v3159_v30 = vpack.c.bf16 %v3137_v25, %v3136_v36  ;;  %v7101_v1 = vld [vmem:[%s9286_s4 + $0x10] sm:$0xff]   ;;  %v2791_v15 = vmax.f32 %v2759_v16, 0.0  ;;  %v2792_v55 = vmax.f32 %v2760_v9, 0.0  ;;  %v2662_v50 = vld [vmem:[%s8295_s20 + $0x38] sm:$0xff] }
 0x2b1   : > { %2820 = vst [vmem:[#allocation2 + $0x188] sm:$0xff] %v2787_v22  ;;  %2822 = vst [vmem:[#allocation2 + $0x1a8] sm:$0xff] %v2789_v27  ;;  %v2725_v25 = vmul.f32 %v8299_v29, %v2686_v3 }
 0x2b2   : > { %5921 = vmatpush3.bf16.msra.mxu0 %v7092_v42  ;;  %6794 = vmatpush3.bf16.msra.mxu1 %v8281_v63  ;;  %v2788_v42 = vmax.f32 %v2756_v61, 0.0  ;;  %2823 = vst [vmem:[#allocation2 + $0x1b0] sm:$0xff] %v2790_v51  ;;  %2824 = vst [vmem:[#allocation2 + $0x1c8] sm:$0xff] %v2791_v15 }
 0x2b3   : > { %5922 = vmatprep.subr.bf16.mxu0 %v7093_v11  ;;  %6787 = vmatprep.subr.bf16.mxu1 %v8292_v46  ;;  %v2659_v11 = vld [vmem:[%s8295_s20 + $0x20] sm:$0xff]  ;;  %v3025_v0 = vld [vmem:[#allocation2 + $0x4f] sm:$0xff]  ;;  %2825 = vst [vmem:[#allocation2 + $0x1d0] sm:$0xff] %v2792_v55 }
 0x2b4   : > { %v2698_v18 = vmul.f32 %v8299_v29, %v2659_v11  ;;  %2821 = vst [vmem:[#allocation2 + $0x190] sm:$0xff] %v2788_v42  ;;  %v8372_v28 = vpack.c.bf16 %v2788_v42, %v2787_v22  ;;  %v3024_v20 = vld [vmem:[#allocation2 + $0x47] sm:$0xff]  ;;  %v7102_v22 = vld [vmem:[%s9286_s4 + $0x58] sm:$0xff]   ;;  %v2661_v42 = vld [vmem:[%s8295_s20 + $0x30] sm:$0xff]  ;;  %v8410_v11 = vpack.c.bf16 %v2790_v51, %v2789_v27 }
 0x2b5   : > { %v8397_v31 = vpack.c.bf16 %v3025_v0, %v3024_v20 }
 0x2b6   : > { %5923 = vmatpush3.bf16.msra.mxu0 %v7095_v37  ;;  %6795 = vmatpush3.bf16.msra.mxu1 %v8292_v46  ;;  %v3158_v37 = vpack.c.bf16 %v3135_v41, %v3134_v34  ;;  %v2737_v47 = vadd.f32 %v8304_v14, %v2698_v18  ;;  %v8416_v18 = vpack.c.bf16 %v2792_v55, %v2791_v15 }
 0x2b7   : > { %6460 = vmatprep.subr.bf16.mxu0 %v8203_v7  ;;  %6044 = vmatprep.subr.bf16.mxu1 %v7096_v23  ;;  %v2738_v23 = vadd.f32 %v8304_v14, %v2699_v24  ;;  %v3138_v52 = vld [vmem:[#allocation2 + $0x169] sm:$0xff]  ;;  %v3139_v44 = vld [vmem:[#allocation2 + $0x171] sm:$0xff]  ;;  %v2701_v34 = vmul.f32 %v8299_v29, %v2662_v50 }
 0x2b8   : > { %6492 = vmatprep.mubr.bf16.mxu1 %v3158_v37  ;;  %v2769_v48 = vmax.f32 %v2737_v47, 0.0  ;;  %v3160_v56 = vpack.c.bf16 %v3139_v44, %v3138_v52  ;;  %v2685_v24 = vld [vmem:[%s8295_s20 + $0xf0] sm:$0xff]  ;;  %v7103_v47 = vld [vmem:[%s9286_s4 + $0x18] sm:$0xff]   ;;  %v7105_v44 = vld [vmem:[%s9286_s4 + $0x20] sm:$0xff]  }
 0x2b9   : > { %3391 = vmatmul.mubr.bf16.vlgmr.msra.gmra.mrb[0].mxu0 %v8363_v4  ;;  %6493 = vmatmul.mubr.bf16.vlgmr.msra.gmra.mrb[0].mxu1 %v3159_v30  ;;  %v2770_v32 = vmax.f32 %v2738_v23, 0.0  ;;  %v2724_v36 = vmul.f32 %v8299_v29, %v2685_v24  ;;  %v2740_v33 = vadd.f32 %v8304_v14, %v2701_v34  ;;  %v3143_v45 = vld [vmem:[#allocation2 + $0x1b1] sm:$0xff] }
 0x2ba   : > { %6461 = vmatpush3.bf16.msra.mxu0 %v8203_v7  ;;  %3398 = vmatprep.mubr.bf16.mxu0 %v8359_v17  ;;  %v7100_v7 = vld [vmem:[%s9286_s4 + $0x50] sm:$0xff]   ;;  %2802 = vst [vmem:[#allocation2 + $0x68] sm:$0xff] %v2769_v48 }
 0x2bb   : > { %6045 = vmatpush3.bf16.msra.mxu1 %v7097_v59  ;;  %6462 = vmatprep.subr.bf16.mxu0 %v8216_v8  ;;  %2803 = vst [vmem:[#allocation2 + $0x70] sm:$0xff] %v2770_v32  ;;  %v3140_v57 = vld [vmem:[#allocation2 + $0x189] sm:$0xff]  ;;  %v8402_v61 = vpack.c.bf16 %v2770_v32, %v2769_v48  ;;  %v3141_v21 = vld [vmem:[#allocation2 + $0x191] sm:$0xff]  ;;  %v2683_v59 = vld [vmem:[%s8295_s20 + $0xe0] sm:$0xff]  ;;  %v2763_v62 = vadd.f32 %v8304_v14, %v2724_v36  ;;  %v2772_v38 = vmax.f32 %v2740_v33, 0.0 }
 0x2bc   : > { %6046 = vmatprep.subr.bf16.mxu1 %v7098_v6  ;;  %v3161_v2 = vpack.c.bf16 %v3141_v21, %v3140_v57  ;;  %6496 = vmatprep.mubr.bf16.mxu1 %v3160_v56  ;;  %v2722_v41 = vmul.f32 %v8299_v29, %v2683_v59  ;;  %v2723_v6 = vmul.f32 %v8299_v29, %v2684_v19  ;;  %v3144_v9 = vld [vmem:[#allocation2 + $0x1c9] sm:$0xff]  ;;  %v3145_v20 = vld [vmem:[#allocation2 + $0x1d1] sm:$0xff]  ;;  %v2663_v57 = vld [vmem:[%s8295_s20 + $0x40] sm:$0xff] }
 0x2bd   : > { %v2764_v48 = vadd.f32 %v8304_v14, %v2725_v25  ;;  %2805 = vst [vmem:[#allocation2 + $0x90] sm:$0xff] %v2772_v38  ;;  %v3163_v52 = vpack.c.bf16 %v3145_v20, %v3144_v9  ;;  %v2702_v55 = vmul.f32 %v8299_v29, %v2663_v57  ;;  %v8462_v21 = vld [vmem:[#allocation2 + $0x8] sm:$0xff]  ;;  %v2666_v59 = vld [vmem:[%s8295_s20 + $0x58] sm:$0xff]  ;;  %v2667_v19 = vld [vmem:[%s8295_s20 + $0x60] sm:$0xff] }
 0x2be   : > { %6463 = vmatpush3.bf16.msra.mxu0 %v8216_v8  ;;  %v2700_v8 = vmul.f32 %v8299_v29, %v2661_v42  ;;  %v2761_v30 = vadd.f32 %v8304_v14, %v2722_v41  ;;  %v2762_v23 = vadd.f32 %v8304_v14, %v2723_v6  ;;  %v8468_v42 = vld [vmem:[#allocation2 + $0x10] sm:$0xff]  ;;  %v2705_v41 = vmul.f32 %v8299_v29, %v2666_v59  ;;  %v2668_v6 = vld [vmem:[%s8295_s20 + $0x68] sm:$0xff] }
 0x2bf   : > { %6464 = vmatprep.subr.bf16.mxu0 %v8228_v60  ;;  %6047 = vmatpush3.bf16.msra.mxu1 %v7099_v39  ;;  %v2796_v27 = vmax.f32 %v2764_v48, 0.0  ;;  %v2706_v24 = vmul.f32 %v8299_v29, %v2667_v19  ;;  %v7113_v59 = vld [vmem:[%s9286_s4 + $0x88] sm:$0xff]  }
 0x2c0   : > { %6048 = vmatprep.subr.bf16.mxu1 %v7100_v7  ;;  %v2739_v37 = vadd.f32 %v8304_v14, %v2700_v8  ;;  %v2793_v39 = vmax.f32 %v2761_v30, 0.0  ;;  %v2794_v32 = vmax.f32 %v2762_v23, 0.0  ;;  %v2795_v7 = vmax.f32 %v2763_v62, 0.0  ;;  %v2665_v8 = vld [vmem:[%s8295_s20 + $0x50] sm:$0xff] }
 0x2c1   : > { %3399 = vmatmul.mubr.bf16.gmra.mrb[4].mxu0 %v8397_v31  ;;  %6497 = vmatmul.mubr.bf16.gmra.mrb[4].mxu1 %v3161_v2  ;;  %v3026_v43 = vld [vmem:[#allocation2 + $0x67] sm:$0xff]  ;;  %2829 = vst [vmem:[#allocation2 + $0x210] sm:$0xff] %v2796_v27  ;;  %v2741_v2 = vadd.f32 %v8304_v14, %v2702_v55  ;;  %v2704_v34 = vmul.f32 %v8299_v29, %v2665_v8 }
 0x2c2   : > { %3406 = vmatprep.mubr.bf16.mxu0 %v8402_v61  ;;  %6465 = vmatpush3.bf16.msra.mxu0 %v8228_v60  ;;  %v3027_v49 = vld [vmem:[#allocation2 + $0x6f] sm:$0xff]  ;;  %v2771_v53 = vmax.f32 %v2739_v37, 0.0  ;;  %2826 = vst [vmem:[#allocation2 + $0x1e8] sm:$0xff] %v2793_v39  ;;  %2827 = vst [vmem:[#allocation2 + $0x1f0] sm:$0xff] %v2794_v32  ;;  %v8446_v51 = vpack.c.bf16 %v2794_v32, %v2793_v39  ;;  %v8454_v15 = vpack.c.bf16 %v2796_v27, %v2795_v7 }
 0x2c3   : > { %6049 = vmatpush3.bf16.msra.mxu1 %v7101_v1  ;;  %6466 = vmatprep.subr.bf16.mxu0 %v8241_v10  ;;  %v8438_v40 = vpack.c.bf16 %v3027_v49, %v3026_v43  ;;  %v3142_v60 = vld [vmem:[#allocation2 + $0x1a9] sm:$0xff]  ;;  %2828 = vst [vmem:[#allocation2 + $0x208] sm:$0xff] %v2795_v7  ;;  %v2773_v36 = vmax.f32 %v2741_v2, 0.0  ;;  %v2743_v49 = vadd.f32 %v8304_v14, %v2704_v34  ;;  %v2670_v7 = vld [vmem:[%s8295_s20 + $0x78] sm:$0xff] }
 0x2c4   : > { %6050 = vmatprep.subr.bf16.mxu1 %v7102_v22  ;;  %2804 = vst [vmem:[#allocation2 + $0x88] sm:$0xff] %v2771_v53  ;;  %v3162_v16 = vpack.c.bf16 %v3143_v45, %v3142_v60  ;;  %v8443_v0 = vpack.c.bf16 %v2772_v38, %v2771_v53  ;;  %v2664_v1 = vld [vmem:[%s8295_s20 + $0x48] sm:$0xff]  ;;  %v7108_v37 = vld [vmem:[%s9286_s4 + $0x70] sm:$0xff]   ;;  %v2744_v53 = vadd.f32 %v8304_v14, %v2705_v41 }
 0x2c5   : > { %v2703_v56 = vmul.f32 %v8299_v29, %v2664_v1  ;;  %v7107_v22 = vld [vmem:[%s9286_s4 + $0x28] sm:$0xff]   ;;  %v2669_v43 = vld [vmem:[%s8295_s20 + $0x70] sm:$0xff]  ;;  %v8491_v62 = vadd.f32 %v8304_v14, %v2706_v24  ;;  %2806 = vst [vmem:[#allocation2 + $0xa8] sm:$0xff] %v2773_v36  ;;  %v2775_v9 = vmax.f32 %v2743_v49, 0.0  ;;  %v2709_v57 = vmul.f32 %v8299_v29, %v2670_v7  ;;  %v7119_v24 = vld [vmem:[%s9286_s4 + $0x1c0] sm:$0xff]  }
 0x2c6   : > { %6467 = vmatpush3.bf16.msra.mxu0 %v8241_v10  ;;  %6500 = vmatprep.mubr.bf16.mxu1 %v3162_v16  ;;  %v7106_v10 = vld [vmem:[%s9286_s4 + $0x68] sm:$0xff]   ;;  %v2708_v48 = vmul.f32 %v8299_v29, %v2669_v43  ;;  %v7109_v16 = vld [vmem:[%s9286_s4 + $0x30] sm:$0xff]   ;;  %v2776_v20 = vmax.f32 %v2744_v53, 0.0  ;;  %v8581_v49 = vld [vmem:[%s9286_s4 + $0x200] sm:$0xff]  }
 0x2c7   : > { %6051 = vmatpush3.bf16.msra.mxu1 %v7103_v47  ;;  %6468 = vmatprep.subr.bf16.mxu0 %v8254_v13  ;;  %v2742_v50 = vadd.f32 %v8304_v14, %v2703_v56  ;;  %v2707_v47 = vmul.f32 %v8299_v29, %v2668_v6  ;;  %2808 = vst [vmem:[#allocation2 + $0xc8] sm:$0xff] %v2775_v9  ;;  %v7111_v29 = vld [vmem:[%s9286_s4 + $0x38] sm:$0xff]   ;;  %v2830_v56 = vld [vmem:[#allocation2 + $0x7] sm:$0xff] }
 0x2c8   : > { %6052 = vmatprep.subr.bf16.mxu1 %v7104_v54  ;;  %v3149_v32 = vld [vmem:[#allocation2 + $0x211] sm:$0xff]  ;;  %v2747_v1 = vadd.f32 %v8304_v14, %v2708_v48  ;;  %2809 = vst [vmem:[#allocation2 + $0xd0] sm:$0xff] %v2776_v20  ;;  %v3040_v53 = vld [vmem:[#allocation2 + $0x147] sm:$0xff] }
 0x2c9   : > { %3407 = vmatmul.mubr.bf16.gmra.mrb[8].mxu0 %v8438_v40  ;;  %6501 = vmatmul.mubr.bf16.gmra.mrb[8].mxu1 %v3163_v52  ;;  %v2774_v25 = vmax.f32 %v2742_v50, 0.0  ;;  %v3146_v33 = vld [vmem:[#allocation2 + $0x1e9] sm:$0xff]  ;;  %v3147_v30 = vld [vmem:[#allocation2 + $0x1f1] sm:$0xff]  ;;  %v2746_v45 = vadd.f32 %v8304_v14, %v2707_v47  ;;  %v2777_v52 = vmax.f32 %v8491_v62, 0.0 }
 0x2ca   : > { %3414 = vmatprep.mubr.bf16.mxu0 %v8443_v0  ;;  %6469 = vmatpush3.bf16.msra.mxu0 %v8254_v13  ;;  %v2910_v13 = vpack.c.bf16 %v8468_v42, %v8462_v21  ;;  %v3164_v54 = vpack.c.bf16 %v3147_v30, %v3146_v33  ;;  %v3148_v39 = vld [vmem:[#allocation2 + $0x209] sm:$0xff]  ;;  %v2779_v55 = vmax.f32 %v2747_v1, 0.0 }
 0x2cb   : > { %6053 = vmatpush3.bf16.msra.mxu1 %v7105_v44  ;;  %6470 = vmatprep.subr.bf16.mxu0 %v8267_v26  ;;  %v3028_v3 = vld [vmem:[#allocation2 + $0x87] sm:$0xff]  ;;  %v3029_v23 = vld [vmem:[#allocation2 + $0x8f] sm:$0xff]  ;;  %2807 = vst [vmem:[#allocation2 + $0xb0] sm:$0xff] %v2774_v25  ;;  %v8496_v60 = vpack.c.bf16 %v2774_v25, %v2773_v36  ;;  %v3165_v27 = vpack.c.bf16 %v3149_v32, %v3148_v39  ;;  %v7110_v44 = vld [vmem:[%s9286_s4 + $0x78] sm:$0xff]  }
 0x2cc   : > { %6054 = vmatprep.subr.bf16.mxu1 %v7106_v10  ;;  %v8494_v38 = vpack.c.bf16 %v3029_v23, %v3028_v3  ;;  %6504 = vmatprep.mubr.bf16.mxu1 %v3164_v54  ;;  %2810 = vst [vmem:[#allocation2 + $0xe8] sm:$0xff] %v2777_v52  ;;  %v2748_v10 = vadd.f32 %v8304_v14, %v2709_v57  ;;  %v2831_v21 = vld [vmem:[#allocation2 + $0xf] sm:$0xff]  ;;  %2812 = vst [vmem:[#allocation2 + $0x108] sm:$0xff] %v2779_v55  ;;  %v3030_v14 = vld [vmem:[#allocation2 + $0xa7] sm:$0xff] }
 0x2cd   : > { %v2862_v8 = vpack.c.bf16 %v2831_v21, %v2830_v56  ;;  %v7116_v25 = vld [vmem:[%s9286_s4 + $0xa0] sm:$0xff]   ;;  %v7117_v47 = vld [vmem:[%s9286_s4 + $0xa8] sm:$0xff]   ;;  %v7118_v33 = vld [vmem:[%s9286_s4 + $0xb0] sm:$0xff]  }
 0x2ce   : > { %6471 = vmatpush3.bf16.msra.mxu0 %v8267_v26  ;;  %v2778_v26 = vmax.f32 %v2746_v45, 0.0  ;;  %v2780_v42 = vmax.f32 %v2748_v10, 0.0  ;;  %v3032_v19 = vld [vmem:[#allocation2 + $0xc7] sm:$0xff]  ;;  %v7127_v23 = vld [vmem:[%s9286_s4 + $0xb8] sm:$0xff]   ;;  %v3043_v54 = vld [vmem:[#allocation2 + $0x16f] sm:$0xff] }
 0x2cf   : > { %6055 = vmatpush3.bf16.msra.mxu1 %v7107_v22  ;;  %6472 = vmatprep.subr.bf16.mxu0 %v8281_v63  ;;  %v7112_v22 = vld [vmem:[%s9286_s4 + $0x80] sm:$0xff]   ;;  %v3033_v34 = vld [vmem:[#allocation2 + $0xcf] sm:$0xff] }
 0x2d0   : > { %6056 = vmatprep.subr.bf16.mxu1 %v7108_v37  ;;  %2811 = vst [vmem:[#allocation2 + $0xf0] sm:$0xff] %v2778_v26  ;;  %2813 = vst [vmem:[#allocation2 + $0x110] sm:$0xff] %v2780_v42  ;;  %v8533_v41 = vpack.c.bf16 %v3033_v34, %v3032_v19  ;;  %v8538_v6 = vpack.c.bf16 %v2778_v26, %v2777_v52  ;;  %v3038_v30 = vld [vmem:[#allocation2 + $0x127] sm:$0xff]  ;;  %v3045_v45 = vld [vmem:[#allocation2 + $0x18f] sm:$0xff] }
 0x2d1   : > { %3415 = vmatmul.mubr.bf16.gmra.mrb[12].mxu0 %v8494_v38  ;;  %6505 = vmatmul.mubr.bf16.gmra.mrb[12].mxu1 %v3165_v27  ;;  %v3042_v48 = vld [vmem:[#allocation2 + $0x167] sm:$0xff]  ;;  %v3049_v52 = vld [vmem:[#allocation2 + $0x1cf] sm:$0xff] }
 0x2d2   : > { %3422 = vmatprep.mubr.bf16.mxu0 %v8496_v60  ;;  %6473 = vmatpush3.bf16.msra.mxu0 %v8281_v63  ;;  %v3031_v2 = vld [vmem:[#allocation2 + $0xaf] sm:$0xff]  ;;  %v8522_v63 = vpack.c.bf16 %v2776_v20, %v2775_v9  ;;  %v8594_v39 = vpack.c.bf16 %v3043_v54, %v3042_v48  ;;  %v3044_v32 = vld [vmem:[#allocation2 + $0x187] sm:$0xff] }
 0x2d3   : > { %6057 = vmatpush3.bf16.msra.mxu1 %v7109_v16  ;;  %3856 = vmatprep.mubr.bf16.mxu1 %v2910_v13  ;;  %v8524_v50 = vpack.c.bf16 %v3031_v2, %v3030_v14  ;;  %v3034_v3 = vld [vmem:[#allocation2 + $0xe7] sm:$0xff]  ;;  %v8555_v13 = vpack.c.bf16 %v2780_v42, %v2779_v55  ;;  %v8600_v7 = vpack.c.bf16 %v3045_v45, %v3044_v32  ;;  %v3047_v16 = vld [vmem:[#allocation2 + $0x1af] sm:$0xff] }
 0x2d4   : > { %6058 = vmatprep.subr.bf16.mxu1 %v7110_v44  ;;  %6474 = vmatprep.subr.bf16.mxu0 %v8292_v46  ;;  %v3046_v27 = vld [vmem:[#allocation2 + $0x1a7] sm:$0xff]  ;;  %v3051_v57 = vld [vmem:[#allocation2 + $0x1ef] sm:$0xff] }
 0x2d5   : > { %v8606_v9 = vpack.c.bf16 %v3047_v16, %v3046_v27  ;;  %v3048_v20 = vld [vmem:[#allocation2 + $0x1c7] sm:$0xff]  ;;  %v3123_v42 = vld [vmem:[#allocation2 + $0x71] sm:$0xff] }
 0x2d6   : > { %6475 = vmatpush3.bf16.msra.mxu0 %v8292_v46  ;;  %v7114_v46 = vld [vmem:[%s9286_s4 + $0x90] sm:$0xff]   ;;  %v8612_v44 = vpack.c.bf16 %v3049_v52, %v3048_v20  ;;  %v3050_v26 = vld [vmem:[#allocation2 + $0x1e7] sm:$0xff] }
 0x2d7   : > { %6059 = vmatpush3.bf16.msra.mxu1 %v7111_v29  ;;  %v3035_v37 = vld [vmem:[#allocation2 + $0xef] sm:$0xff]  ;;  %6180 = vmatprep.subr.bf16.mxu0 %v7119_v24  ;;  %v8618_v1 = vpack.c.bf16 %v3051_v57, %v3050_v26  ;;  %v3052_v10 = vld [vmem:[#allocation2 + $0x207] sm:$0xff] }
 0x2d8   : > { %6508 = vmatprep.subr.bf16.mxu1 %v7112_v22  ;;  %v8550_v36 = vpack.c.bf16 %v3035_v37, %v3034_v3  ;;  %v3118_v55 = vld [vmem:[#allocation2 + $0x29] sm:$0xff]  ;;  %v3119_v29 = vld [vmem:[#allocation2 + $0x31] sm:$0xff] }
 0x2d9   : > { %3423 = vmatmul.mubr.bf16.gmra.mrb[16].mxu0 %v8524_v50  ;;  %v8626_v21 = vpack.c.bf16 %v3119_v29, %v3118_v55  ;;  %v3125_v19 = vld [vmem:[#allocation2 + $0x91] sm:$0xff]  ;;  %v3132_v48 = vld [vmem:[#allocation2 + $0x109] sm:$0xff] }
 0x2da   : > { %3430 = vmatprep.mubr.bf16.mxu0 %v8522_v63  ;;  %3857 = vmatmul.mubr.bf16.vlgmr.msra.gmra.mrb[16].mxu1 %v2862_v8  ;;  %v7121_v8 = vld [vmem:[%s9286_s4 + $0x1c8] sm:$0xff]   ;;  %v7123_v34 = vld [vmem:[%s9286_s4 + $0x1d0] sm:$0xff]  }
 0x2db   : > { %6509 = vmatpush3.bf16.msra.mxu1 %v7112_v22  ;;  %3864 = vmatprep.mubr.bf16.mxu1 %v8328_v58  ;;  %v7115_v58 = vld [vmem:[%s9286_s4 + $0x98] sm:$0xff]   ;;  %v7124_v3 = vld [vmem:[%s9286_s4 + $0x190] sm:$0xff]   ;;  %v4195_v45 = vld [vmem:[#allocation2 + $0x48] sm:$0xff] }
 0x2dc   : > { %6510 = vmatprep.subr.bf16.mxu1 %v7113_v59  ;;  %v3121_v22 = vld [vmem:[#allocation2 + $0x51] sm:$0xff]  ;;  %v2926_v20 = vld [vmem:[#allocation2 + $0x9] sm:$0xff] }
 0x2dd   : > { %v3127_v24 = vld [vmem:[#allocation2 + $0xb1] sm:$0xff]  ;;  %v4147_v55 = vld [vmem:[#allocation2 + $0x47] sm:$0xff] }
 0x2de   : > { %v3133_v54 = vld [vmem:[#allocation2 + $0x111] sm:$0xff] }
 0x2df   : > { %6511 = vmatpush3.bf16.msra.mxu1 %v7113_v59  ;;  %v7122_v59 = vld [vmem:[%s9286_s4 + $0x188] sm:$0xff]   ;;  %v7132_v32 = vld [vmem:[%s9286_s4 + $0x1f0] sm:$0xff]   ;;  %v8692_v16 = vpack.c.bf16 %v3133_v54, %v3132_v48 }
 0x2e0   : > { %6512 = vmatprep.subr.bf16.mxu1 %v7114_v46  ;;  %v4196_v27 = vld [vmem:[#allocation2 + $0x50] sm:$0xff] }
 0x2e1   : > { %3431 = vmatmul.mubr.bf16.gmra.mrb[20].mxu0 %v8533_v41  ;;  %v2927_v52 = vld [vmem:[#allocation2 + $0x11] sm:$0xff]  ;;  %v4227_v57 = vpack.c.bf16 %v4196_v27, %v4195_v45  ;;  %v2956_v27 = vld [vmem:[#allocation2 + $0x1e9] sm:$0xff] }
 0x2e2   : > { %3438 = vmatprep.mubr.bf16.mxu0 %v8538_v6  ;;  %3865 = vmatmul.mubr.bf16.gmra.mrb[20].mxu1 %v8363_v4  ;;  %v3036_v4 = vld [vmem:[#allocation2 + $0x107] sm:$0xff]  ;;  %v7133_v26 = vld [vmem:[%s9286_s4 + $0x1b0] sm:$0xff]  }
 0x2e3   : > { %3872 = vmatprep.mubr.bf16.mxu1 %v8359_v17  ;;  %6513 = vmatpush3.bf16.msra.mxu1 %v7114_v46  ;;  %v3037_v17 = vld [vmem:[#allocation2 + $0x10f] sm:$0xff] }
 0x2e4   : > { %6514 = vmatprep.subr.bf16.mxu1 %v7115_v58  ;;  %v8564_v43 = vpack.c.bf16 %v3037_v17, %v3036_v4  ;;  %v3126_v46 = vld [vmem:[#allocation2 + $0xa9] sm:$0xff]  ;;  %v3129_v4 = vld [vmem:[#allocation2 + $0xd1] sm:$0xff]  ;;  %v7128_v17 = vld [vmem:[%s9286_s4 + $0x1e0] sm:$0xff]  }
 0x2e5   : > { %v8657_v37 = vpack.c.bf16 %v3127_v24, %v3126_v46  ;;  %v4148_v29 = vld [vmem:[#allocation2 + $0x4f] sm:$0xff] }
 0x2e6   : > { %v2945_v46 = vld [vmem:[#allocation2 + $0x131] sm:$0xff]  ;;  %v2946_v24 = vld [vmem:[#allocation2 + $0x149] sm:$0xff] }
 0x2e7   : > { %6515 = vmatpush3.bf16.msra.mxu1 %v7115_v58 }
 0x2e8   : > { %6516 = vmatprep.subr.bf16.mxu1 %v7116_v25 }
 0x2e9   : > { %3439 = vmatmul.mubr.bf16.gmra.mrb[24].mxu0 %v8550_v36 }
 0x2ea   : > { %3446 = vmatprep.mubr.bf16.mxu0 %v8555_v13  ;;  %3873 = vmatmul.mubr.bf16.gmra.mrb[24].mxu1 %v8397_v31  ;;  %v3039_v31 = vld [vmem:[#allocation2 + $0x12f] sm:$0xff] }
 0x2eb   : > { %3880 = vmatprep.mubr.bf16.mxu1 %v8402_v61  ;;  %6517 = vmatpush3.bf16.msra.mxu1 %v7116_v25  ;;  %v8576_v61 = vpack.c.bf16 %v3039_v31, %v3038_v30  ;;  %v7125_v25 = vld [vmem:[%s9286_s4 + $0x1d8] sm:$0xff]   ;;  %v7129_v31 = vld [vmem:[%s9286_s4 + $0x1a0] sm:$0xff]  }
 0x2ec   : > { %6518 = vmatprep.subr.bf16.mxu1 %v7117_v47  ;;  %v3131_v30 = vld [vmem:[#allocation2 + $0xf1] sm:$0xff] }
 0x2ef   : > { %6519 = vmatpush3.bf16.msra.mxu1 %v7117_v47  ;;  %v3128_v47 = vld [vmem:[#allocation2 + $0xc9] sm:$0xff] }
 0x2f0   : > { %6520 = vmatprep.subr.bf16.mxu1 %v7118_v33 }
 0x2f1   : > { %3447 = vmatmul.mubr.bf16.gmra.mrb[28].mxu0 %v8564_v43 }
 0x2f2   : > { %3454 = vmatprep.mubr.bf16.mxu0 %v8348_v35  ;;  %3881 = vmatmul.mubr.bf16.gmra.mrb[28].mxu1 %v8438_v40  ;;  %v3041_v40 = vld [vmem:[#allocation2 + $0x14f] sm:$0xff] }
 0x2f3   : > { %3888 = vmatprep.mubr.bf16.mxu1 %v8443_v0  ;;  %6521 = vmatpush3.bf16.msra.mxu1 %v7118_v33  ;;  %v8588_v62 = vpack.c.bf16 %v3041_v40, %v3040_v53  ;;  %v3130_v33 = vld [vmem:[#allocation2 + $0xe9] sm:$0xff] }
 0x2f4   : > { %6522 = vmatprep.subr.bf16.mxu1 %v7127_v23  ;;  %v8677_v53 = vpack.c.bf16 %v3131_v30, %v3130_v33  ;;  %v7130_v40 = vld [vmem:[%s9286_s4 + $0x1e8] sm:$0xff]  }
 0x2f5   : > { %v2952_v30 = vld [vmem:[#allocation2 + $0x1a9] sm:$0xff] }
 0x2f7   : > { %6523 = vmatpush3.bf16.msra.mxu1 %v7127_v23  ;;  %v8672_v23 = vpack.c.bf16 %v3129_v4, %v3128_v47  ;;  %v2950_v47 = vld [vmem:[#allocation2 + $0x189] sm:$0xff]  ;;  %v2951_v4 = vld [vmem:[#allocation2 + $0x191] sm:$0xff] }
 0x2f8   : > { %6556 = vmatprep.subr.bf16.mxu1 %v8581_v49  ;;  %v8750_v33 = vpack.c.bf16 %v2951_v4, %v2950_v47 }
 0x2f9   : > { %3455 = vmatmul.mubr.bf16.gmra.mrb[32].mxu0 %v8576_v61 }
 0x2fa   : > { %3462 = vmatprep.mubr.bf16.mxu0 %v8353_v12  ;;  %3889 = vmatmul.mubr.bf16.gmra.mrb[32].mxu1 %v8494_v38 }
 0x2fb   : > { %3896 = vmatprep.mubr.bf16.mxu1 %v8496_v60 }
 0x301   : > { %3463 = vmatmul.mubr.bf16.gmra.mrb[36].mxu0 %v8588_v62 }
 0x302   : > { %3470 = vmatprep.mubr.bf16.mxu0 %v8370_v5  ;;  %3897 = vmatmul.mubr.bf16.gmra.mrb[36].mxu1 %v8524_v50 }
 0x303   : > { %3904 = vmatprep.mubr.bf16.mxu1 %v8522_v63 }
 0x309   : > { %3471 = vmatmul.mubr.bf16.gmra.mrb[40].mxu0 %v8594_v39 }
 0x30a   : > { %3478 = vmatprep.mubr.bf16.mxu0 %v8372_v28  ;;  %3905 = vmatmul.mubr.bf16.gmra.mrb[40].mxu1 %v8533_v41 }
 0x30b   : > { %3912 = vmatprep.mubr.bf16.mxu1 %v8538_v6 }
 0x311   : > { %3479 = vmatmul.mubr.bf16.gmra.mrb[44].mxu0 %v8600_v7 }
 0x312   : > { %3486 = vmatprep.mubr.bf16.mxu0 %v8410_v11  ;;  %3913 = vmatmul.mubr.bf16.gmra.mrb[44].mxu1 %v8550_v36 }
 0x313   : > { %3920 = vmatprep.mubr.bf16.mxu1 %v8555_v13 }
 0x319   : > { %3487 = vmatmul.mubr.bf16.gmra.mrb[48].mxu0 %v8606_v9 }
 0x31a   : > { %3494 = vmatprep.mubr.bf16.mxu0 %v8416_v18  ;;  %3921 = vmatmul.mubr.bf16.gmra.mrb[48].mxu1 %v8564_v43 }
 0x31b   : > { %3928 = vmatprep.mubr.bf16.mxu1 %v8348_v35  ;;  %v3053_v35 = vld [vmem:[#allocation2 + $0x20f] sm:$0xff] }
 0x31c   : > { %v8624_v56 = vpack.c.bf16 %v3053_v35, %v3052_v10  ;;  %v7134_v10 = vld [vmem:[%s9286_s4 + $0x1f8] sm:$0xff]   ;;  %v2958_v35 = vpack.c.bf16 %v2927_v52, %v2926_v20 }
 0x31d   : > { %v2957_v20 = vld [vmem:[#allocation2 + $0x1f1] sm:$0xff] }
 0x321   : > { %3495 = vmatmul.mubr.bf16.gmra.mrb[52].mxu0 %v8612_v44 }
 0x322   : > { %3502 = vmatprep.mubr.bf16.mxu0 %v8446_v51  ;;  %3929 = vmatmul.mubr.bf16.gmra.mrb[52].mxu1 %v8576_v61 }
 0x323   : > { %3936 = vmatprep.mubr.bf16.mxu1 %v8353_v12  ;;  %v3120_v12 = vld [vmem:[#allocation2 + $0x49] sm:$0xff] }
 0x324   : > { %v8632_v14 = vpack.c.bf16 %v3121_v22, %v3120_v12  ;;  %v4197_v12 = vld [vmem:[#allocation2 + $0x68] sm:$0xff]  ;;  %v4198_v22 = vld [vmem:[#allocation2 + $0x70] sm:$0xff] }
 0x329   : > { %3503 = vmatmul.mubr.bf16.gmra.mrb[56].mxu0 %v8618_v1 }
 0x32a   : > { %3510 = vmatprep.mubr.bf16.mxu0 %v8454_v15  ;;  %3937 = vmatmul.mubr.bf16.gmra.mrb[56].mxu1 %v8588_v62  ;;  %v3122_v15 = vld [vmem:[#allocation2 + $0x69] sm:$0xff] }
 0x32b   : > { %3944 = vmatprep.mubr.bf16.mxu1 %v8370_v5  ;;  %v7120_v5 = vld [vmem:[%s9286_s4 + $0x180] sm:$0xff]   ;;  %v8637_v2 = vpack.c.bf16 %v3123_v42, %v3122_v15  ;;  %v4179_v15 = vpack.c.bf16 %v4148_v29, %v4147_v55  ;;  %v4228_v42 = vpack.c.bf16 %v4198_v22, %v4197_v12  ;;  %v4214_v29 = vld [vmem:[#allocation2 + $0x170] sm:$0xff] }
 0x331   : > { %3511 = vmatmul.mubr.bf16.gmra.mrb[60].mxu0 %v8624_v56 }
 0x332   : > { %6476 = vmatprep.mubr.bf16.mxu0 %v8626_v21  ;;  %3945 = vmatmul.mubr.bf16.gmra.mrb[60].mxu1 %v8594_v39 }
 0x333   : > { %3952 = vmatprep.mubr.bf16.mxu1 %v8372_v28  ;;  %v3124_v28 = vld [vmem:[#allocation2 + $0x89] sm:$0xff] }
 0x334   : > { %v8652_v58 = vpack.c.bf16 %v3125_v19, %v3124_v28  ;;  %v7138_v19 = vld [vmem:[%s9286_s4 + $0x210] sm:$0xff]  }
 0x339   : > { %6477 = vmatmul.mubr.bf16.vlgmr.msra.gmra.mrb[64].mxu0 %v8632_v14 }
 0x33a   : > { %6181 = vmatpush3.bf16.msra.mxu0 %v7120_v5  ;;  %6480 = vmatprep.mubr.bf16.mxu0 %v8637_v2  ;;  %v7137_v5 = vld [vmem:[%s9286_s4 + $0x208] sm:$0xff]  }
 0x33b   : > { %3953 = vmatmul.mubr.bf16.gmra.mrb[64].mxu1 %v8600_v7  ;;  %6182 = vmatprep.subr.bf16.mxu0 %v7121_v8  ;;  %v4149_v8 = vld [vmem:[#allocation2 + $0x67] sm:$0xff] }
 0x33c   : > { %3960 = vmatprep.mubr.bf16.mxu1 %v8410_v11  ;;  %v7126_v11 = vld [vmem:[%s9286_s4 + $0x198] sm:$0xff]  }
 0x33e   : > { %6183 = vmatpush3.bf16.msra.mxu0 %v7122_v59  ;;  %v4150_v59 = vld [vmem:[#allocation2 + $0x6f] sm:$0xff] }
 0x33f   : > { %6184 = vmatprep.subr.bf16.mxu0 %v7123_v34  ;;  %v4180_v28 = vpack.c.bf16 %v4150_v59, %v4149_v8  ;;  %v7139_v34 = vld [vmem:[%s9286_s4 + $0x218] sm:$0xff]  }
 0x341   : > { %6481 = vmatmul.mubr.bf16.gmra.mrb[68].mxu0 %v8652_v58 }
 0x342   : > { %6185 = vmatpush3.bf16.msra.mxu0 %v7124_v3  ;;  %6484 = vmatprep.mubr.bf16.mxu0 %v8657_v37  ;;  %v2947_v3 = vld [vmem:[#allocation2 + $0x151] sm:$0xff] }
 0x343   : > { %3961 = vmatmul.mubr.bf16.gmra.mrb[68].mxu1 %v8606_v9  ;;  %6186 = vmatprep.subr.bf16.mxu0 %v7125_v25 }
 0x344   : > { %3968 = vmatprep.mubr.bf16.mxu1 %v8416_v18  ;;  %v7131_v18 = vld [vmem:[%s9286_s4 + $0x1a8] sm:$0xff]  }
 0x346   : > { %6187 = vmatpush3.bf16.msra.mxu0 %v7126_v11  ;;  %v2949_v11 = vld [vmem:[#allocation2 + $0x171] sm:$0xff] }
 0x347   : > { %6188 = vmatprep.subr.bf16.mxu0 %v7128_v17 }
 0x349   : > { %6485 = vmatmul.mubr.bf16.gmra.mrb[72].mxu0 %v8672_v23 }
 0x34a   : > { %6189 = vmatpush3.bf16.msra.mxu0 %v7129_v31  ;;  %6488 = vmatprep.mubr.bf16.mxu0 %v8677_v53  ;;  %v2953_v31 = vld [vmem:[#allocation2 + $0x1b1] sm:$0xff] }
 0x34b   : > { %3969 = vmatmul.mubr.bf16.gmra.mrb[72].mxu1 %v8612_v44  ;;  %6190 = vmatprep.subr.bf16.mxu0 %v7130_v40  ;;  %v2954_v40 = vld [vmem:[#allocation2 + $0x1c9] sm:$0xff]  ;;  %v8756_v54 = vpack.c.bf16 %v2953_v31, %v2952_v30 }
 0x34c   : > { %3976 = vmatprep.mubr.bf16.mxu1 %v8446_v51  ;;  %v7135_v51 = vld [vmem:[%s9286_s4 + $0x1b8] sm:$0xff]  }
 0x34e   : > { %6191 = vmatpush3.bf16.msra.mxu0 %v7131_v18  ;;  %v2955_v18 = vld [vmem:[#allocation2 + $0x1d1] sm:$0xff] }
 0x34f   : > { %6192 = vmatprep.subr.bf16.mxu0 %v7132_v32  ;;  %v8758_v32 = vpack.c.bf16 %v2955_v18, %v2954_v40 }
 0x351   : > { %6489 = vmatmul.mubr.bf16.gmra.mrb[76].mxu0 %v8692_v16 }
 0x352   : > { %6193 = vmatpush3.bf16.msra.mxu0 %v7133_v26  ;;  %4515 = vmatprep.mubr.bf16.mxu0 %v4227_v57 }
 0x353   : > { %3977 = vmatmul.mubr.bf16.gmra.mrb[76].mxu1 %v8618_v1  ;;  %6194 = vmatprep.subr.bf16.mxu0 %v7134_v10 }
 0x354   : > { %6524 = vmatprep.mubr.bf16.mxu1 %v2958_v35 }
 0x356   : > { %6195 = vmatpush3.bf16.msra.mxu0 %v7135_v51  ;;  %v8765_v51 = vpack.c.bf16 %v2957_v20, %v2956_v27 }
 0x359   : > { %4516 = vmatmul.mubr.bf16.vlgmr.msra.gmra.mrb[80].mxu0 %v4179_v15 }
 0x35a   : > { %4523 = vmatprep.mubr.bf16.mxu0 %v4228_v42 }
 0x35b   : > { %6525 = vmatmul.mubr.bf16.vlgmr.msra.gmra.mrb[80].mxu1 %v8626_v21  ;;  %v7141_v21 = vld [vmem:[%s9286_s4 + $0x228] sm:$0xff]  }
 0x35c   : > { %6557 = vmatpush3.bf16.msra.mxu1 %v8581_v49  ;;  %6528 = vmatprep.mubr.bf16.mxu1 %v8632_v14  ;;  %v7140_v49 = vld [vmem:[%s9286_s4 + $0x220] sm:$0xff]  }
 0x35d   : > { %6558 = vmatprep.subr.bf16.mxu1 %v7137_v5 }
 0x360   : > { %6559 = vmatpush3.bf16.msra.mxu1 %v7137_v5 }
 0x361   : > { %4524 = vmatmul.mubr.bf16.gmra.mrb[84].mxu0 %v4180_v28  ;;  %6560 = vmatprep.subr.bf16.mxu1 %v7138_v19  ;;  %v4216_v28 = vld [vmem:[#allocation2 + $0x190] sm:$0xff] }
 0x362   : > { %4531 = vmatprep.mubr.bf16.mxu0 %v8443_v0  ;;  %v7142_v0 = vld [vmem:[%s9286_s4 + $0x230] sm:$0xff]  }
 0x363   : > { %6529 = vmatmul.mubr.bf16.gmra.mrb[84].mxu1 %v8637_v2 }
 0x364   : > { %6532 = vmatprep.mubr.bf16.mxu1 %v8652_v58  ;;  %6561 = vmatpush3.bf16.msra.mxu1 %v7138_v19 }
 0x365   : > { %6562 = vmatprep.subr.bf16.mxu1 %v7139_v34 }
 0x368   : > { %6563 = vmatpush3.bf16.msra.mxu1 %v7139_v34 }
 0x369   : > { %4532 = vmatmul.mubr.bf16.gmra.mrb[88].mxu0 %v8494_v38  ;;  %6564 = vmatprep.subr.bf16.mxu1 %v7140_v49  ;;  %v7143_v38 = vld [vmem:[%s9286_s4 + $0x238] sm:$0xff]  }
 0x36a   : > { %4539 = vmatprep.mubr.bf16.mxu0 %v8496_v60  ;;  %v2944_v60 = vld [vmem:[#allocation2 + $0x129] sm:$0xff] }
 0x36b   : > { %6533 = vmatmul.mubr.bf16.gmra.mrb[88].mxu1 %v8657_v37  ;;  %v8740_v25 = vpack.c.bf16 %v2945_v46, %v2944_v60 }
 0x36c   : > { %6536 = vmatprep.mubr.bf16.mxu1 %v8672_v23  ;;  %6565 = vmatpush3.bf16.msra.mxu1 %v7140_v49 }
 0x36d   : > { %6566 = vmatprep.subr.bf16.mxu1 %v7141_v21 }
 0x370   : > { %6567 = vmatpush3.bf16.msra.mxu1 %v7141_v21 }
 0x371   : > { %4540 = vmatmul.mubr.bf16.gmra.mrb[92].mxu0 %v8524_v50  ;;  %6568 = vmatprep.subr.bf16.mxu1 %v7142_v0  ;;  %v8742_v50 = vpack.c.bf16 %v2947_v3, %v2946_v24 }
 0x372   : > { %4547 = vmatprep.mubr.bf16.mxu0 %v8522_v63  ;;  %v2948_v63 = vld [vmem:[#allocation2 + $0x169] sm:$0xff] }
 0x373   : > { %6537 = vmatmul.mubr.bf16.gmra.mrb[92].mxu1 %v8677_v53  ;;  %v8748_v17 = vpack.c.bf16 %v2949_v11, %v2948_v63 }
 0x374   : > { %6540 = vmatprep.mubr.bf16.mxu1 %v8692_v16  ;;  %6569 = vmatpush3.bf16.msra.mxu1 %v7142_v0 }
 0x375   : > { %6570 = vmatprep.subr.bf16.mxu1 %v7143_v38 }
 0x378   : > { %6571 = vmatpush3.bf16.msra.mxu1 %v7143_v38 }
 0x379   : > { %4548 = vmatmul.mubr.bf16.gmra.mrb[96].mxu0 %v8533_v41  ;;  %v4209_v41 = vld [vmem:[#allocation2 + $0x128] sm:$0xff] }
 0x37a   : > { %4555 = vmatprep.mubr.bf16.mxu0 %v8538_v6  ;;  %v4210_v6 = vld [vmem:[#allocation2 + $0x130] sm:$0xff] }
 0x37b   : > { %6541 = vmatmul.mubr.bf16.gmra.mrb[0].mxu1 %v8740_v25  ;;  %v4234_v48 = vpack.c.bf16 %v4210_v6, %v4209_v41 }
 0x37c   : > { %6544 = vmatprep.mubr.bf16.mxu1 %v8742_v50 }
 0x381   : > { %4556 = vmatmul.mubr.bf16.gmra.mrb[100].mxu0 %v8550_v36  ;;  %v4211_v36 = vld [vmem:[#allocation2 + $0x148] sm:$0xff] }
 0x382   : > { %4563 = vmatprep.mubr.bf16.mxu0 %v8555_v13  ;;  %v4212_v13 = vld [vmem:[#allocation2 + $0x150] sm:$0xff] }
 0x383   : > { %6545 = vmatmul.mubr.bf16.gmra.mrb[4].mxu1 %v8748_v17  ;;  %v4235_v10 = vpack.c.bf16 %v4212_v13, %v4211_v36  ;;  %v4222_v13 = vld [vmem:[#allocation2 + $0x1f0] sm:$0xff] }
 0x384   : > { %6548 = vmatprep.mubr.bf16.mxu1 %v8750_v33 }
 0x389   : > { %4564 = vmatmul.mubr.bf16.gmra.mrb[104].mxu0 %v8564_v43  ;;  %v4213_v43 = vld [vmem:[#allocation2 + $0x168] sm:$0xff] }
 0x38a   : > { %4571 = vmatprep.mubr.bf16.mxu0 %v4234_v48  ;;  %v4236_v5 = vpack.c.bf16 %v4214_v29, %v4213_v43 }
 0x38b   : > { %6549 = vmatmul.mubr.bf16.gmra.mrb[8].mxu1 %v8756_v54 }
 0x38c   : > { %v5924_v45 = vpop.f32.mrb[0].mxu0  ;;  %6552 = vmatprep.mubr.bf16.mxu1 %v8758_v32 }
 0x38d   : > { %v5925_v52 = vpop.f32.mrb[1].mxu0 }
 0x38e   : > { %v8763_v26 = vadd.f32 %v5925_v52, %v5924_v45  ;;  %v5927_v57 = vpop.f32.mrb[2].mxu0 }
 0x38f   : > { %v5928_v35 = vpop.f32.mrb[3].mxu0 }
 0x390   : > { %v8767_v55 = vadd.f32 %v5928_v35, %v5927_v57 }
 0x391   : > { %4572 = vmatmul.mubr.bf16.gmra.mrb[108].mxu0 %v8576_v61  ;;  %v4215_v61 = vld [vmem:[#allocation2 + $0x188] sm:$0xff] }
 0x392   : > { %4579 = vmatprep.mubr.bf16.mxu0 %v4235_v10  ;;  %v4237_v21 = vpack.c.bf16 %v4216_v28, %v4215_v61 }
 0x393   : > { %6553 = vmatmul.mubr.bf16.gmra.mrb[12].mxu1 %v8765_v51 }
 0x394   : > { %v5930_v12 = vpop.f32.mrb[4].mxu0  ;;  %6572 = vmatprep.mubr.bf16.mxu1 %v8632_v14 }
 0x395   : > { %v5931_v22 = vpop.f32.mrb[5].mxu0 }
 0x396   : > { %v8772_v15 = vadd.f32 %v5931_v22, %v5930_v12  ;;  %v5933_v42 = vpop.f32.mrb[6].mxu0 }
 0x397   : > { %v5934_v8 = vpop.f32.mrb[7].mxu0 }
 0x398   : > { %v8774_v59 = vadd.f32 %v5934_v8, %v5933_v42  ;;  %v4224_v42 = vld [vmem:[#allocation2 + $0x210] sm:$0xff] }
 0x399   : > { %4580 = vmatmul.mubr.bf16.gmra.mrb[112].mxu0 %v8588_v62  ;;  %v4217_v62 = vld [vmem:[#allocation2 + $0x1a8] sm:$0xff] }
 0x39a   : > { %4587 = vmatprep.mubr.bf16.mxu0 %v4236_v5 }
 0x39b   : > { %6573 = vmatmul.mubr.bf16.vlgmr.msra.gmra.mrb[80].mxu1 %v8637_v2  ;;  %v4218_v2 = vld [vmem:[#allocation2 + $0x1b0] sm:$0xff] }
 0x39c   : > { %v5936_v19 = vpop.f32.mrb[8].mxu0  ;;  %6576 = vmatprep.mubr.bf16.mxu1 %v8652_v58  ;;  %v4238_v3 = vpack.c.bf16 %v4218_v2, %v4217_v62 }
 0x39d   : > { %v5937_v34 = vpop.f32.mrb[9].mxu0 }
 0x39e   : > { %v8779_v14 = vadd.f32 %v5937_v34, %v5936_v19  ;;  %v5939_v49 = vpop.f32.mrb[10].mxu0 }
 0x39f   : > { %v5940_v0 = vpop.f32.mrb[11].mxu0 }
 0x3a0   : > { %v8781_v38 = vadd.f32 %v5940_v0, %v5939_v49 }
 0x3a1   : > { %4588 = vmatmul.mubr.bf16.gmra.mrb[116].mxu0 %v8594_v39  ;;  %v4219_v39 = vld [vmem:[#allocation2 + $0x1c8] sm:$0xff] }
 0x3a2   : > { %4595 = vmatprep.mubr.bf16.mxu0 %v4237_v21 }
 0x3a3   : > { %6577 = vmatmul.mubr.bf16.gmra.mrb[84].mxu1 %v8657_v37  ;;  %v4220_v37 = vld [vmem:[#allocation2 + $0x1d0] sm:$0xff] }
 0x3a4   : > { %v5942_v60 = vpop.f32.mrb[12].mxu0  ;;  %6580 = vmatprep.mubr.bf16.mxu1 %v8672_v23  ;;  %v4239_v30 = vpack.c.bf16 %v4220_v37, %v4219_v39 }
 0x3a5   : > { %v5943_v46 = vpop.f32.mrb[13].mxu0 }
 0x3a6   : > { %v8786_v58 = vadd.f32 %v5943_v46, %v5942_v60  ;;  %v5945_v24 = vpop.f32.mrb[14].mxu0  ;;  %v4226_v60 = vld [vmem:[#allocation2 + $0x230] sm:$0xff] }
 0x3a7   : > { %v5946_v63 = vpop.f32.mrb[15].mxu0 }
 0x3a8   : > { %v8788_v11 = vadd.f32 %v5946_v63, %v5945_v24  ;;  %v4272_v63 = vld [vmem:[#allocation2 + $0x211] sm:$0xff] }
 0x3a9   : > { %4596 = vmatmul.mubr.bf16.gmra.mrb[120].mxu0 %v8600_v7 }
 0x3aa   : > { %4603 = vmatprep.mubr.bf16.mxu0 %v4238_v3  ;;  %v4271_v3 = vld [vmem:[#allocation2 + $0x209] sm:$0xff] }
 0x3ab   : > { %6581 = vmatmul.mubr.bf16.gmra.mrb[88].mxu1 %v8677_v53 }
 0x3ac   : > { %v5948_v47 = vpop.f32.mrb[16].mxu0  ;;  %6584 = vmatprep.mubr.bf16.mxu1 %v8692_v16  ;;  %v4221_v16 = vld [vmem:[#allocation2 + $0x1e8] sm:$0xff] }
 0x3ad   : > { %v5949_v4 = vpop.f32.mrb[17].mxu0  ;;  %v6060_v23 = vpop.f32.mrb[16].mxu1  ;;  %v4240_v10 = vpack.c.bf16 %v4222_v13, %v4221_v16  ;;  %v4273_v13 = vld [vmem:[#allocation2 + $0x229] sm:$0xff] }
 0x3ae   : > { %v8793_v41 = vadd.f32 %v5949_v4, %v5948_v47  ;;  %v5951_v6 = vpop.f32.mrb[18].mxu0  ;;  %v6061_v31 = vpop.f32.mrb[17].mxu1 }
 0x3af   : > { %v5952_v40 = vpop.f32.mrb[19].mxu0  ;;  %v8795_v18 = vadd.f32 %v6061_v31, %v6060_v23  ;;  %v6063_v48 = vpop.f32.mrb[18].mxu1 }
 0x3b0   : > { %v8797_v7 = vadd.f32 %v5952_v40, %v5951_v6  ;;  %v6064_v36 = vpop.f32.mrb[19].mxu1 }
 0x3b1   : > { %4604 = vmatmul.mubr.bf16.gmra.mrb[124].mxu0 %v8606_v9  ;;  %v8800_v53 = vadd.f32 %v6064_v36, %v6063_v48  ;;  %v4177_v48 = vld [vmem:[#allocation2 + $0x227] sm:$0xff]  ;;  %v4178_v36 = vld [vmem:[#allocation2 + $0x22f] sm:$0xff] }
 0x3b2   : > { %4611 = vmatprep.mubr.bf16.mxu0 %v4239_v30 }
 0x3b3   : > { %6585 = vmatmul.mubr.bf16.gmra.mrb[92].mxu1 %v8740_v25 }
 0x3b4   : > { %v5954_v45 = vpop.f32.mrb[20].mxu0  ;;  %6588 = vmatprep.mubr.bf16.mxu1 %v8742_v50  ;;  %v4223_v50 = vld [vmem:[#allocation2 + $0x208] sm:$0xff] }
 0x3b5   : > { %v5955_v27 = vpop.f32.mrb[21].mxu0  ;;  %v6066_v20 = vpop.f32.mrb[20].mxu1  ;;  %v4241_v34 = vpack.c.bf16 %v4224_v42, %v4223_v50 }
 0x3b6   : > { %v8804_v52 = vadd.f32 %v5955_v27, %v5954_v45  ;;  %v5957_v57 = vpop.f32.mrb[22].mxu0  ;;  %v6067_v35 = vpop.f32.mrb[21].mxu1  ;;  %v4274_v45 = vld [vmem:[#allocation2 + $0x231] sm:$0xff] }
 0x3b7   : > { %v5958_v43 = vpop.f32.mrb[23].mxu0  ;;  %v8806_v29 = vadd.f32 %v6067_v35, %v6066_v20  ;;  %v6069_v9 = vpop.f32.mrb[22].mxu1  ;;  %v4194_v20 = vpack.c.bf16 %v4178_v36, %v4177_v48 }
 0x3b8   : > { %v8808_v12 = vadd.f32 %v5958_v43, %v5957_v57  ;;  %v6070_v22 = vpop.f32.mrb[23].mxu1 }
 0x3b9   : > { %4612 = vmatmul.mubr.bf16.gmra.mrb[128].mxu0 %v8612_v44  ;;  %v8811_v25 = vadd.f32 %v6070_v22, %v6069_v9  ;;  %v4290_v22 = vpack.c.bf16 %v4274_v45, %v4273_v13 }
 0x3ba   : > { %4619 = vmatprep.mubr.bf16.mxu0 %v4240_v10 }
 0x3bb   : > { %6589 = vmatmul.mubr.bf16.gmra.mrb[0].mxu1 %v8748_v17 }
 0x3bc   : > { %v5960_v5 = vpop.f32.mrb[24].mxu0  ;;  %6592 = vmatprep.mubr.bf16.mxu1 %v8750_v33  ;;  %v4225_v33 = vld [vmem:[#allocation2 + $0x228] sm:$0xff] }
 0x3bd   : > { %v5961_v8 = vpop.f32.mrb[25].mxu0  ;;  %v6072_v61 = vpop.f32.mrb[24].mxu1  ;;  %v4242_v4 = vpack.c.bf16 %v4226_v60, %v4225_v33 }
 0x3be   : > { %v8815_v28 = vadd.f32 %v5961_v8, %v5960_v5  ;;  %v5963_v19 = vpop.f32.mrb[26].mxu0  ;;  %v6073_v49 = vpop.f32.mrb[25].mxu1 }
 0x3bf   : > { %v5964_v21 = vpop.f32.mrb[27].mxu0  ;;  %v8817_v0 = vadd.f32 %v6073_v49, %v6072_v61  ;;  %v6075_v44 = vpop.f32.mrb[26].mxu1 }
 0x3c0   : > { %v8819_v62 = vadd.f32 %v5964_v21, %v5963_v19  ;;  %v6076_v2 = vpop.f32.mrb[27].mxu1 }
 0x3c1   : > { %4620 = vmatmul.mubr.bf16.gmra.mrb[132].mxu0 %v8618_v1  ;;  %v8822_v17 = vadd.f32 %v6076_v2, %v6075_v44 }
 0x3c2   : > { %4627 = vmatprep.mubr.bf16.mxu0 %v4241_v34 }
 0x3c3   : > { %6593 = vmatmul.mubr.bf16.gmra.mrb[4].mxu1 %v8756_v54  ;;  %v4289_v54 = vpack.c.bf16 %v4272_v63, %v4271_v3 }
 0x3c4   : > { %v5966_v46 = vpop.f32.mrb[28].mxu0  ;;  %6596 = vmatprep.mubr.bf16.mxu1 %v8758_v32 }
 0x3c5   : > { %v5967_v24 = vpop.f32.mrb[29].mxu0  ;;  %v6078_v39 = vpop.f32.mrb[28].mxu1 }
 0x3c6   : > { %v8826_v37 = vadd.f32 %v5967_v24, %v5966_v46  ;;  %v5969_v47 = vpop.f32.mrb[30].mxu0  ;;  %v6079_v23 = vpop.f32.mrb[29].mxu1 }
 0x3c7   : > { %v5970_v1 = vpop.f32.mrb[31].mxu0  ;;  %v8828_v6 = vadd.f32 %v6079_v23, %v6078_v39  ;;  %v6081_v30 = vpop.f32.mrb[30].mxu1 }
 0x3c8   : > { %v8830_v31 = vadd.f32 %v5970_v1, %v5969_v47  ;;  %v6082_v40 = vpop.f32.mrb[31].mxu1 }
 0x3c9   : > { %4628 = vmatmul.mubr.bf16.gmra.mrb[136].mxu0 %v8624_v56  ;;  %v8833_v32 = vadd.f32 %v6082_v40, %v6081_v30 }
 0x3ca   : > { %4635 = vmatprep.mubr.bf16.mxu0 %v4242_v4 }
 0x3cb   : > { %6597 = vmatmul.mubr.bf16.gmra.mrb[8].mxu1 %v8765_v51 }
 0x3cc   : > { %v5972_v16 = vpop.f32.mrb[32].mxu0  ;;  %6600 = vmatprep.mubr.bf16.mxu1 %v4289_v54 }
 0x3cd   : > { %v5973_v27 = vpop.f32.mrb[33].mxu0  ;;  %v6084_v57 = vpop.f32.mrb[32].mxu1 }
 0x3ce   : > { %v5974_v10 = vadd.f32 %v5973_v27, %v5972_v16  ;;  %v5975_v35 = vpop.f32.mrb[34].mxu0  ;;  %v6085_v43 = vpop.f32.mrb[33].mxu1 }
 0x3cf   : > { %v5976_v9 = vpop.f32.mrb[35].mxu0  ;;  %v8836_v56 = vadd.f32 %v6085_v43, %v6084_v57  ;;  %v6087_v50 = vpop.f32.mrb[34].mxu1 }
 0x3d0   : > { %v5977_v42 = vadd.f32 %v5976_v9, %v5975_v35  ;;  %v6088_v5 = vpop.f32.mrb[35].mxu1 }
 0x3d1   : > { %4636 = vmatmul.mubr.bf16.gmra.mrb[140].mxu0 %v4194_v20  ;;  %v8838_v8 = vadd.f32 %v6088_v5, %v6087_v50 }
 0x3d3   : > { %6601 = vmatmul.mubr.bf16.gmra.mrb[12].mxu1 %v4290_v22 }
 0x3d4   : > { %v5978_v51 = vpop.f32.mrb[36].mxu0 }
 0x3d5   : > { %v5979_v61 = vpop.f32.mrb[37].mxu0  ;;  %v6090_v19 = vpop.f32.mrb[36].mxu1 }
 0x3d6   : > { %v5980_v34 = vadd.f32 %v5979_v61, %v5978_v51  ;;  %v5981_v49 = vpop.f32.mrb[38].mxu0  ;;  %v6091_v21 = vpop.f32.mrb[37].mxu1 }
 0x3d7   : > { %v5982_v44 = vpop.f32.mrb[39].mxu0  ;;  %v8840_v2 = vadd.f32 %v6091_v21, %v6090_v19  ;;  %v6093_v33 = vpop.f32.mrb[38].mxu1 }
 0x3d8   : > { %v5983_v60 = vadd.f32 %v5982_v44, %v5981_v49  ;;  %v6094_v46 = vpop.f32.mrb[39].mxu1 }
 0x3d9   : > { %v8842_v24 = vadd.f32 %v6094_v46, %v6093_v33 }
 0x3dc   : > { %v5984_v3 = vpop.f32.mrb[40].mxu0 }
 0x3dd   : > { %v5985_v63 = vpop.f32.mrb[41].mxu0  ;;  %v6096_v39 = vpop.f32.mrb[40].mxu1 }
 0x3de   : > { %v5986_v47 = vadd.f32 %v5985_v63, %v5984_v3  ;;  %v5987_v4 = vpop.f32.mrb[42].mxu0  ;;  %v6097_v23 = vpop.f32.mrb[41].mxu1 }
 0x3df   : > { %v5988_v1 = vpop.f32.mrb[43].mxu0  ;;  %v8844_v30 = vadd.f32 %v6097_v23, %v6096_v39  ;;  %v6099_v54 = vpop.f32.mrb[42].mxu1 }
 0x3e0   : > { %v5989_v40 = vadd.f32 %v5988_v1, %v5987_v4  ;;  %v6100_v48 = vpop.f32.mrb[43].mxu1 }
 0x3e1   : > { %v8846_v36 = vadd.f32 %v6100_v48, %v6099_v54 }
 0x3e4   : > { %v5990_v16 = vpop.f32.mrb[44].mxu0 }
 0x3e5   : > { %v5991_v13 = vpop.f32.mrb[45].mxu0  ;;  %v6102_v45 = vpop.f32.mrb[44].mxu1 }
 0x3e6   : > { %v5992_v27 = vadd.f32 %v5991_v13, %v5990_v16  ;;  %v5993_v20 = vpop.f32.mrb[46].mxu0  ;;  %v6103_v57 = vpop.f32.mrb[45].mxu1 }
 0x3e7   : > { %v5994_v35 = vpop.f32.mrb[47].mxu0  ;;  %v8848_v43 = vadd.f32 %v6103_v57, %v6102_v45  ;;  %v6105_v9 = vpop.f32.mrb[46].mxu1 }
 0x3e8   : > { %v5995_v22 = vadd.f32 %v5994_v35, %v5993_v20  ;;  %v6106_v50 = vpop.f32.mrb[47].mxu1 }
 0x3e9   : > { %v8850_v5 = vadd.f32 %v6106_v50, %v6105_v9 }
 0x3ec   : > { %v5996_v51 = vpop.f32.mrb[48].mxu0 }
 0x3ed   : > { %v5997_v61 = vpop.f32.mrb[49].mxu0  ;;  %v6108_v19 = vpop.f32.mrb[48].mxu1 }
 0x3ee   : > { %v8852_v49 = vadd.f32 %v5997_v61, %v5996_v51  ;;  %v5999_v21 = vpop.f32.mrb[50].mxu0  ;;  %v6109_v44 = vpop.f32.mrb[49].mxu1 }
 0x3ef   : > { %v6000_v33 = vpop.f32.mrb[51].mxu0  ;;  %v6110_v46 = vadd.f32 %v6109_v44, %v6108_v19  ;;  %v6111_v3 = vpop.f32.mrb[50].mxu1 }
 0x3f0   : > { %v8854_v63 = vadd.f32 %v6000_v33, %v5999_v21  ;;  %v6112_v39 = vpop.f32.mrb[51].mxu1 }
 0x3f1   : > { %v8856_v4 = vadd.f32 %v6110_v46, %v5974_v10  ;;  %v6113_v23 = vadd.f32 %v6112_v39, %v6111_v3 }
 0x3f3   : > { %v8858_v1 = vadd.f32 %v6113_v23, %v5977_v42 }
 0x3f4   : > { %v6002_v54 = vpop.f32.mrb[52].mxu0 }
 0x3f5   : > { %v6003_v48 = vpop.f32.mrb[53].mxu0  ;;  %v6114_v16 = vpop.f32.mrb[52].mxu1 }
 0x3f6   : > { %v8860_v13 = vadd.f32 %v6003_v48, %v6002_v54  ;;  %v6005_v45 = vpop.f32.mrb[54].mxu0  ;;  %v6115_v20 = vpop.f32.mrb[53].mxu1 }
 0x3f7   : > { %v6006_v57 = vpop.f32.mrb[55].mxu0  ;;  %v6116_v35 = vadd.f32 %v6115_v20, %v6114_v16  ;;  %v6117_v9 = vpop.f32.mrb[54].mxu1 }
 0x3f8   : > { %v8862_v50 = vadd.f32 %v6006_v57, %v6005_v45  ;;  %v6118_v51 = vpop.f32.mrb[55].mxu1 }
 0x3f9   : > { %v8864_v61 = vadd.f32 %v6116_v35, %v5980_v34  ;;  %v6119_v10 = vadd.f32 %v6118_v51, %v6117_v9 }
 0x3fb   : > { %v8866_v19 = vadd.f32 %v6119_v10, %v5983_v60 }
 0x3fc   : > { %v6008_v42 = vpop.f32.mrb[56].mxu0 }
 0x3fd   : > { %9292 = vst [vmem:[#allocation9_spill] sm:$0xff] %v8866_v19  ;;  %v6009_v21 = vpop.f32.mrb[57].mxu0  ;;  %v6120_v44 = vpop.f32.mrb[56].mxu1 }
 0x3fe   : > { %v8868_v33 = vadd.f32 %v6009_v21, %v6008_v42  ;;  %v6011_v46 = vpop.f32.mrb[58].mxu0  ;;  %v6121_v3 = vpop.f32.mrb[57].mxu1 }
 0x3ff   : > { %v6012_v39 = vpop.f32.mrb[59].mxu0  ;;  %v6122_v23 = vadd.f32 %v6121_v3, %v6120_v44  ;;  %v6123_v54 = vpop.f32.mrb[58].mxu1 }
 0x400   : > { %v8870_v48 = vadd.f32 %v6012_v39, %v6011_v46  ;;  %v6124_v16 = vpop.f32.mrb[59].mxu1 }
 0x401   : > { %v8872_v45 = vadd.f32 %v6122_v23, %v5986_v47  ;;  %v6125_v34 = vadd.f32 %v6124_v16, %v6123_v54 }
 0x403   : > { %v8874_v20 = vadd.f32 %v6125_v34, %v5989_v40 }
 0x404   : > { %v6014_v60 = vpop.f32.mrb[60].mxu0 }
 0x405   : > { %v6015_v57 = vpop.f32.mrb[61].mxu0  ;;  %v6126_v35 = vpop.f32.mrb[60].mxu1 }
 0x406   : > { %v8876_v9 = vadd.f32 %v6015_v57, %v6014_v60  ;;  %v6017_v51 = vpop.f32.mrb[62].mxu0  ;;  %v6127_v10 = vpop.f32.mrb[61].mxu1 }
 0x407   : > { %v6018_v42 = vpop.f32.mrb[63].mxu0  ;;  %v6128_v21 = vadd.f32 %v6127_v10, %v6126_v35  ;;  %v6129_v19 = vpop.f32.mrb[62].mxu1 }
 0x408   : > { %v8878_v44 = vadd.f32 %v6018_v42, %v6017_v51  ;;  %v6130_v46 = vpop.f32.mrb[63].mxu1 }
 0x409   : > { %v8880_v3 = vadd.f32 %v6128_v21, %v5992_v27  ;;  %v6131_v47 = vadd.f32 %v6130_v46, %v6129_v19 }
 0x40b   : > { %v8882_v39 = vadd.f32 %v6131_v47, %v5995_v22 }
 0x40c   : > { %v6478_v40 = vpop.f32.mrb[64].mxu0 }
 0x40d   : > { %v3562_v23 = vadd.f32 %v6478_v40, %v8772_v15  ;;  %v3553_v54 = vpop.f32.mrb[65].mxu0 }
 0x40e   : > { %v6132_v16 = vpop.f32.mrb[64].mxu1  ;;  %v3554_v34 = vadd.f32 %v8763_v26, %v3553_v54  ;;  %v6479_v60 = vpop.f32.mrb[66].mxu0 }
 0x40f   : > { %v8887_v57 = vadd.f32 %v8806_v29, %v3562_v23  ;;  %v6133_v35 = vpop.f32.mrb[65].mxu1  ;;  %v3565_v51 = vadd.f32 %v6479_v60, %v8774_v59  ;;  %v3556_v10 = vpop.f32.mrb[67].mxu0 }
 0x410   : > { %v8891_v27 = vadd.f32 %v8795_v18, %v3554_v34  ;;  %v6134_v22 = vadd.f32 %v6133_v35, %v6132_v16  ;;  %v6135_v19 = vpop.f32.mrb[66].mxu1  ;;  %v3557_v42 = vadd.f32 %v8767_v55, %v3556_v10 }
 0x411   : > { %v8895_v15 = vadd.f32 %v8811_v25, %v3565_v51  ;;  %v6136_v21 = vpop.f32.mrb[67].mxu1 }
 0x412   : > { %v8898_v26 = vadd.f32 %v6134_v22, %v8852_v49  ;;  %v8901_v29 = vadd.f32 %v8800_v53, %v3557_v42  ;;  %v6137_v46 = vadd.f32 %v6136_v21, %v6135_v19 }
 0x414   : > { %v8904_v59 = vadd.f32 %v6137_v46, %v8854_v63  ;;  %v6482_v18 = vpop.f32.mrb[68].mxu0 }
 0x415   : > { %v3578_v47 = vadd.f32 %v6482_v18, %v8786_v58  ;;  %v3569_v40 = vpop.f32.mrb[69].mxu0 }
 0x416   : > { %v6138_v23 = vpop.f32.mrb[68].mxu1  ;;  %v3570_v55 = vadd.f32 %v8779_v14, %v3569_v40  ;;  %v6483_v25 = vpop.f32.mrb[70].mxu0 }
 0x417   : > { %v8909_v54 = vadd.f32 %v8828_v6, %v3578_v47  ;;  %v6139_v49 = vpop.f32.mrb[69].mxu1  ;;  %v3581_v16 = vadd.f32 %v6483_v25, %v8788_v11  ;;  %v3572_v53 = vpop.f32.mrb[71].mxu0 }
 0x418   : > { %v8913_v34 = vadd.f32 %v8817_v0, %v3570_v55  ;;  %v6140_v63 = vadd.f32 %v6139_v49, %v6138_v23  ;;  %v6141_v60 = vpop.f32.mrb[70].mxu1  ;;  %v3573_v35 = vadd.f32 %v8781_v38, %v3572_v53 }
 0x419   : > { %v8917_v58 = vadd.f32 %v8833_v32, %v3581_v16  ;;  %v6142_v51 = vpop.f32.mrb[71].mxu1 }
 0x41a   : > { %v8920_v14 = vadd.f32 %v6140_v63, %v8860_v13  ;;  %v8923_v6 = vadd.f32 %v8822_v17, %v3573_v35  ;;  %v6143_v10 = vadd.f32 %v6142_v51, %v6141_v60 }
 0x41c   : > { %v8926_v11 = vadd.f32 %v6143_v10, %v8862_v50  ;;  %v6486_v0 = vpop.f32.mrb[72].mxu0 }
 0x41d   : > { %v3594_v22 = vadd.f32 %v6486_v0, %v8804_v52  ;;  %v3585_v19 = vpop.f32.mrb[73].mxu0 }
 0x41e   : > { %v6144_v42 = vpop.f32.mrb[72].mxu1  ;;  %v3586_v38 = vadd.f32 %v8793_v41, %v3585_v19  ;;  %v6487_v32 = vpop.f32.mrb[74].mxu0 }
 0x41f   : > { %v8931_v21 = vadd.f32 %v8840_v2, %v3594_v22  ;;  %v6145_v13 = vpop.f32.mrb[73].mxu1  ;;  %v3597_v46 = vadd.f32 %v6487_v32, %v8808_v12  ;;  %v3588_v17 = vpop.f32.mrb[75].mxu0 }
 0x420   : > { %v8935_v18 = vadd.f32 %v8836_v56, %v3586_v38  ;;  %v6146_v50 = vadd.f32 %v6145_v13, %v6144_v42  ;;  %v6147_v47 = vpop.f32.mrb[74].mxu1  ;;  %v3589_v40 = vadd.f32 %v8797_v7, %v3588_v17 }
 0x421   : > { %v8939_v52 = vadd.f32 %v8842_v24, %v3597_v46  ;;  %v6148_v23 = vpop.f32.mrb[75].mxu1 }
 0x422   : > { %v8942_v41 = vadd.f32 %v6146_v50, %v8868_v33  ;;  %v3894_v2 = vadd.f32 %v8838_v8, %v3589_v40  ;;  %v6149_v55 = vadd.f32 %v6148_v23, %v6147_v47 }
 0x424   : > { %v8946_v12 = vadd.f32 %v6149_v55, %v8870_v48  ;;  %v6490_v25 = vpop.f32.mrb[76].mxu0 }
 0x425   : > { %v3610_v56 = vadd.f32 %v6490_v25, %v8826_v37  ;;  %v3601_v49 = vpop.f32.mrb[77].mxu0 }
 0x426   : > { %v6150_v16 = vpop.f32.mrb[76].mxu1  ;;  %v3602_v7 = vadd.f32 %v8815_v28, %v3601_v49  ;;  %v6491_v53 = vpop.f32.mrb[78].mxu0 }
 0x427   : > { %v8951_v24 = vadd.f32 %v8848_v43, %v3610_v56  ;;  %v6151_v63 = vpop.f32.mrb[77].mxu1  ;;  %v3613_v33 = vadd.f32 %v6491_v53, %v8830_v31  ;;  %v3604_v60 = vpop.f32.mrb[79].mxu0 }
 0x428   : > { %v8955_v8 = vadd.f32 %v8844_v30, %v3602_v7  ;;  %v6152_v48 = vadd.f32 %v6151_v63, %v6150_v16  ;;  %v6153_v35 = vpop.f32.mrb[78].mxu1  ;;  %v3605_v51 = vadd.f32 %v8819_v62, %v3604_v60 }
 0x429   : > { %v8959_v37 = vadd.f32 %v8850_v5, %v3613_v33  ;;  %v6154_v10 = vpop.f32.mrb[79].mxu1 }
 0x42a   : > { %v8962_v28 = vadd.f32 %v6152_v48, %v8876_v9  ;;  %v3910_v43 = vadd.f32 %v8846_v36, %v3605_v51  ;;  %v6155_v0 = vadd.f32 %v6154_v10, %v6153_v35 }
 0x42c   : > { %v8966_v31 = vadd.f32 %v6155_v0, %v8878_v44  ;;  %v6196_v22 = vpop.f32.mrb[80].mxu0 }
 0x42d   : > { %v6197_v30 = vpop.f32.mrb[81].mxu0 }
 0x42e   : > { %v6198_v19 = vadd.f32 %v6197_v30, %v6196_v22  ;;  %v6199_v42 = vpop.f32.mrb[82].mxu0 }
 0x42f   : > { %v6200_v38 = vpop.f32.mrb[83].mxu0 }
 0x430   : > { %v6201_v32 = vadd.f32 %v6200_v38, %v6199_v42  ;;  %v8969_v62 = vadd.f32 %v6198_v19, %v8891_v27 }
 0x432   : > { %v8972_v5 = vadd.f32 %v6201_v32, %v8901_v29 }
 0x434   : > { %v6202_v9 = vpop.f32.mrb[84].mxu0 }
 0x435   : > { %v6203_v13 = vpop.f32.mrb[85].mxu0 }
 0x436   : > { %v6204_v46 = vadd.f32 %v6203_v13, %v6202_v9  ;;  %v6205_v36 = vpop.f32.mrb[86].mxu0 }
 0x437   : > { %v6206_v17 = vpop.f32.mrb[87].mxu0 }
 0x438   : > { %v6207_v50 = vadd.f32 %v6206_v17, %v6205_v36  ;;  %v6798_v44 = vadd.f32 %v6204_v46, %v8887_v57 }
 0x43a   : > { %v6806_v47 = vadd.f32 %v6207_v50, %v8895_v15 }
 0x43c   : > { %v6208_v40 = vpop.f32.mrb[88].mxu0 }
 0x43d   : > { %v6209_v23 = vpop.f32.mrb[89].mxu0 }
 0x43e   : > { %v6210_v55 = vadd.f32 %v6209_v23, %v6208_v40  ;;  %v6211_v25 = vpop.f32.mrb[90].mxu0 }
 0x43f   : > { %v6212_v56 = vpop.f32.mrb[91].mxu0 }
 0x440   : > { %v6213_v27 = vadd.f32 %v6212_v56, %v6211_v25  ;;  %v8977_v49 = vadd.f32 %v6210_v55, %v8913_v34 }
 0x442   : > { %v8980_v29 = vadd.f32 %v6213_v27, %v8923_v6 }
 0x444   : > { %v6214_v16 = vpop.f32.mrb[92].mxu0 }
 0x445   : > { %v6215_v7 = vpop.f32.mrb[93].mxu0 }
 0x446   : > { %v6216_v53 = vadd.f32 %v6215_v7, %v6214_v16  ;;  %v6217_v63 = vpop.f32.mrb[94].mxu0 }
 0x447   : > { %v6218_v33 = vpop.f32.mrb[95].mxu0 }
 0x448   : > { %v6219_v57 = vadd.f32 %v6218_v33, %v6217_v63  ;;  %v8983_v15 = vadd.f32 %v6216_v53, %v8909_v54 }
 0x44a   : > { %v8986_v60 = vadd.f32 %v6219_v57, %v8917_v58 }
 0x44c   : > { %v6220_v48 = vpop.f32.mrb[96].mxu0 }
 0x44d   : > { %v6221_v35 = vpop.f32.mrb[97].mxu0 }
 0x44e   : > { %v6222_v51 = vadd.f32 %v6221_v35, %v6220_v48  ;;  %v6223_v34 = vpop.f32.mrb[98].mxu0 }
 0x44f   : > { %v6224_v10 = vpop.f32.mrb[99].mxu0 }
 0x450   : > { %v6225_v0 = vadd.f32 %v6224_v10, %v6223_v34  ;;  %v8989_v6 = vadd.f32 %v6222_v51, %v8935_v18 }
 0x452   : > { %v8991_v22 = vadd.f32 %v6225_v0, %v3894_v2 }
 0x454   : > { %v6226_v30 = vpop.f32.mrb[100].mxu0 }
 0x455   : > { %v6227_v19 = vpop.f32.mrb[101].mxu0 }
 0x456   : > { %v6228_v42 = vadd.f32 %v6227_v19, %v6226_v30  ;;  %v6229_v38 = vpop.f32.mrb[102].mxu0 }
 0x457   : > { %v6230_v54 = vpop.f32.mrb[103].mxu0 }
 0x458   : > { %v6231_v32 = vadd.f32 %v6230_v54, %v6229_v38  ;;  %v8994_v58 = vadd.f32 %v6228_v42, %v8931_v21 }
 0x45a   : > { %v8997_v9 = vadd.f32 %v6231_v32, %v8939_v52 }
 0x45c   : > { %v6232_v13 = vpop.f32.mrb[104].mxu0 }
 0x45d   : > { %v6233_v46 = vpop.f32.mrb[105].mxu0 }
 0x45e   : > { %v6234_v36 = vadd.f32 %v6233_v46, %v6232_v13  ;;  %v6235_v17 = vpop.f32.mrb[106].mxu0 }
 0x45f   : > { %v6236_v18 = vpop.f32.mrb[107].mxu0 }
 0x460   : > { %v6237_v50 = vadd.f32 %v6236_v18, %v6235_v17  ;;  %v9000_v2 = vadd.f32 %v6234_v36, %v8955_v8 }
 0x462   : > { %v9002_v40 = vadd.f32 %v6237_v50, %v3910_v43 }
 0x464   : > { %v6238_v23 = vpop.f32.mrb[108].mxu0 }
 0x465   : > { %v6239_v55 = vpop.f32.mrb[109].mxu0 }
 0x466   : > { %v6240_v25 = vadd.f32 %v6239_v55, %v6238_v23  ;;  %v6241_v56 = vpop.f32.mrb[110].mxu0 }
 0x467   : > { %v6242_v21 = vpop.f32.mrb[111].mxu0 }
 0x468   : > { %v6243_v27 = vadd.f32 %v6242_v21, %v6241_v56  ;;  %v9005_v52 = vadd.f32 %v6240_v25, %v8951_v24 }
 0x46a   : > { %v9008_v16 = vadd.f32 %v6243_v27, %v8959_v37 }
 0x46c   : > { %v6244_v7 = vpop.f32.mrb[112].mxu0 }
 0x46d   : > { %v6245_v53 = vpop.f32.mrb[113].mxu0 }
 0x46e   : > { %v6574_v8 = vpop.f32.mrb[80].mxu1  ;;  %v6246_v43 = vadd.f32 %v6245_v53, %v6244_v7  ;;  %v6247_v63 = vpop.f32.mrb[114].mxu0 }
 0x46f   : > { %v6799_v33 = vadd.f32 %v6798_v44, %v6574_v8  ;;  %v4678_v57 = vpop.f32.mrb[81].mxu1  ;;  %v6248_v48 = vpop.f32.mrb[115].mxu0 }
 0x470   : > { %v6803_v35 = vadd.f32 %v8969_v62, %v4678_v57  ;;  %v6575_v51 = vpop.f32.mrb[82].mxu1  ;;  %v6249_v34 = vadd.f32 %v6248_v48, %v6247_v63  ;;  %v9012_v24 = vadd.f32 %v8856_v4, %v6246_v43  ;;  %v9293_v43 = vld [vmem:[#allocation9_spill] sm:$0xff] }
 0x471   : > { %4839 = vst [vmem:[%s8295_s20 + $0x10] sm:$0xff] %v6799_v33  ;;  %v6807_v37 = vadd.f32 %v6806_v47, %v6575_v51  ;;  %v4681_v10 = vpop.f32.mrb[83].mxu1  ;;  %v4912_v54 = vmul.f32 %v6799_v33, %v6799_v33 }
 0x472   : > { %4837 = vst [vmem:[%s8295_s20] sm:$0xff] %v6803_v35  ;;  %v6811_v0 = vadd.f32 %v8972_v5, %v4681_v10  ;;  %v9018_v30 = vadd.f32 %v8858_v1, %v6249_v34  ;;  %v4910_v44 = vmul.f32 %v6803_v35, %v6803_v35 }
 0x473   : > { %4840 = vst [vmem:[%s8295_s20 + $0x18] sm:$0xff] %v6807_v37  ;;  %v4913_v36 = vmul.f32 %v6807_v37, %v6807_v37 }
 0x474   : > { %4838 = vst [vmem:[%s8295_s20 + $0x8] sm:$0xff] %v6811_v0  ;;  %v4870_v19 = vadd.f32 %v6811_v0, %v6803_v35  ;;  %v4911_v42 = vmul.f32 %v6811_v0, %v6811_v0  ;;  %v6250_v62 = vpop.f32.mrb[116].mxu0 }
 0x475   : > { %v6251_v38 = vpop.f32.mrb[117].mxu0 }
 0x476   : > { %v4871_v4 = vadd.f32 %v6799_v33, %v4870_v19  ;;  %v4942_v32 = vadd.f32 %v4911_v42, %v4910_v44  ;;  %v6578_v13 = vpop.f32.mrb[84].mxu1  ;;  %v6252_v47 = vadd.f32 %v6251_v38, %v6250_v62  ;;  %v6253_v46 = vpop.f32.mrb[118].mxu0 }
 0x477   : > { %v6815_v5 = vadd.f32 %v8983_v15, %v6578_v13  ;;  %v4694_v1 = vpop.f32.mrb[85].mxu1  ;;  %v6254_v17 = vpop.f32.mrb[119].mxu0 }
 0x478   : > { %v4943_v18 = vadd.f32 %v4942_v32, %v4912_v54  ;;  %v6819_v50 = vadd.f32 %v8977_v49, %v4694_v1  ;;  %v4872_v23 = vadd.f32 %v6807_v37, %v4871_v4  ;;  %v6579_v55 = vpop.f32.mrb[86].mxu1  ;;  %v6255_v25 = vadd.f32 %v6254_v17, %v6253_v46 }
 0x479   : > { %4843 = vst [vmem:[%s8295_s20 + $0x30] sm:$0xff] %v6815_v5  ;;  %v6823_v56 = vadd.f32 %v8986_v60, %v6579_v55  ;;  %v4697_v21 = vpop.f32.mrb[87].mxu1  ;;  %v9027_v27 = vadd.f32 %v8864_v61, %v6252_v47  ;;  %v4916_v35 = vmul.f32 %v6815_v5, %v6815_v5 }
 0x47a   : > { %4841 = vst [vmem:[%s8295_s20 + $0x20] sm:$0xff] %v6819_v50  ;;  %v4873_v7 = vadd.f32 %v6819_v50, %v4872_v23  ;;  %v4914_v15 = vmul.f32 %v6819_v50, %v6819_v50  ;;  %v4944_v53 = vadd.f32 %v4943_v18, %v4913_v36  ;;  %v6827_v8 = vadd.f32 %v8980_v29, %v4697_v21 }
 0x47b   : > { %4844 = vst [vmem:[%s8295_s20 + $0x38] sm:$0xff] %v6823_v56  ;;  %v9033_v49 = vadd.f32 %v9293_v43, %v6255_v25  ;;  %v4917_v0 = vmul.f32 %v6823_v56, %v6823_v56 }
 0x47c   : > { %v4945_v63 = vadd.f32 %v4944_v53, %v4914_v15  ;;  %4842 = vst [vmem:[%s8295_s20 + $0x28] sm:$0xff] %v6827_v8  ;;  %v4874_v33 = vadd.f32 %v6827_v8, %v4873_v7  ;;  %v4915_v57 = vmul.f32 %v6827_v8, %v6827_v8  ;;  %v6256_v48 = vpop.f32.mrb[120].mxu0 }
 0x47d   : > { %v6257_v60 = vpop.f32.mrb[121].mxu0 }
 0x47e   : > { %v4875_v61 = vadd.f32 %v6815_v5, %v4874_v33  ;;  %v4946_v51 = vadd.f32 %v4945_v63, %v4915_v57  ;;  %v6582_v34 = vpop.f32.mrb[88].mxu1  ;;  %v6258_v37 = vadd.f32 %v6257_v60, %v6256_v48  ;;  %v6259_v10 = vpop.f32.mrb[122].mxu0 }
 0x47f   : > { %v6831_v29 = vadd.f32 %v8994_v58, %v6582_v34  ;;  %v4710_v44 = vpop.f32.mrb[89].mxu1  ;;  %v6260_v19 = vpop.f32.mrb[123].mxu0 }
 0x480   : > { %v4947_v42 = vadd.f32 %v4946_v51, %v4916_v35  ;;  %v6835_v62 = vadd.f32 %v8989_v6, %v4710_v44  ;;  %v4876_v38 = vadd.f32 %v6823_v56, %v4875_v61  ;;  %v6583_v54 = vpop.f32.mrb[90].mxu1  ;;  %v6261_v4 = vadd.f32 %v6260_v19, %v6259_v10 }
 0x481   : > { %4847 = vst [vmem:[%s8295_s20 + $0x50] sm:$0xff] %v6831_v29  ;;  %v6839_v32 = vadd.f32 %v8997_v9, %v6583_v54  ;;  %v4713_v13 = vpop.f32.mrb[91].mxu1  ;;  %v9041_v47 = vadd.f32 %v8872_v45, %v6258_v37  ;;  %v4920_v23 = vmul.f32 %v6831_v29, %v6831_v29 }
 0x482   : > { %4845 = vst [vmem:[%s8295_s20 + $0x40] sm:$0xff] %v6835_v62  ;;  %v4877_v46 = vadd.f32 %v6835_v62, %v4876_v38  ;;  %v4918_v58 = vmul.f32 %v6835_v62, %v6835_v62  ;;  %v4948_v36 = vadd.f32 %v4947_v42, %v4917_v0  ;;  %v6843_v5 = vadd.f32 %v8991_v22, %v4713_v13 }
 0x483   : > { %4848 = vst [vmem:[%s8295_s20 + $0x58] sm:$0xff] %v6839_v32  ;;  %v9047_v6 = vadd.f32 %v8874_v20, %v6261_v4  ;;  %v4921_v7 = vmul.f32 %v6839_v32, %v6839_v32 }
 0x484   : > { %v4949_v1 = vadd.f32 %v4948_v36, %v4918_v58  ;;  %4846 = vst [vmem:[%s8295_s20 + $0x48] sm:$0xff] %v6843_v5  ;;  %v4878_v17 = vadd.f32 %v6843_v5, %v4877_v46  ;;  %v4919_v18 = vmul.f32 %v6843_v5, %v6843_v5  ;;  %v6262_v50 = vpop.f32.mrb[124].mxu0 }
 0x485   : > { %v6263_v9 = vpop.f32.mrb[125].mxu0 }
 0x486   : > { %v4879_v45 = vadd.f32 %v6831_v29, %v4878_v17  ;;  %v4950_v55 = vadd.f32 %v4949_v1, %v4919_v18  ;;  %v6586_v25 = vpop.f32.mrb[92].mxu1  ;;  %v6264_v56 = vadd.f32 %v6263_v9, %v6262_v50  ;;  %v6265_v21 = vpop.f32.mrb[126].mxu0 }
 0x487   : > { %v6847_v22 = vadd.f32 %v9005_v52, %v6586_v25  ;;  %v4726_v15 = vpop.f32.mrb[93].mxu1  ;;  %v6266_v20 = vpop.f32.mrb[127].mxu0 }
 0x488   : > { %v4951_v53 = vadd.f32 %v4950_v55, %v4920_v23  ;;  %v6851_v8 = vadd.f32 %v9000_v2, %v4726_v15  ;;  %v4880_v43 = vadd.f32 %v6839_v32, %v4879_v45  ;;  %v6587_v63 = vpop.f32.mrb[94].mxu1  ;;  %v6267_v33 = vadd.f32 %v6266_v20, %v6265_v21 }
 0x489   : > { %4851 = vst [vmem:[%s8295_s20 + $0x70] sm:$0xff] %v6847_v22  ;;  %v6855_v57 = vadd.f32 %v9008_v16, %v6587_v63  ;;  %v4729_v48 = vpop.f32.mrb[95].mxu1  ;;  %v6873_v60 = vadd.f32 %v8880_v3, %v6264_v56  ;;  %v4924_v16 = vmul.f32 %v6847_v22, %v6847_v22 }
 0x48a   : > { %4849 = vst [vmem:[%s8295_s20 + $0x60] sm:$0xff] %v6851_v8  ;;  %v4881_v35 = vadd.f32 %v6851_v8, %v4880_v43  ;;  %v4922_v61 = vmul.f32 %v6851_v8, %v6851_v8  ;;  %v4952_v52 = vadd.f32 %v4951_v53, %v4921_v7  ;;  %v6859_v51 = vadd.f32 %v9002_v40, %v4729_v48 }
 0x48b   : > { %4852 = vst [vmem:[%s8295_s20 + $0x78] sm:$0xff] %v6855_v57  ;;  %v6879_v34 = vadd.f32 %v8882_v39, %v6267_v33  ;;  %v4925_v38 = vmul.f32 %v6855_v57, %v6855_v57 }
 0x48c   : > { %v4953_v2 = vadd.f32 %v4952_v52, %v4922_v61  ;;  %4850 = vst [vmem:[%s8295_s20 + $0x68] sm:$0xff] %v6859_v51  ;;  %v4882_v37 = vadd.f32 %v6859_v51, %v4881_v35  ;;  %v4923_v10 = vmul.f32 %v6859_v51, %v6859_v51  ;;  %v6268_v0 = vpop.f32.mrb[128].mxu0 }
 0x48d   : > { %v6269_v29 = vpop.f32.mrb[129].mxu0 }
 0x48e   : > { %v4883_v44 = vadd.f32 %v6847_v22, %v4882_v37  ;;  %v4954_v19 = vadd.f32 %v4953_v2, %v4923_v10  ;;  %v6590_v3 = vpop.f32.mrb[0].mxu1  ;;  %v6270_v42 = vadd.f32 %v6269_v29, %v6268_v0  ;;  %v6271_v62 = vpop.f32.mrb[130].mxu0 }
 0x48f   : > { %v6862_v40 = vadd.f32 %v9027_v27, %v6590_v3  ;;  %v4742_v54 = vpop.f32.mrb[1].mxu1  ;;  %v6272_v39 = vpop.f32.mrb[131].mxu0 }
 0x490   : > { %v4955_v4 = vadd.f32 %v4954_v19, %v4924_v16  ;;  %v6865_v32 = vadd.f32 %v9012_v24, %v4742_v54  ;;  %v4884_v13 = vadd.f32 %v6855_v57, %v4883_v44  ;;  %v6591_v46 = vpop.f32.mrb[2].mxu1  ;;  %v6273_v58 = vadd.f32 %v6272_v39, %v6271_v62 }
 0x491   : > { %4855 = vst [vmem:[%s8295_s20 + $0x90] sm:$0xff] %v6862_v40  ;;  %v6868_v36 = vadd.f32 %v9033_v49, %v6591_v46  ;;  %v4745_v5 = vpop.f32.mrb[3].mxu1  ;;  %v6888_v1 = vadd.f32 %v8898_v26, %v6270_v42  ;;  %v4928_v49 = vmul.f32 %v6862_v40, %v6862_v40 }
 0x492   : > { %4853 = vst [vmem:[%s8295_s20 + $0x80] sm:$0xff] %v6865_v32  ;;  %v4885_v17 = vadd.f32 %v6865_v32, %v4884_v13  ;;  %v4926_v18 = vmul.f32 %v6865_v32, %v6865_v32  ;;  %v4956_v27 = vadd.f32 %v4955_v4, %v4925_v38  ;;  %v6871_v50 = vadd.f32 %v9018_v30, %v4745_v5 }
 0x493   : > { %4856 = vst [vmem:[%s8295_s20 + $0x98] sm:$0xff] %v6868_v36  ;;  %v6894_v9 = vadd.f32 %v8904_v59, %v6273_v58  ;;  %v4929_v15 = vmul.f32 %v6868_v36, %v6868_v36 }
 0x494   : > { %v4957_v24 = vadd.f32 %v4956_v27, %v4926_v18  ;;  %4854 = vst [vmem:[%s8295_s20 + $0x88] sm:$0xff] %v6871_v50  ;;  %v4886_v23 = vadd.f32 %v6871_v50, %v4885_v17  ;;  %v4927_v45 = vmul.f32 %v6871_v50, %v6871_v50  ;;  %v6274_v55 = vpop.f32.mrb[132].mxu0 }
 0x495   : > { %v6275_v25 = vpop.f32.mrb[133].mxu0 }
 0x496   : > { %v4887_v56 = vadd.f32 %v6862_v40, %v4886_v23  ;;  %v4958_v21 = vadd.f32 %v4957_v24, %v4927_v45  ;;  %v6594_v26 = vpop.f32.mrb[4].mxu1  ;;  %v6276_v7 = vadd.f32 %v6275_v25, %v6274_v55  ;;  %v6277_v22 = vpop.f32.mrb[134].mxu0 }
 0x497   : > { %v6874_v20 = vadd.f32 %v6873_v60, %v6594_v26  ;;  %v4758_v30 = vpop.f32.mrb[5].mxu1  ;;  %v6278_v53 = vpop.f32.mrb[135].mxu0 }
 0x498   : > { %v4959_v59 = vadd.f32 %v4958_v21, %v4928_v49  ;;  %v6877_v8 = vadd.f32 %v9041_v47, %v4758_v30  ;;  %v4888_v43 = vadd.f32 %v6868_v36, %v4887_v56  ;;  %v6595_v63 = vpop.f32.mrb[6].mxu1  ;;  %v6279_v33 = vadd.f32 %v6278_v53, %v6277_v22 }
 0x499   : > { %4859 = vst [vmem:[%s8295_s20 + $0xb0] sm:$0xff] %v6874_v20  ;;  %v6880_v57 = vadd.f32 %v6879_v34, %v6595_v63  ;;  %v4761_v48 = vpop.f32.mrb[7].mxu1  ;;  %v6885_v35 = vadd.f32 %v8920_v14, %v6276_v7  ;;  %v4932_v34 = vmul.f32 %v6874_v20, %v6874_v20 }
 0x49a   : > { %4857 = vst [vmem:[%s8295_s20 + $0xa0] sm:$0xff] %v6877_v8  ;;  %v4889_v61 = vadd.f32 %v6877_v8, %v4888_v43  ;;  %v4930_v52 = vmul.f32 %v6877_v8, %v6877_v8  ;;  %v4960_v51 = vadd.f32 %v4959_v59, %v4929_v15  ;;  %v6883_v60 = vadd.f32 %v9047_v6, %v4761_v48 }
 0x49b   : > { %4860 = vst [vmem:[%s8295_s20 + $0xb8] sm:$0xff] %v6880_v57  ;;  %v6891_v2 = vadd.f32 %v8926_v11, %v6279_v33  ;;  %v4933_v42 = vmul.f32 %v6880_v57, %v6880_v57 }
 0x49c   : > { %v4961_v37 = vadd.f32 %v4960_v51, %v4930_v52  ;;  %4858 = vst [vmem:[%s8295_s20 + $0xa8] sm:$0xff] %v6883_v60  ;;  %v4890_v47 = vadd.f32 %v6883_v60, %v4889_v61  ;;  %v4931_v10 = vmul.f32 %v6883_v60, %v6883_v60  ;;  %v6280_v0 = vpop.f32.mrb[136].mxu0 }
 0x49d   : > { %v6281_v29 = vpop.f32.mrb[137].mxu0 }
 0x49e   : > { %v4891_v16 = vadd.f32 %v6874_v20, %v4890_v47  ;;  %v4962_v44 = vadd.f32 %v4961_v37, %v4931_v10  ;;  %v6598_v14 = vpop.f32.mrb[8].mxu1  ;;  %v6282_v19 = vadd.f32 %v6281_v29, %v6280_v0  ;;  %v6283_v3 = vpop.f32.mrb[138].mxu0 }
 0x49f   : > { %v6886_v62 = vadd.f32 %v6885_v35, %v6598_v14  ;;  %v4774_v6 = vpop.f32.mrb[9].mxu1  ;;  %v6284_v38 = vpop.f32.mrb[139].mxu0 }
 0x4a0   : > { %v4963_v11 = vadd.f32 %v4962_v44, %v4932_v34  ;;  %v6889_v40 = vadd.f32 %v6888_v1, %v4774_v6  ;;  %v4892_v54 = vadd.f32 %v6880_v57, %v4891_v16  ;;  %v6599_v39 = vpop.f32.mrb[10].mxu1  ;;  %v6285_v4 = vadd.f32 %v6284_v38, %v6283_v3  ;;  %v4909_v38 = vld [vmem:[#allocation5] sm:$0x1] }
 0x4a1   : > { %4863 = vst [vmem:[%s8295_s20 + $0xd0] sm:$0xff] %v6886_v62  ;;  %v6892_v32 = vadd.f32 %v6891_v2, %v6599_v39  ;;  %v4777_v13 = vpop.f32.mrb[11].mxu1  ;;  %v6900_v46 = vadd.f32 %v8942_v41, %v6282_v19  ;;  %v4936_v45 = vmul.f32 %v6886_v62, %v6886_v62 }
 0x4a2   : > { %4861 = vst [vmem:[%s8295_s20 + $0xc0] sm:$0xff] %v6889_v40  ;;  %v4893_v58 = vadd.f32 %v6889_v40, %v4892_v54  ;;  %v4934_v36 = vmul.f32 %v6889_v40, %v6889_v40  ;;  %v4964_v5 = vadd.f32 %v4963_v11, %v4933_v42  ;;  %v6895_v17 = vadd.f32 %v6894_v9, %v4777_v13  ;;  %v4869_v42 = vld [vmem:[#allocation4] sm:$0x1] }
 0x4a3   : > { %4864 = vst [vmem:[%s8295_s20 + $0xd8] sm:$0xff] %v6892_v32  ;;  %v6906_v18 = vadd.f32 %v8946_v12, %v6285_v4  ;;  %v4937_v21 = vmul.f32 %v6892_v32, %v6892_v32 }
 0x4a4   : > { %v4965_v27 = vadd.f32 %v4964_v5, %v4934_v36  ;;  %4862 = vst [vmem:[%s8295_s20 + $0xc8] sm:$0xff] %v6895_v17  ;;  %v4894_v1 = vadd.f32 %v6895_v17, %v4893_v58  ;;  %v4935_v50 = vmul.f32 %v6895_v17, %v6895_v17  ;;  %v6286_v24 = vpop.f32.mrb[140].mxu0 }
 0x4a5   : > { %v6287_v23 = vpop.f32.mrb[141].mxu0 }
 0x4a6   : > { %v4895_v55 = vadd.f32 %v6886_v62, %v4894_v1  ;;  %v4966_v25 = vadd.f32 %v4965_v27, %v4935_v50  ;;  %v6602_v49 = vpop.f32.mrb[12].mxu1  ;;  %v6288_v41 = vadd.f32 %v6287_v23, %v6286_v24  ;;  %v6289_v56 = vpop.f32.mrb[142].mxu0 }
 0x4a7   : > { %v4790_v26 = vpop.f32.mrb[13].mxu1  ;;  %v6290_v9 = vpop.f32.mrb[143].mxu0 }
 0x4a8   : > { %v4967_v7 = vadd.f32 %v4966_v25, %v4936_v45  ;;  %v6897_v12 = vadd.f32 %v8962_v28, %v6288_v41  ;;  %v6901_v22 = vadd.f32 %v6900_v46, %v4790_v26  ;;  %v4896_v15 = vadd.f32 %v6892_v32, %v4895_v55  ;;  %v6603_v20 = vpop.f32.mrb[14].mxu1 }
 0x4a9   : > { %v6291_v30 = vadd.f32 %v6290_v9, %v6289_v56  ;;  %v4793_v53 = vpop.f32.mrb[15].mxu1 }
 0x4aa   : > { %v6898_v59 = vadd.f32 %v6897_v12, %v6602_v49  ;;  %4865 = vst [vmem:[%s8295_s20 + $0xe0] sm:$0xff] %v6901_v22  ;;  %v4897_v8 = vadd.f32 %v6901_v22, %v4896_v15  ;;  %v4938_v43 = vmul.f32 %v6901_v22, %v6901_v22  ;;  %v4968_v63 = vadd.f32 %v4967_v7, %v4937_v21 }
 0x4ab   : > { %v6903_v33 = vadd.f32 %v8966_v31, %v6291_v30  ;;  %v6907_v57 = vadd.f32 %v6906_v18, %v4793_v53 }
 0x4ac   : > { %4867 = vst [vmem:[%s8295_s20 + $0xf0] sm:$0xff] %v6898_v59  ;;  %v4969_v48 = vadd.f32 %v4968_v63, %v4938_v43  ;;  %v4940_v35 = vmul.f32 %v6898_v59, %v6898_v59 }
 0x4ad   : > { %v6904_v61 = vadd.f32 %v6903_v33, %v6603_v20  ;;  %4866 = vst [vmem:[%s8295_s20 + $0xe8] sm:$0xff] %v6907_v57  ;;  %v4898_v28 = vadd.f32 %v6907_v57, %v4897_v8  ;;  %v4939_v52 = vmul.f32 %v6907_v57, %v6907_v57 }
 0x4af   : > { %4868 = vst [vmem:[%s8295_s20 + $0xf8] sm:$0xff] %v6904_v61  ;;  %v4941_v51 = vmul.f32 %v6904_v61, %v6904_v61  ;;  %v4899_v60 = vadd.f32 %v6898_v59, %v4898_v28  ;;  %v4970_v2 = vadd.f32 %v4969_v48, %v4939_v52 }
 0x4b1   : > { %v4900_v37 = vadd.f32 %v6904_v61, %v4899_v60  ;;  %v4971_v47 = vadd.f32 %v4970_v2, %v4940_v35 }
 0x4b3   : > { %v4901_v10 = vrot.slane %v4900_v37, 4  ;;  %v4972_v0 = vadd.f32 %v4971_v47, %v4941_v51 }
 0x4b5   : > { %v4902_v29 = vadd.f32 %v4901_v10, %v4900_v37  ;;  %v4973_v34 = vrot.slane %v4972_v0, 4 }
 0x4b7   : > { %v4903_v16 = vrot.slane %v4902_v29, 2  ;;  %v4974_v31 = vadd.f32 %v4973_v34, %v4972_v0 }
 0x4b9   : > { %v4904_v44 = vadd.f32 %v4903_v16, %v4902_v29  ;;  %v4975_v14 = vrot.slane %v4974_v31, 2 }
 0x4bb   : > { %v4905_v19 = vrot.slane %v4904_v44, 1  ;;  %v4976_v3 = vadd.f32 %v4975_v14, %v4974_v31 }
 0x4bd   : > { %v4906_v62 = vadd.f32 %v4905_v19, %v4904_v44  ;;  %v4977_v6 = vrot.slane %v4976_v3, 1 }
 0x4bf   : > { %v4907_v11 = vadd.f32 %v4906_v62, %v4869_v42  ;;  %v4978_v40 = vadd.f32 %v4977_v6, %v4976_v3 }
 0x4c1   : > { %4908 = vst [vmem:[#allocation4] sm:$0x1] %v4907_v11  ;;  %v4979_v54 = vadd.f32 %v4978_v40, %v4909_v38 }
 0x4c3   : > { %4980 = vst [vmem:[#allocation5] sm:$0x1] %v4979_v54 }
 0x4c4 PF: > { %p4981_p1 = scmp.eq.s32.totalorder %s7172_s25, 2 }
 0x4c6   : > { %p4982_p2 = pnand %p4981_p1, %p327_p9 }
 0x4c7   : > { %v4993_v17 = vld [vmem:[%s9287_s5] sm:$0x1] (!%p4982_p2) }
 0x4c8   : > { %4985 = sbr.rel (%p4982_p2) target bundleno = 1253 (0x4e5), region = 68  ;;  %v4986_v39 = vld [vmem:[#allocation4] sm:$0x1] (!%p4982_p2) }
 0x4c9   : > { %v4987_v32 = vmul.f32 (!%p4982_p2), 0.001953125, %v4986_v39  ;;  %v4998_v1 = vld [vmem:[%s9288_s6] sm:$0x1] (!%p4982_p2) }
 0x4ca   : > { %v4988_v4 = vld [vmem:[#allocation5] sm:$0x1] (!%p4982_p2) }
 0x4cb   : > { %v4989_v13 = vmul.f32 (!%p4982_p2), 0.001953125, %v4988_v4  ;;  %v4990_v46 = vmul.f32 (!%p4982_p2), %v4987_v32, %v4987_v32 }
 0x4cd   : > { %v4991_v58 = vsub.f32 (!%p4982_p2), %v4989_v13, %v4990_v46 }
 0x4cf   : > { %v4992_v36 = vmax.f32 %v4991_v58, 0.0 }
 0x4d1   : > { %v4994_v5 = vadd.f32 1e-05, %v4992_v36 }
 0x4d3   : > { %7144 = vrsqrt.f32 %v4994_v5 }
 0x4dd   : > { %v7145_v18 = vpop.eup %7144 }
 0x4de   : > { %v4996_v27 = vmul.f32 %v7145_v18, %v4993_v17 }
 0x4e0   : > { %4997 = vst [vmem:[#allocation6] sm:$0x1] %v4996_v27  ;;  %v4999_v50 = vmul.f32 %v4996_v27, %v4987_v32 }
 0x4e2   : > { %v5000_v24 = vsub.f32 %v4998_v1, %v4999_v50 }
 0x4e4   : > { %5001 = vst [vmem:[#allocation7] sm:$0x1] %v5000_v24 }
 0x4e5 PF: > { %p5492_p3 = scmp.ne.s32.totalorder %s7172_s25, 2 }
 0x4e6   : > { %s5493_s16 = sshll.u32 (!%p5492_p3), %s7168_s24, 8  ;;  %v5117_v25 = vld [vmem:[%s7275_s14] sm:$0xff] (!%p5492_p3)  ;;  %v5118_v26 = vld [vmem:[%s7275_s14 + $0x8] sm:$0xff] (!%p5492_p3)  ;;  %v5119_v22 = vld [vmem:[%s7275_s14 + $0x10] sm:$0xff] (!%p5492_p3) }
 0x4e7   : > { %5004 = sbr.rel (%p5492_p3) target bundleno = 1295 (0x50f), region = 72  ;;  %v9101_v23 = vld [vmem:[#allocation6] ss:$0 sm:$0xff] (!%p5492_p3)  ;;  %s9105_s17 = scalar_lea.vmem (!%p5492_p3), [#allocation3], %s5493_s16  ;;  %v5120_v63 = vld [vmem:[%s7275_s14 + $0x18] sm:$0xff] (!%p5492_p3)  ;;  %v5122_v28 = vld [vmem:[%s7275_s14 + $0x28] sm:$0xff] (!%p5492_p3) }
 0x4e8   : > { %v5007_v55 = vld [vmem:[%s9105_s17] sm:$0xff] (!%p5492_p3)  ;;  %v5008_v49 = vld [vmem:[%s9105_s17 + $0x8] sm:$0xff] (!%p5492_p3)  ;;  %v5009_v41 = vld [vmem:[%s9105_s17 + $0x10] sm:$0xff] (!%p5492_p3) }
 0x4e9   : > { %v5046_v56 = vmul.f32 (!%p5492_p3), %v9101_v23, %v5007_v55  ;;  %v5047_v21 = vmul.f32 (!%p5492_p3), %v9101_v23, %v5008_v49  ;;  %v5048_v9 = vmul.f32 (!%p5492_p3), %v9101_v23, %v5009_v41  ;;  %v5010_v7 = vld [vmem:[%s9105_s17 + $0x18] sm:$0xff] (!%p5492_p3)  ;;  %v5011_v12 = vld [vmem:[%s9105_s17 + $0x20] sm:$0xff] (!%p5492_p3)  ;;  %v5012_v30 = vld [vmem:[%s9105_s17 + $0x28] sm:$0xff] (!%p5492_p3) }
 0x4ea   : > { %v5049_v15 = vmul.f32 (!%p5492_p3), %v9101_v23, %v5010_v7  ;;  %v5050_v20 = vmul.f32 (!%p5492_p3), %v9101_v23, %v5011_v12  ;;  %v5013_v53 = vld [vmem:[%s9105_s17 + $0x30] sm:$0xff] (!%p5492_p3)  ;;  %v5121_v33 = vld [vmem:[%s7275_s14 + $0x20] sm:$0xff] (!%p5492_p3)  ;;  %v5051_v57 = vmul.f32 (!%p5492_p3), %v9101_v23, %v5012_v30  ;;  %v5014_v48 = vld [vmem:[%s9105_s17 + $0x38] sm:$0xff] (!%p5492_p3) }
 0x4eb   : > { %v9103_v45 = vld [vmem:[#allocation7] ss:$0 sm:$0xff] (!%p5492_p3)  ;;  %v5052_v52 = vmul.f32 (!%p5492_p3), %v9101_v23, %v5013_v53  ;;  %v5053_v51 = vmul.f32 (!%p5492_p3), %v9101_v23, %v5014_v48  ;;  %v5123_v10 = vld [vmem:[%s7275_s14 + $0x30] sm:$0xff] (!%p5492_p3)  ;;  %v5124_v0 = vld [vmem:[%s7275_s14 + $0x38] sm:$0xff] (!%p5492_p3) }
 0x4ec   : > { %v5085_v59 = vadd.f32 (!%p5492_p3), %v9103_v45, %v5046_v56  ;;  %v5086_v8 = vadd.f32 (!%p5492_p3), %v9103_v45, %v5047_v21  ;;  %v5087_v43 = vadd.f32 (!%p5492_p3), %v9103_v45, %v5048_v9  ;;  %v5088_v35 = vadd.f32 (!%p5492_p3), %v9103_v45, %v5049_v15  ;;  %v5015_v44 = vld [vmem:[%s9105_s17 + $0x40] sm:$0xff] (!%p5492_p3)  ;;  %v5016_v14 = vld [vmem:[%s9105_s17 + $0x48] sm:$0xff] (!%p5492_p3)  ;;  %v5017_v19 = vld [vmem:[%s9105_s17 + $0x50] sm:$0xff] (!%p5492_p3) }
 0x4ed   : > { %v5089_v61 = vadd.f32 (!%p5492_p3), %v9103_v45, %v5050_v20  ;;  %v5090_v47 = vadd.f32 (!%p5492_p3), %v9103_v45, %v5051_v57  ;;  %v5091_v16 = vadd.f32 (!%p5492_p3), %v9103_v45, %v5052_v52  ;;  %v5092_v31 = vadd.f32 (!%p5492_p3), %v9103_v45, %v5053_v51  ;;  %v5018_v38 = vld [vmem:[%s9105_s17 + $0x58] sm:$0xff] (!%p5492_p3)  ;;  %v5019_v11 = vld [vmem:[%s9105_s17 + $0x60] sm:$0xff] (!%p5492_p3)  ;;  %v5020_v32 = vld [vmem:[%s9105_s17 + $0x68] sm:$0xff] (!%p5492_p3) }
 0x4ee   : > { %v5149_v60 = vadd.f32 %v5117_v25, %v5085_v59  ;;  %v5150_v2 = vadd.f32 %v5118_v26, %v5086_v8  ;;  %v5151_v37 = vadd.f32 %v5119_v22, %v5087_v43  ;;  %v5152_v29 = vadd.f32 %v5120_v63, %v5088_v35  ;;  %v5021_v5 = vld [vmem:[%s9105_s17 + $0x70] sm:$0xff]  ;;  %v5022_v17 = vld [vmem:[%s9105_s17 + $0x78] sm:$0xff]  ;;  %v5125_v1 = vld [vmem:[%s7275_s14 + $0x40] sm:$0xff] }
 0x4ef   : > { %v5153_v34 = vadd.f32 %v5121_v33, %v5089_v61  ;;  %v5154_v6 = vadd.f32 %v5122_v28, %v5090_v47  ;;  %v5155_v39 = vadd.f32 %v5123_v10, %v5091_v16  ;;  %v5156_v4 = vadd.f32 %v5124_v0, %v5092_v31  ;;  %v5126_v50 = vld [vmem:[%s7275_s14 + $0x48] sm:$0xff]  ;;  %v5127_v24 = vld [vmem:[%s7275_s14 + $0x50] sm:$0xff]  ;;  %v5128_v21 = vld [vmem:[%s7275_s14 + $0x58] sm:$0xff] }
 0x4f0   : > { %v5181_v3 = vmax.f32 %v5149_v60, 0.0  ;;  %v5182_v42 = vmax.f32 %v5150_v2, 0.0  ;;  %v5183_v62 = vmax.f32 %v5151_v37, 0.0  ;;  %v5184_v40 = vmax.f32 %v5152_v29, 0.0  ;;  %v5129_v26 = vld [vmem:[%s7275_s14 + $0x60] sm:$0xff]  ;;  %v5130_v22 = vld [vmem:[%s7275_s14 + $0x68] sm:$0xff] }
 0x4f1   : > { %v5185_v54 = vmax.f32 %v5153_v34, 0.0  ;;  %v5186_v13 = vmax.f32 %v5154_v6, 0.0  ;;  %v5054_v46 = vmul.f32 %v9101_v23, %v5015_v44  ;;  %v5055_v58 = vmul.f32 %v9101_v23, %v5016_v14  ;;  %v5131_v43 = vld [vmem:[%s7275_s14 + $0x70] sm:$0xff]  ;;  %v5132_v63 = vld [vmem:[%s7275_s14 + $0x78] sm:$0xff]  ;;  %v5023_v61 = vld [vmem:[%s9105_s17 + $0x80] sm:$0xff] }
 0x4f2   : > { %5213 = vst [vmem:[%s7280_s18] sm:$0xff] %v5181_v3  ;;  %5214 = vst [vmem:[%s7280_s18 + $0x8] sm:$0xff] %v5182_v42  ;;  %v5056_v36 = vmul.f32 %v9101_v23, %v5017_v19  ;;  %v5187_v18 = vmax.f32 %v5155_v39, 0.0  ;;  %v5188_v27 = vmax.f32 %v5156_v4, 0.0  ;;  %v5057_v55 = vmul.f32 %v9101_v23, %v5018_v38  ;;  %v5024_v28 = vld [vmem:[%s9105_s17 + $0x88] sm:$0xff]  ;;  %v5025_v52 = vld [vmem:[%s9105_s17 + $0x90] sm:$0xff] }
 0x4f3   : > { %5215 = vst [vmem:[%s7280_s18 + $0x10] sm:$0xff] %v5183_v62  ;;  %5216 = vst [vmem:[%s7280_s18 + $0x18] sm:$0xff] %v5184_v40  ;;  %v5058_v25 = vmul.f32 %v9101_v23, %v5019_v11  ;;  %v5093_v49 = vadd.f32 %v9103_v45, %v5054_v46  ;;  %v5094_v41 = vadd.f32 %v9103_v45, %v5055_v58  ;;  %v5026_v47 = vld [vmem:[%s9105_s17 + $0x98] sm:$0xff]  ;;  %v5027_v10 = vld [vmem:[%s9105_s17 + $0xa0] sm:$0xff] }
 0x4f4   : > { %5217 = vst [vmem:[%s7280_s18 + $0x20] sm:$0xff] %v5185_v54  ;;  %5218 = vst [vmem:[%s7280_s18 + $0x28] sm:$0xff] %v5186_v13  ;;  %v5095_v56 = vadd.f32 %v9103_v45, %v5056_v36  ;;  %v5059_v9 = vmul.f32 %v9101_v23, %v5020_v32  ;;  %v5096_v7 = vadd.f32 %v9103_v45, %v5057_v55  ;;  %v5028_v31 = vld [vmem:[%s9105_s17 + $0xa8] sm:$0xff]  ;;  %v5029_v42 = vld [vmem:[%s9105_s17 + $0xb0] sm:$0xff] }
 0x4f5   : > { %5219 = vst [vmem:[%s7280_s18 + $0x30] sm:$0xff] %v5187_v18  ;;  %5220 = vst [vmem:[%s7280_s18 + $0x38] sm:$0xff] %v5188_v27  ;;  %v5097_v12 = vadd.f32 %v9103_v45, %v5058_v25  ;;  %v5060_v15 = vmul.f32 %v9101_v23, %v5021_v5  ;;  %v5061_v20 = vmul.f32 %v9101_v23, %v5022_v17  ;;  %v5030_v62 = vld [vmem:[%s9105_s17 + $0xb8] sm:$0xff]  ;;  %v5133_v11 = vld [vmem:[%s7275_s14 + $0x80] sm:$0xff] }
 0x4f6   : > { %v5157_v30 = vadd.f32 %v5125_v1, %v5093_v49  ;;  %v5158_v53 = vadd.f32 %v5126_v50, %v5094_v41  ;;  %v5159_v59 = vadd.f32 %v5127_v24, %v5095_v56  ;;  %v5098_v8 = vadd.f32 %v9103_v45, %v5059_v9  ;;  %v5134_v40 = vld [vmem:[%s7275_s14 + $0x88] sm:$0xff]  ;;  %v5135_v54 = vld [vmem:[%s7275_s14 + $0x90] sm:$0xff]  ;;  %v5136_v58 = vld [vmem:[%s7275_s14 + $0x98] sm:$0xff] }
 0x4f7   : > { %v5160_v33 = vadd.f32 %v5128_v21, %v5096_v7  ;;  %v5161_v57 = vadd.f32 %v5129_v26, %v5097_v12  ;;  %v5099_v48 = vadd.f32 %v9103_v45, %v5060_v15  ;;  %v5100_v35 = vadd.f32 %v9103_v45, %v5061_v20  ;;  %v5137_v36 = vld [vmem:[%s7275_s14 + $0xa0] sm:$0xff]  ;;  %v5138_v27 = vld [vmem:[%s7275_s14 + $0xa8] sm:$0xff]  ;;  %v5139_v41 = vld [vmem:[%s7275_s14 + $0xb0] sm:$0xff] }
 0x4f8   : > { %v5189_v51 = vmax.f32 %v5157_v30, 0.0  ;;  %v5190_v60 = vmax.f32 %v5158_v53, 0.0  ;;  %v5191_v2 = vmax.f32 %v5159_v59, 0.0  ;;  %v5162_v37 = vadd.f32 %v5130_v22, %v5098_v8  ;;  %v5140_v56 = vld [vmem:[%s7275_s14 + $0xb8] sm:$0xff]  ;;  %v5031_v12 = vld [vmem:[%s9105_s17 + $0xc0] sm:$0xff]  ;;  %v5032_v22 = vld [vmem:[%s9105_s17 + $0xc8] sm:$0xff] }
 0x4f9   : > { %v5192_v0 = vmax.f32 %v5160_v33, 0.0  ;;  %v5193_v29 = vmax.f32 %v5161_v57, 0.0  ;;  %v5163_v34 = vadd.f32 %v5131_v43, %v5099_v48  ;;  %v5164_v16 = vadd.f32 %v5132_v63, %v5100_v35  ;;  %v5033_v15 = vld [vmem:[%s9105_s17 + $0xd0] sm:$0xff]  ;;  %v5034_v8 = vld [vmem:[%s9105_s17 + $0xd8] sm:$0xff]  ;;  %v5035_v43 = vld [vmem:[%s9105_s17 + $0xe0] sm:$0xff] }
 0x4fa   : > { %5221 = vst [vmem:[%s7280_s18 + $0x40] sm:$0xff] %v5189_v51  ;;  %5222 = vst [vmem:[%s7280_s18 + $0x48] sm:$0xff] %v5190_v60  ;;  %v5194_v44 = vmax.f32 %v5162_v37, 0.0  ;;  %v5062_v14 = vmul.f32 %v9101_v23, %v5023_v61  ;;  %v5063_v19 = vmul.f32 %v9101_v23, %v5024_v28  ;;  %v5064_v3 = vmul.f32 %v9101_v23, %v5025_v52  ;;  %v5036_v35 = vld [vmem:[%s9105_s17 + $0xe8] sm:$0xff]  ;;  %v5037_v60 = vld [vmem:[%s9105_s17 + $0xf0] sm:$0xff] }
 0x4fb   : > { %5223 = vst [vmem:[%s7280_s18 + $0x50] sm:$0xff] %v5191_v2  ;;  %5224 = vst [vmem:[%s7280_s18 + $0x58] sm:$0xff] %v5192_v0  ;;  %v5195_v6 = vmax.f32 %v5163_v34, 0.0  ;;  %v5196_v38 = vmax.f32 %v5164_v16, 0.0  ;;  %v5065_v39 = vmul.f32 %v9101_v23, %v5026_v47  ;;  %v5066_v4 = vmul.f32 %v9101_v23, %v5027_v10  ;;  %v5038_v2 = vld [vmem:[%s9105_s17 + $0xf8] sm:$0xff]  ;;  %v5141_v10 = vld [vmem:[%s7275_s14 + $0xc0] sm:$0xff] }
 0x4fc   : > { %5225 = vst [vmem:[%s7280_s18 + $0x60] sm:$0xff] %v5193_v29  ;;  %5226 = vst [vmem:[%s7280_s18 + $0x68] sm:$0xff] %v5194_v44  ;;  %v5101_v32 = vadd.f32 %v9103_v45, %v5062_v14  ;;  %v5102_v13 = vadd.f32 %v9103_v45, %v5063_v19  ;;  %v5103_v46 = vadd.f32 %v9103_v45, %v5064_v3  ;;  %v5142_v0 = vld [vmem:[%s7275_s14 + $0xc8] sm:$0xff]  ;;  %v5143_v29 = vld [vmem:[%s7275_s14 + $0xd0] sm:$0xff] }
 0x4fd   : > { %v5067_v5 = vmul.f32 %v9101_v23, %v5028_v31  ;;  %5227 = vst [vmem:[%s7280_s18 + $0x70] sm:$0xff] %v5195_v6  ;;  %5228 = vst [vmem:[%s7280_s18 + $0x78] sm:$0xff] %v5196_v38  ;;  %v5104_v17 = vadd.f32 %v9103_v45, %v5065_v39  ;;  %v5105_v18 = vadd.f32 %v9103_v45, %v5066_v4  ;;  %v5144_v19 = vld [vmem:[%s7275_s14 + $0xd8] sm:$0xff]  ;;  %v5145_v3 = vld [vmem:[%s7275_s14 + $0xe0] sm:$0xff] }
 0x4fe   : > { %v5068_v1 = vmul.f32 %v9101_v23, %v5029_v42  ;;  %v5069_v50 = vmul.f32 %v9101_v23, %v5030_v62  ;;  %v5165_v24 = vadd.f32 %v5133_v11, %v5101_v32  ;;  %v5166_v55 = vadd.f32 %v5134_v40, %v5102_v13  ;;  %v5146_v38 = vld [vmem:[%s7275_s14 + $0xe8] sm:$0xff]  ;;  %v5147_v13 = vld [vmem:[%s7275_s14 + $0xf0] sm:$0xff] }
 0x4ff   : > { %v5167_v25 = vadd.f32 %v5135_v54, %v5103_v46  ;;  %v5106_v49 = vadd.f32 %v9103_v45, %v5067_v5  ;;  %v5168_v21 = vadd.f32 %v5136_v58, %v5104_v17  ;;  %v5169_v26 = vadd.f32 %v5137_v36, %v5105_v18  ;;  %v5148_v46 = vld [vmem:[%s7275_s14 + $0xf8] sm:$0xff] }
 0x500   : > { %v5107_v9 = vadd.f32 %v9103_v45, %v5068_v1  ;;  %v5108_v7 = vadd.f32 %v9103_v45, %v5069_v50  ;;  %v5197_v20 = vmax.f32 %v5165_v24, 0.0  ;;  %v5198_v30 = vmax.f32 %v5166_v55, 0.0 }
 0x501   : > { %v5199_v53 = vmax.f32 %v5167_v25, 0.0  ;;  %v5170_v59 = vadd.f32 %v5138_v27, %v5106_v49  ;;  %v5200_v63 = vmax.f32 %v5168_v21, 0.0  ;;  %v5201_v33 = vmax.f32 %v5169_v26, 0.0 }
 0x502   : > { %v5171_v57 = vadd.f32 %v5139_v41, %v5107_v9  ;;  %v5172_v48 = vadd.f32 %v5140_v56, %v5108_v7  ;;  %5229 = vst [vmem:[%s7280_s18 + $0x80] sm:$0xff] %v5197_v20  ;;  %5230 = vst [vmem:[%s7280_s18 + $0x88] sm:$0xff] %v5198_v30  ;;  %v5070_v28 = vmul.f32 %v9101_v23, %v5031_v12 }
 0x503   : > { %5231 = vst [vmem:[%s7280_s18 + $0x90] sm:$0xff] %v5199_v53  ;;  %v5202_v61 = vmax.f32 %v5170_v59, 0.0  ;;  %v5071_v52 = vmul.f32 %v9101_v23, %v5032_v22  ;;  %v5072_v51 = vmul.f32 %v9101_v23, %v5033_v15  ;;  %5232 = vst [vmem:[%s7280_s18 + $0x98] sm:$0xff] %v5200_v63  ;;  %v5073_v34 = vmul.f32 %v9101_v23, %v5034_v8 }
 0x504   : > { %5233 = vst [vmem:[%s7280_s18 + $0xa0] sm:$0xff] %v5201_v33  ;;  %v5203_v37 = vmax.f32 %v5171_v57, 0.0  ;;  %v5204_v47 = vmax.f32 %v5172_v48, 0.0  ;;  %v5074_v16 = vmul.f32 %v9101_v23, %v5035_v43  ;;  %v5109_v31 = vadd.f32 %v9103_v45, %v5070_v28 }
 0x505   : > { %5234 = vst [vmem:[%s7280_s18 + $0xa8] sm:$0xff] %v5202_v61  ;;  %v5110_v44 = vadd.f32 %v9103_v45, %v5071_v52  ;;  %v5111_v14 = vadd.f32 %v9103_v45, %v5072_v51  ;;  %v5075_v42 = vmul.f32 %v9101_v23, %v5036_v35  ;;  %v5112_v62 = vadd.f32 %v9103_v45, %v5073_v34 }
 0x506   : > { %5235 = vst [vmem:[%s7280_s18 + $0xb0] sm:$0xff] %v5203_v37  ;;  %5236 = vst [vmem:[%s7280_s18 + $0xb8] sm:$0xff] %v5204_v47  ;;  %v5113_v6 = vadd.f32 %v9103_v45, %v5074_v16  ;;  %v5076_v11 = vmul.f32 %v9101_v23, %v5037_v60  ;;  %v5077_v40 = vmul.f32 %v9101_v23, %v5038_v2 }
 0x507   : > { %v5173_v54 = vadd.f32 %v5141_v10, %v5109_v31  ;;  %v5174_v39 = vadd.f32 %v5142_v0, %v5110_v44  ;;  %v5175_v4 = vadd.f32 %v5143_v29, %v5111_v14  ;;  %v5114_v32 = vadd.f32 %v9103_v45, %v5075_v42 }
 0x508   : > { %v5176_v58 = vadd.f32 %v5144_v19, %v5112_v62  ;;  %v5177_v36 = vadd.f32 %v5145_v3, %v5113_v6  ;;  %v5115_v5 = vadd.f32 %v9103_v45, %v5076_v11  ;;  %v5116_v17 = vadd.f32 %v9103_v45, %v5077_v40 }
 0x509   : > { %v5205_v18 = vmax.f32 %v5173_v54, 0.0  ;;  %v5206_v23 = vmax.f32 %v5174_v39, 0.0  ;;  %v5207_v27 = vmax.f32 %v5175_v4, 0.0  ;;  %v5178_v1 = vadd.f32 %v5146_v38, %v5114_v32 }
 0x50a   : > { %v5208_v50 = vmax.f32 %v5176_v58, 0.0  ;;  %v5209_v24 = vmax.f32 %v5177_v36, 0.0  ;;  %v5179_v55 = vadd.f32 %v5147_v13, %v5115_v5  ;;  %v5180_v25 = vadd.f32 %v5148_v46, %v5116_v17 }
 0x50b   : > { %5237 = vst [vmem:[%s7280_s18 + $0xc0] sm:$0xff] %v5205_v18  ;;  %5238 = vst [vmem:[%s7280_s18 + $0xc8] sm:$0xff] %v5206_v23  ;;  %v5210_v49 = vmax.f32 %v5178_v1, 0.0 }
 0x50c   : > { %5239 = vst [vmem:[%s7280_s18 + $0xd0] sm:$0xff] %v5207_v27  ;;  %5240 = vst [vmem:[%s7280_s18 + $0xd8] sm:$0xff] %v5208_v50  ;;  %v5211_v41 = vmax.f32 %v5179_v55, 0.0  ;;  %v5212_v56 = vmax.f32 %v5180_v25, 0.0 }
 0x50d   : > { %5241 = vst [vmem:[%s7280_s18 + $0xe0] sm:$0xff] %v5209_v24  ;;  %5242 = vst [vmem:[%s7280_s18 + $0xe8] sm:$0xff] %v5210_v49 }
 0x50e   : > { %5243 = vst [vmem:[%s7280_s18 + $0xf0] sm:$0xff] %v5211_v41  ;;  %5244 = vst [vmem:[%s7280_s18 + $0xf8] sm:$0xff] %v5212_v56 }
 0x50f PF: > { %s17_s28 = sadd.s32 1, %s7184_s28   ;;  %s9294_s24 = smov %s7176_s26 }
 0x510   : > { %p14_p4 = scmp.ge.s32.totalorder %s17_s28, 8   ;;  %s9295_s25 = smov %s7180_s27 }
 0x511   : > { %s9296_s26 = smov %s9299_s29  ;;  %s9297_s27 = smov %s9303_s30 }
 0x512   :  { %16 = sbr.rel (!%p14_p4) target bundleno = 3 (0x3), region = 109 }

</bundles_post_ra>
